<compile_context>
chip_gen: v6e
topology: v6e:2x2x1
jax: 0.10.0
libtpu: 0.0.40
codegen_flags: <defaults>
</compile_context>

<pallas_src>
import math
import functools

import jax
import jax.numpy as jnp
from jax.experimental import pallas as pl
from jax.experimental.pallas import tpu as pltpu


# ----------------------------- configuration -------------------------------
B = 8              # batch
D = 128            # rnn_size == input_size == output_size (residual adds need this)
A = 128            # att_size
L = 16             # number of attention regions
NUM_LAYERS = 2
NUM_PARALLELS = 2
OUTPUT_SIZE = 128
DROPOUT = 0.0      # F.dropout(p=0) == identity
BLOCK_NUM = 1      # unused by the forward pass


def _bf16_transcendentals_supported():
    """bf16 VPU/EUP exists on v6e/v7x; keep f32 elementwise math on v5e & older."""
    try:
        kind = jax.devices()[0].device_kind.lower()
    except Exception:
        return False
    return ("v6" in kind) or ("v7" in kind)


# ------------------------------- fused kernel --------------------------------
def _layer_kernel(
    x_ref,        # (B, D)        f32   constant block across layers
    att_ref,      # (B, L, D)     f32   constant block across layers
    prev_c_ref,   # (B, D)        f32   this layer's cell state
    prev_h_ref,   # (B, D)        f32   this layer's hidden state
    att_wa_ref,   # (D, 2A)       bf16  att-bank projection, both modules of layer
    att_wx_ref,   # (D, 2A)       bf16  xt conditioning, both modules of layer
    att_wh_ref,   # (2, D, A)     bf16  h conditioning per module
    att_b_ref,    # (2, 1, A)     f32
    att_wv_ref,   # (2, 1, A)     f32
    lstm_w_ref,   # (3D, 8D)      bf16  [Wx;Wh;Watt] x 2 cores, cols [i0 i1 f0 f1 o0 o1 g0 g1]
    lstm_b_ref,   # (1, 8D)       f32
    proj_w_ref,   # (D, O)        bf16
    proj_b_ref,   # (1, O)        f32
    out_c_ref,    # (B, D)        f32
    out_h_ref,    # (B, D)        f32
    out_lp_ref,   # (B, O)        f32
    carry_ref,    # (B, D)        f32 VMEM scratch: previous layer's top_h
    *, bf16_trans,
):
    f32, bf16 = jnp.float32, jnp.bfloat16
    lid = pl.program_id(0)

    @pl.when(lid == 0)
    def _():
        carry_ref[...] = jnp.zeros_like(carry_ref)

    x = x_ref[...]
    xt = x + carry_ref[...]                    # layer 0: carry == 0 -> xt = x
    prev_c = prev_c_ref[...]
    prev_h = prev_h_ref[...]

    a3 = att_ref[...]                          # (B, L, D) f32
    a2_bf = a3.reshape(B * L, D).astype(bf16)
    xt_bf = xt.astype(bf16)

    # Off the h->attend critical path: bank projection + xt conditioning for
    # BOTH attention modules of this layer in two wide matmuls.
    ap_all = jnp.dot(a2_bf, att_wa_ref[...], preferred_element_type=f32)   # (B*L, 2A)
    xq_all = jnp.dot(xt_bf, att_wx_ref[...], preferred_element_type=f32)   # (B, 2A)

    def attend(m, h):
        """out = sum_l softmax_l( wv . tanh(att_l@Wa + x@Wx + h@Wh + b) ) * att_l."""
        hq = jnp.dot(h.astype(bf16), att_wh_ref[m],
                     preferred_element_type=f32)                           # (B, A)
        cond = (xq_all[:, m * A:(m + 1) * A] + hq + att_b_ref[m])[:, None, :]
        pre = ap_all[:, m * A:(m + 1) * A].reshape(B, L, A) + cond         # (B, L, A)
        if bf16_trans:
            e = jnp.tanh(pre.astype(bf16)).astype(f32)                     # bf16 EUP (v6e/v7x)
        else:
            e = jnp.tanh(pre)                                              # f32 (v5e-safe)
        scores = jnp.sum(e * att_wv_ref[m][None], axis=-1)                 # (B, L) lane-dense
        mx = jnp.max(scores, axis=-1, keepdims=True)
        w = jnp.exp(scores - mx)
        alpha = w * pl.reciprocal(jnp.sum(w, axis=-1, keepdims=True),
                                  approx=True)                             # (B, L)
        return jnp.sum(alpha[:, :, None] * a3, axis=1)                     # (B, D)

    prev_att = attend(0, prev_h)

    # Both parallel LSTM cores in ONE wide-K matmul:
    #   [xt ; prev_h ; att] (B,3D) @ (3D, 8D) -> gates for core0 & core1.
    cat3 = jnp.concatenate([xt_bf, prev_h.astype(bf16), prev_att.astype(bf16)],
                           axis=-1)
    gates = jnp.dot(cat3, lstm_w_ref[...],
                    preferred_element_type=f32) + lstm_b_ref[...]          # (B, 8D) f32

    sig = jax.nn.sigmoid(gates[:, :6 * D])     # [i0 i1 f0 f1 o0 o1]
    tah = jnp.tanh(gates[:, 6 * D:])           # [g0 g1]
    i0, i1 = sig[:, 0 * D:1 * D], sig[:, 1 * D:2 * D]
    f0, f1 = sig[:, 2 * D:3 * D], sig[:, 3 * D:4 * D]
    o0, o1 = sig[:, 4 * D:5 * D], sig[:, 5 * D:6 * D]
    g0, g1 = tah[:, 0 * D:1 * D], tah[:, 1 * D:2 * D]

    c0 = f0 * prev_c + i0 * g0
    c1 = f1 * prev_c + i1 * g1
    next_c = 0.5 * (c0 + c1)                                   # mean over parallel cores
    next_h = 0.5 * (o0 * jnp.tanh(c0) + o1 * jnp.tanh(c1))     # mean over parallel cores

    att_res = attend(1, next_h)
    top_h = att_res + next_h
    # TODO(synk): F.dropout(p>0, training=True) not implemented; DROPOUT==0.0
    # here so dropout is the identity.

    carry_ref[...] = top_h                     # residual input for the next layer

    logits = jnp.dot(top_h.astype(bf16), proj_w_ref[...],
                     preferred_element_type=f32) + proj_b_ref[...]         # (B, O)
    mx = jnp.max(logits, axis=-1, keepdims=True)
    lse = mx + jnp.log(jnp.sum(jnp.exp(logits - mx), axis=-1, keepdims=True))

    out_c_ref[...] = next_c
    out_h_ref[...] = top_h
    out_lp_ref[...] = logits - lse


# ----------------------------- cost estimate ---------------------------------
_FLOPS = NUM_LAYERS * int(
    2 * (B * L) * D * (2 * A)          # att-bank projection (both modules)
    + 2 * B * D * (2 * A)              # xt conditioning (both modules)
    + 2 * (2 * B * D * A)              # h conditioning (one per attend)
    + 2 * B * (3 * D) * (8 * D)        # fused parallel-core LSTM gates
    + 2 * B * D * OUTPUT_SIZE          # projection
)
_TRANSCENDENTALS = NUM_LAYERS * int(
    2 * B * L * A                      # attention tanh energies
    + 2 * B * L                        # attention softmax exp
    + B * 8 * D                        # gate sigmoid/tanh
    + 2 * B * D                        # tanh(next_c) per core
    + B * OUTPUT_SIZE                  # log_softmax exp
)


# ------------------------------ kernel wrapper --------------------------------
def fused_forward(packed, x, att, prev_c, prev_h, *, bf16_trans):
    operands = (
        x, att, prev_c, prev_h,
        packed["att_wa"], packed["att_wx"], packed["att_wh"],
        packed["att_b"], packed["att_wv"],
        packed["lstm_w"], packed["lstm_b"],
        packed["proj_w"], packed["proj_b"],
    )
    out_shape = (
        jax.ShapeDtypeStruct((NUM_LAYERS, B, D), jnp.float32),
        jax.ShapeDtypeStruct((NUM_LAYERS, B, D), jnp.float32),
        jax.ShapeDtypeStruct((NUM_LAYERS, B, OUTPUT_SIZE), jnp.float32),
    )
    in_specs = [
        pl.BlockSpec((B, D), lambda i: (0, 0)),                      # x (layer-invariant)
        pl.BlockSpec((B, L, D), lambda i: (0, 0, 0)),                # att bank (layer-invariant)
        pl.BlockSpec((None, B, D), lambda i: (i, 0, 0)),             # prev_c
        pl.BlockSpec((None, B, D), lambda i: (i, 0, 0)),             # prev_h
        pl.BlockSpec((None, D, 2 * A), lambda i: (i, 0, 0)),         # att_wa
        pl.BlockSpec((None, D, 2 * A), lambda i: (i, 0, 0)),         # att_wx
        pl.BlockSpec((None, 2, D, A), lambda i: (i, 0, 0, 0)),       # att_wh
        pl.BlockSpec((None, 2, 1, A), lambda i: (i, 0, 0, 0)),       # att_b
        pl.BlockSpec((None, 2, 1, A), lambda i: (i, 0, 0, 0)),       # att_wv
        pl.BlockSpec((None, 3 * D, 8 * D), lambda i: (i, 0, 0)),     # lstm_w
        pl.BlockSpec((None, 1, 8 * D), lambda i: (i, 0, 0)),         # lstm_b
        pl.BlockSpec((None, D, OUTPUT_SIZE), lambda i: (i, 0, 0)),   # proj_w
        pl.BlockSpec((None, 1, OUTPUT_SIZE), lambda i: (i, 0, 0)),   # proj_b
    ]
    out_specs = (
        pl.BlockSpec((None, B, D), lambda i: (i, 0, 0)),
        pl.BlockSpec((None, B, D), lambda i: (i, 0, 0)),
        pl.BlockSpec((None, B, OUTPUT_SIZE), lambda i: (i, 0, 0)),
    )
    in_bytes = sum(math.prod(o.shape) * o.dtype.itemsize for o in operands)
    out_bytes = sum(math.prod(s.shape) * s.dtype.itemsize for s in out_shape)
    return pl.pallas_call(
        functools.partial(_layer_kernel, bf16_trans=bf16_trans),
        out_shape=out_shape,
        grid=(NUM_LAYERS,),
        in_specs=in_specs,
        out_specs=out_specs,
        scratch_shapes=[pltpu.VMEM((B, D), jnp.float32)],            # top_h carry
        compiler_params=pltpu.CompilerParams(
            dimension_semantics=("arbitrary",),                      # layers are sequential
            vmem_limit_bytes=32 * 1024 * 1024),
        cost_estimate=pl.CostEstimate(
            flops=_FLOPS,
            transcendentals=_TRANSCENDENTALS,
            bytes_accessed=int(in_bytes + out_bytes)),
    )(*operands)


# ------------------------------ parameter init -------------------------------
def _uniform(key, shape, fan_in):
    bound = 1.0 / math.sqrt(fan_in)
    return jax.random.uniform(key, shape, jnp.float32, -bound, bound)


def init_params(key):
    """Per-module params mirroring the original nn.ModuleList structure."""
    params = {"cores": [], "attens": [], "projs": []}
    for _ in range(NUM_LAYERS * NUM_PARALLELS):
        key, k1, k2, k3, k4 = jax.random.split(key, 5)
        params["cores"].append({
            "wx": _uniform(k1, (D, 4 * D), D),
            "wh": _uniform(k2, (D, 4 * D), D),
            "wa": _uniform(k3, (D, 4 * D), D),
            "b":  _uniform(k4, (1, 4 * D), D),
        })
    for _ in range(NUM_LAYERS * 2):
        key, k1, k2, k3, k4, k5 = jax.random.split(key, 6)
        params["attens"].append({
            "wx": _uniform(k1, (D, A), D),
            "wh": _uniform(k2, (D, A), D),
            "wa": _uniform(k3, (D, A), D),
            "b":  _uniform(k4, (1, A), D),
            "wv": _uniform(k5, (1, A), A),
        })
    for _ in range(NUM_LAYERS):
        key, k1, k2 = jax.random.split(key, 3)
        params["projs"].append({
            "w": _uniform(k1, (D, OUTPUT_SIZE), D),
            "b": _uniform(k2, (1, OUTPUT_SIZE), D),
        })
    return params


def pack_params(params):
    """Pack per-module weights into the per-layer, MXU-friendly layout (bf16 weights)."""
    bf16 = jnp.bfloat16
    att_wa, att_wx, att_wh, att_b, att_wv = [], [], [], [], []
    for l in range(NUM_LAYERS):
        mods = [params["attens"][2 * l + m] for m in range(2)]
        att_wa.append(jnp.concatenate([p["wa"] for p in mods], axis=1))   # (D, 2A)
        att_wx.append(jnp.concatenate([p["wx"] for p in mods], axis=1))   # (D, 2A)
        att_wh.append(jnp.stack([p["wh"] for p in mods]))                 # (2, D, A)
        att_b.append(jnp.stack([p["b"] for p in mods]))                   # (2, 1, A)
        att_wv.append(jnp.stack([p["wv"] for p in mods]))                 # (2, 1, A)

    # LSTM: per layer, rows = [Wx; Wh; Watt], columns reordered to
    # [i0 i1 f0 f1 o0 o1 g0 g1] across the two parallel cores.
    lstm_w, lstm_b = [], []
    for l in range(NUM_LAYERS):
        cores = [params["cores"][l * NUM_PARALLELS + j] for j in range(NUM_PARALLELS)]
        ws = [jnp.concatenate([c["wx"], c["wh"], c["wa"]], axis=0) for c in cores]  # (3D,4D)
        cols, bcols = [], []
        for k in range(4):                       # gate order: i, f, o, g
            for j in range(NUM_PARALLELS):
                cols.append(ws[j][:, k * D:(k + 1) * D])
                bcols.append(cores[j]["b"][:, k * D:(k + 1) * D])
        lstm_w.append(jnp.concatenate(cols, axis=1))    # (3D, 8D)
        lstm_b.append(jnp.concatenate(bcols, axis=1))   # (1, 8D)

    return {
        "att_wa": jnp.stack(att_wa).astype(bf16),           # (layers, D, 2A)
        "att_wx": jnp.stack(att_wx).astype(bf16),           # (layers, D, 2A)
        "att_wh": jnp.stack(att_wh).astype(bf16),           # (layers, 2, D, A)
        "att_b":  jnp.stack(att_b),                          # (layers, 2, 1, A) f32
        "att_wv": jnp.stack(att_wv),                         # (layers, 2, 1, A) f32
        "lstm_w": jnp.stack(lstm_w).astype(bf16),            # (layers, 3D, 8D)
        "lstm_b": jnp.stack(lstm_b),                          # (layers, 1, 8D) f32
        "proj_w": jnp.stack([p["w"] for p in params["projs"]]).astype(bf16),
        "proj_b": jnp.stack([p["b"] for p in params["projs"]]),
    }


# --------------------------------- forward -----------------------------------
def forward(packed, x, att, inputs, *, bf16_trans):
    """Mirrors LSTM_DOUBLE_ATT_STACK_PARALLEL_MUL_OUT_ATT_LSTM_MUL.forward."""
    prev_c = jnp.stack([inputs[2 * i] for i in range(NUM_LAYERS)])      # (layers, B, D)
    prev_h = jnp.stack([inputs[2 * i + 1] for i in range(NUM_LAYERS)])  # (layers, B, D)
    next_c, top_h, logprobs = fused_forward(packed, x, att, prev_c, prev_h,
                                            bf16_trans=bf16_trans)
    outputs = []
    for i in range(NUM_LAYERS):
        outputs.append(next_c[i])
        outputs.append(top_h[i])
    return outputs, [logprobs[i] for i in range(NUM_LAYERS)]


# --------------------------- pure-JAX reference --------------------------------
def forward_reference(packed, x, att, inputs, bf16_trans):
    """Same math / same packing as the kernel, but plain JAX (for tolerance check)."""
    f32, bf16 = jnp.float32, jnp.bfloat16
    a3 = att
    a2_bf = a3.reshape(B * L, D).astype(bf16)
    outputs, logprobs = [], []
    top_h_prev = None
    for i in range(NUM_LAYERS):
        prev_c = inputs[2 * i]
        prev_h = inputs[2 * i + 1]
        xt = x if i == 0 else x + top_h_prev
        xt_bf = xt.astype(bf16)
        ap_all = jnp.dot(a2_bf, packed["att_wa"][i], preferred_element_type=f32)
        xq_all = jnp.dot(xt_bf, packed["att_wx"][i], preferred_element_type=f32)

        def attend(m, h):
            hq = jnp.dot(h.astype(bf16), packed["att_wh"][i, m],
                         preferred_element_type=f32)
            cond = (xq_all[:, m * A:(m + 1) * A] + hq + packed["att_b"][i, m])[:, None, :]
            pre = ap_all[:, m * A:(m + 1) * A].reshape(B, L, A) + cond
            e = jnp.tanh(pre.astype(bf16)).astype(f32) if bf16_trans else jnp.tanh(pre)
            scores = jnp.sum(e * packed["att_wv"][i, m][None], axis=-1)
            mx = jnp.max(scores, axis=-1, keepdims=True)
            w = jnp.exp(scores - mx)
            alpha = w / jnp.sum(w, axis=-1, keepdims=True)
            return jnp.sum(alpha[:, :, None] * a3, axis=1)

        prev_att = attend(0, prev_h)
        cat3 = jnp.concatenate([xt_bf, prev_h.astype(bf16), prev_att.astype(bf16)],
                               axis=-1)
        gates = jnp.dot(cat3, packed["lstm_w"][i],
                        preferred_element_type=f32) + packed["lstm_b"][i]
        sig = jax.nn.sigmoid(gates[:, :6 * D])
        tah = jnp.tanh(gates[:, 6 * D:])
        i0, i1 = sig[:, :D], sig[:, D:2 * D]
        f0, f1 = sig[:, 2 * D:3 * D], sig[:, 3 * D:4 * D]
        o0, o1 = sig[:, 4 * D:5 * D], sig[:, 5 * D:6 * D]
        g0, g1 = tah[:, :D], tah[:, D:]
        c0 = f0 * prev_c + i0 * g0
        c1 = f1 * prev_c + i1 * g1
        next_c = 0.5 * (c0 + c1)
        next_h = 0.5 * (o0 * jnp.tanh(c0) + o1 * jnp.tanh(c1))
        att_res = attend(1, next_h)
        top_h = att_res + next_h
        logits = jnp.dot(top_h.astype(bf16), packed["proj_w"][i],
                         preferred_element_type=f32) + packed["proj_b"][i]
        outputs.append(next_c)
        outputs.append(top_h)
        logprobs.append(jax.nn.log_softmax(logits, axis=-1))
        top_h_prev = top_h
    return outputs, logprobs


# ----------------------------------- main -------------------------------------
if __name__ == "__main__":
    key = jax.random.PRNGKey(0)
    key, kp, kx, ka, *kin = jax.random.split(key, 4 + 2 * NUM_LAYERS)

    params = init_params(kp)
    packed = pack_params(params)
    x = jax.random.normal(kx, (B, D), jnp.float32)
    att = jax.random.normal(ka, (B, L, D), jnp.float32)
    inputs = [jax.random.normal(k, (B, D), jnp.float32) for k in kin]

    use_bf16 = _bf16_transcendentals_supported()

    fwd = jax.jit(functools.partial(forward, packed, bf16_trans=use_bf16))
    outputs, logprobs = fwd(x, att, inputs)
    jax.block_until_ready((outputs, logprobs))

    # Shape / sanity checks.
    assert len(outputs) == 2 * NUM_LAYERS and len(logprobs) == NUM_LAYERS
    assert all(o.shape == (B, D) for o in outputs)
    assert all(lp.shape == (B, OUTPUT_SIZE) for lp in logprobs)
    assert bool(jnp.allclose(jnp.sum(jnp.exp(logprobs[0]), axis=-1), 1.0, atol=1e-4))
    assert all(bool(jnp.all(jnp.isfinite(o))) for o in outputs)

    # Tolerance check against a pure-JAX reference using the same packed weights
    # (differences: Pallas EUP approx reciprocal / bf16 tanh vs XLA's versions).
    ref_outputs, ref_logprobs = forward_reference(packed, x, att, inputs, use_bf16)
    assert bool(jnp.allclose(jnp.stack(outputs), jnp.stack(ref_outputs), atol=5e-2)), \
        "state mismatch vs pure-JAX reference"
    assert bool(jnp.allclose(jnp.stack(logprobs), jnp.stack(ref_logprobs), atol=5e-2)), \
        "logprob mismatch vs pure-JAX reference"

    print("KERNEL_OK")
</pallas_src>

<mosaic_0001>
module attributes {stable_mosaic.version = 11 : i64} {
  func.func @_layer_kernel(%arg0: i32, %arg1: memref<8x128xf32, #tpu.memory_space<vmem>>, %arg2: memref<8x16x128xf32, #tpu.memory_space<vmem>>, %arg3: memref<1x8x128xf32, #tpu.memory_space<vmem>>, %arg4: memref<1x8x128xf32, #tpu.memory_space<vmem>>, %arg5: memref<1x128x256xbf16, #tpu.memory_space<vmem>>, %arg6: memref<1x128x256xbf16, #tpu.memory_space<vmem>>, %arg7: memref<1x2x128x128xbf16, #tpu.memory_space<vmem>>, %arg8: memref<1x2x1x128xf32, #tpu.memory_space<vmem>>, %arg9: memref<1x2x1x128xf32, #tpu.memory_space<vmem>>, %arg10: memref<1x384x1024xbf16, #tpu.memory_space<vmem>>, %arg11: memref<1x1x1024xf32, #tpu.memory_space<vmem>>, %arg12: memref<1x128x128xbf16, #tpu.memory_space<vmem>>, %arg13: memref<1x1x128xf32, #tpu.memory_space<vmem>>, %arg14: memref<1x8x128xf32, #tpu.memory_space<vmem>>, %arg15: memref<1x8x128xf32, #tpu.memory_space<vmem>>, %arg16: memref<1x8x128xf32, #tpu.memory_space<vmem>>, %arg17: memref<8x128xf32, #tpu.memory_space<vmem>>) attributes {dimension_semantics = [#tpu.dimension_semantics<arbitrary>], iteration_bounds = array<i64: 2>, scalar_prefetch = 0 : i64, scratch_operands = 1 : i64, tpu.core_type = #tpu.core_type<tc>, window_params = [{pipeline_mode = #tpu.pipeline_mode<synchronous>, transform_indices = @transform_0, window_bounds = array<i64: 8, 128>}, {pipeline_mode = #tpu.pipeline_mode<synchronous>, transform_indices = @transform_1, window_bounds = array<i64: 8, 16, 128>}, {transform_indices = @transform_2, window_bounds = array<i64: 1, 8, 128>}, {transform_indices = @transform_3, window_bounds = array<i64: 1, 8, 128>}, {transform_indices = @transform_4, window_bounds = array<i64: 1, 128, 256>}, {transform_indices = @transform_5, window_bounds = array<i64: 1, 128, 256>}, {transform_indices = @transform_6, window_bounds = array<i64: 1, 2, 128, 128>}, {transform_indices = @transform_7, window_bounds = array<i64: 1, 2, 1, 128>}, {transform_indices = @transform_8, window_bounds = array<i64: 1, 2, 1, 128>}, {transform_indices = @transform_9, window_bounds = array<i64: 1, 384, 1024>}, {transform_indices = @transform_10, window_bounds = array<i64: 1, 1, 1024>}, {transform_indices = @transform_11, window_bounds = array<i64: 1, 128, 128>}, {transform_indices = @transform_12, window_bounds = array<i64: 1, 1, 128>}, {transform_indices = @transform_13, window_bounds = array<i64: 1, 8, 128>}, {transform_indices = @transform_14, window_bounds = array<i64: 1, 8, 128>}, {transform_indices = @transform_15, window_bounds = array<i64: 1, 8, 128>}]} {
    %c0_i32 = arith.constant 0 : i32
    %0 = arith.cmpi eq, %arg0, %c0_i32 : i32
    %1 = arith.extui %0 : i1 to i32
    %c0_i32_0 = arith.constant 0 : i32
    %2 = arith.cmpi ne, %1, %c0_i32_0 : i32
    scf.if %2 {
      %cst_83 = arith.constant 0.000000e+00 : f32
      %164 = vector.broadcast %cst_83 : f32 to vector<8x128xf32>
      %c0_84 = arith.constant 0 : index
      %c0_85 = arith.constant 0 : index
      %165 = vector.load %arg17[%c0_84, %c0_85] : memref<8x128xf32, #tpu.memory_space<vmem>>, vector<8x128xf32>
      tpu.vector_store %arg17[%c0_84, %c0_85], %164 {strides = array<i32>} : memref<8x128xf32, #tpu.memory_space<vmem>>, vector<8x128xf32>,
    } else {
    }
    %c0 = arith.constant 0 : index
    %c0_1 = arith.constant 0 : index
    %3 = vector.load %arg1[%c0, %c0_1] : memref<8x128xf32, #tpu.memory_space<vmem>>, vector<8x128xf32>
    %c0_2 = arith.constant 0 : index
    %c0_3 = arith.constant 0 : index
    %4 = vector.load %arg17[%c0_2, %c0_3] : memref<8x128xf32, #tpu.memory_space<vmem>>, vector<8x128xf32>
    %5 = arith.addf %3, %4 : vector<8x128xf32>
    %c0_4 = arith.constant 0 : index
    %c0_5 = arith.constant 0 : index
    %c0_6 = arith.constant 0 : index
    %6 = vector.load %arg3[%c0_4, %c0_5, %c0_6] : memref<1x8x128xf32, #tpu.memory_space<vmem>>, vector<1x8x128xf32>
    %7 = vector.shape_cast %6 : vector<1x8x128xf32> to vector<8x128xf32>
    %c0_7 = arith.constant 0 : index
    %c0_8 = arith.constant 0 : index
    %c0_9 = arith.constant 0 : index
    %8 = vector.load %arg4[%c0_7, %c0_8, %c0_9] : memref<1x8x128xf32, #tpu.memory_space<vmem>>, vector<1x8x128xf32>
    %9 = vector.shape_cast %8 : vector<1x8x128xf32> to vector<8x128xf32>
    %c0_10 = arith.constant 0 : index
    %c0_11 = arith.constant 0 : index
    %c0_12 = arith.constant 0 : index
    %10 = vector.load %arg2[%c0_10, %c0_11, %c0_12] : memref<8x16x128xf32, #tpu.memory_space<vmem>>, vector<8x16x128xf32>
    %11 = vector.shape_cast %10 : vector<8x16x128xf32> to vector<128x128xf32>
    %12 = arith.truncf %11 : vector<128x128xf32> to vector<128x128xbf16>
    %13 = arith.truncf %5 : vector<8x128xf32> to vector<8x128xbf16>
    %c0_13 = arith.constant 0 : index
    %c0_14 = arith.constant 0 : index
    %c0_15 = arith.constant 0 : index
    %14 = vector.load %arg5[%c0_13, %c0_14, %c0_15] : memref<1x128x256xbf16, #tpu.memory_space<vmem>>, vector<1x128x256xbf16>
    %15 = vector.shape_cast %14 : vector<1x128x256xbf16> to vector<128x256xbf16>
    %cst = arith.constant dense<0.000000e+00> : vector<128x256xf32>
    %16 = tpu.matmul %12, %15, %cst {dimension_numbers = #tpu.dot_dimension_numbers<[1], [0], [0], [1], [0, 0, 1, 1], [], []>} : vector<128x128xbf16>, vector<128x256xbf16>, vector<128x256xf32> -> vector<128x256xf32>
    %c0_16 = arith.constant 0 : index
    %c0_17 = arith.constant 0 : index
    %c0_18 = arith.constant 0 : index
    %17 = vector.load %arg6[%c0_16, %c0_17, %c0_18] : memref<1x128x256xbf16, #tpu.memory_space<vmem>>, vector<1x128x256xbf16>
    %18 = vector.shape_cast %17 : vector<1x128x256xbf16> to vector<128x256xbf16>
    %cst_19 = arith.constant dense<0.000000e+00> : vector<8x256xf32>
    %19 = tpu.matmul %13, %18, %cst_19 {dimension_numbers = #tpu.dot_dimension_numbers<[1], [0], [0], [1], [0, 0, 1, 1], [], []>} : vector<8x128xbf16>, vector<128x256xbf16>, vector<8x256xf32> -> vector<8x256xf32>
    %20 = arith.truncf %9 : vector<8x128xf32> to vector<8x128xbf16>
    %c0_20 = arith.constant 0 : index
    %c0_21 = arith.constant 0 : index
    %c0_22 = arith.constant 0 : index
    %c0_23 = arith.constant 0 : index
    %21 = vector.load %arg7[%c0_20, %c0_21, %c0_22, %c0_23] : memref<1x2x128x128xbf16, #tpu.memory_space<vmem>>, vector<1x1x128x128xbf16>
    %22 = vector.shape_cast %21 : vector<1x1x128x128xbf16> to vector<128x128xbf16>
    %cst_24 = arith.constant dense<0.000000e+00> : vector<8x128xf32>
    %23 = tpu.matmul %20, %22, %cst_24 {dimension_numbers = #tpu.dot_dimension_numbers<[1], [0], [0], [1], [0, 0, 1, 1], [], []>} : vector<8x128xbf16>, vector<128x128xbf16>, vector<8x128xf32> -> vector<8x128xf32>
    %24 = vector.extract_strided_slice %19 {offsets = [0, 0], sizes = [8, 128], strides = [1, 1]} : vector<8x256xf32> to vector<8x128xf32>
    %25 = arith.addf %24, %23 : vector<8x128xf32>
    %c0_25 = arith.constant 0 : index
    %c0_26 = arith.constant 0 : index
    %c0_27 = arith.constant 0 : index
    %c0_28 = arith.constant 0 : index
    %26 = vector.load %arg8[%c0_25, %c0_26, %c0_27, %c0_28] : memref<1x2x1x128xf32, #tpu.memory_space<vmem>>, vector<1x1x1x128xf32>
    %27 = vector.shape_cast %26 : vector<1x1x1x128xf32> to vector<1x128xf32>
    %28 = vector.broadcast %27 : vector<1x128xf32> to vector<8x128xf32>
    %29 = arith.addf %25, %28 : vector<8x128xf32>
    %30 = vector.shape_cast %29 : vector<8x128xf32> to vector<8x1x128xf32>
    %31 = vector.extract_strided_slice %16 {offsets = [0, 0], sizes = [128, 128], strides = [1, 1]} : vector<128x256xf32> to vector<128x128xf32>
    %32 = vector.shape_cast %31 : vector<128x128xf32> to vector<8x16x128xf32>
    %33 = vector.broadcast %30 : vector<8x1x128xf32> to vector<8x16x128xf32>
    %34 = arith.addf %32, %33 : vector<8x16x128xf32>
    %35 = math.tanh %34 : vector<8x16x128xf32>
    %c0_29 = arith.constant 0 : index
    %c0_30 = arith.constant 0 : index
    %c0_31 = arith.constant 0 : index
    %c0_32 = arith.constant 0 : index
    %36 = vector.load %arg9[%c0_29, %c0_30, %c0_31, %c0_32] : memref<1x2x1x128xf32, #tpu.memory_space<vmem>>, vector<1x1x1x128xf32>
    %37 = vector.shape_cast %36 : vector<1x1x1x128xf32> to vector<1x128xf32>
    %38 = vector.shape_cast %37 : vector<1x128xf32> to vector<1x1x128xf32>
    %39 = vector.broadcast %38 : vector<1x1x128xf32> to vector<8x16x128xf32>
    %40 = arith.mulf %35, %39 : vector<8x16x128xf32>
    %cst_33 = arith.constant dense<0.000000e+00> : vector<8x16xf32>
    %41 = vector.multi_reduction <add>, %40, %cst_33 [2] : vector<8x16x128xf32> to vector<8x16xf32>
    %cst_34 = arith.constant dense<0xFF800000> : vector<8xf32>
    %42 = vector.multi_reduction <maximumf>, %41, %cst_34 [1] : vector<8x16xf32> to vector<8xf32>
    %43 = vector.shape_cast %42 : vector<8xf32> to vector<8x1xf32>
    %44 = vector.broadcast %43 : vector<8x1xf32> to vector<8x16xf32>
    %45 = arith.subf %41, %44 : vector<8x16xf32>
    %46 = math.exp %45 : vector<8x16xf32>
    %cst_35 = arith.constant dense<0.000000e+00> : vector<8xf32>
    %47 = vector.multi_reduction <add>, %46, %cst_35 [1] : vector<8x16xf32> to vector<8xf32>
    %48 = vector.shape_cast %47 : vector<8xf32> to vector<8x1xf32>
    %49 = tpu.reciprocal %48 {approx = true} : vector<8x1xf32> -> vector<8x1xf32>
    %50 = vector.broadcast %49 : vector<8x1xf32> to vector<8x16xf32>
    %51 = arith.mulf %46, %50 : vector<8x16xf32>
    %52 = vector.shape_cast %51 : vector<8x16xf32> to vector<8x16x1xf32>
    %53 = vector.broadcast %52 : vector<8x16x1xf32> to vector<8x16x128xf32>
    %54 = arith.mulf %53, %10 : vector<8x16x128xf32>
    %cst_36 = arith.constant dense<0.000000e+00> : vector<8x128xf32>
    %55 = vector.multi_reduction <add>, %54, %cst_36 [1] : vector<8x16x128xf32> to vector<8x128xf32>
    %56 = arith.truncf %9 : vector<8x128xf32> to vector<8x128xbf16>
    %57 = arith.truncf %55 : vector<8x128xf32> to vector<8x128xbf16>
    %58 = tpu.concatenate %13, %56, %57 in 1 : vector<8x128xbf16>, vector<8x128xbf16>, vector<8x128xbf16> -> vector<8x384xbf16>
    %c0_37 = arith.constant 0 : index
    %c0_38 = arith.constant 0 : index
    %c0_39 = arith.constant 0 : index
    %59 = vector.load %arg10[%c0_37, %c0_38, %c0_39] : memref<1x384x1024xbf16, #tpu.memory_space<vmem>>, vector<1x384x1024xbf16>
    %60 = vector.shape_cast %59 : vector<1x384x1024xbf16> to vector<384x1024xbf16>
    %cst_40 = arith.constant dense<0.000000e+00> : vector<8x1024xf32>
    %61 = tpu.matmul %58, %60, %cst_40 {dimension_numbers = #tpu.dot_dimension_numbers<[1], [0], [0], [1], [0, 0, 1, 1], [], []>} : vector<8x384xbf16>, vector<384x1024xbf16>, vector<8x1024xf32> -> vector<8x1024xf32>
    %c0_41 = arith.constant 0 : index
    %c0_42 = arith.constant 0 : index
    %c0_43 = arith.constant 0 : index
    %62 = vector.load %arg11[%c0_41, %c0_42, %c0_43] : memref<1x1x1024xf32, #tpu.memory_space<vmem>>, vector<1x1x1024xf32>
    %63 = vector.shape_cast %62 : vector<1x1x1024xf32> to vector<1x1024xf32>
    %64 = vector.broadcast %63 : vector<1x1024xf32> to vector<8x1024xf32>
    %65 = arith.addf %61, %64 : vector<8x1024xf32>
    %66 = vector.extract_strided_slice %65 {offsets = [0, 0], sizes = [8, 768], strides = [1, 1]} : vector<8x1024xf32> to vector<8x768xf32>
    %67 = arith.negf %66 : vector<8x768xf32>
    %68 = math.exp %67 : vector<8x768xf32>
    %cst_44 = arith.constant 1.000000e+00 : f32
    %69 = vector.broadcast %cst_44 : f32 to vector<8x768xf32>
    %70 = arith.addf %69, %68 : vector<8x768xf32>
    %71 = arith.divf %69, %70 : vector<8x768xf32>
    %72 = vector.extract_strided_slice %65 {offsets = [0, 768], sizes = [8, 256], strides = [1, 1]} : vector<8x1024xf32> to vector<8x256xf32>
    %73 = math.tanh %72 : vector<8x256xf32>
    %74 = vector.extract_strided_slice %71 {offsets = [0, 0], sizes = [8, 128], strides = [1, 1]} : vector<8x768xf32> to vector<8x128xf32>
    %75 = vector.extract_strided_slice %71 {offsets = [0, 128], sizes = [8, 128], strides = [1, 1]} : vector<8x768xf32> to vector<8x128xf32>
    %76 = vector.extract_strided_slice %71 {offsets = [0, 256], sizes = [8, 128], strides = [1, 1]} : vector<8x768xf32> to vector<8x128xf32>
    %77 = vector.extract_strided_slice %71 {offsets = [0, 384], sizes = [8, 128], strides = [1, 1]} : vector<8x768xf32> to vector<8x128xf32>
    %78 = vector.extract_strided_slice %71 {offsets = [0, 512], sizes = [8, 128], strides = [1, 1]} : vector<8x768xf32> to vector<8x128xf32>
    %79 = vector.extract_strided_slice %71 {offsets = [0, 640], sizes = [8, 128], strides = [1, 1]} : vector<8x768xf32> to vector<8x128xf32>
    %80 = vector.extract_strided_slice %73 {offsets = [0, 0], sizes = [8, 128], strides = [1, 1]} : vector<8x256xf32> to vector<8x128xf32>
    %81 = vector.extract_strided_slice %73 {offsets = [0, 128], sizes = [8, 128], strides = [1, 1]} : vector<8x256xf32> to vector<8x128xf32>
    %82 = arith.mulf %76, %7 : vector<8x128xf32>
    %83 = arith.mulf %74, %80 : vector<8x128xf32>
    %84 = arith.addf %82, %83 : vector<8x128xf32>
    %85 = arith.mulf %77, %7 : vector<8x128xf32>
    %86 = arith.mulf %75, %81 : vector<8x128xf32>
    %87 = arith.addf %85, %86 : vector<8x128xf32>
    %88 = arith.addf %84, %87 : vector<8x128xf32>
    %cst_45 = arith.constant 5.000000e-01 : f32
    %89 = vector.broadcast %cst_45 : f32 to vector<8x128xf32>
    %90 = arith.mulf %89, %88 : vector<8x128xf32>
    %91 = math.tanh %84 : vector<8x128xf32>
    %92 = arith.mulf %78, %91 : vector<8x128xf32>
    %93 = math.tanh %87 : vector<8x128xf32>
    %94 = arith.mulf %79, %93 : vector<8x128xf32>
    %95 = arith.addf %92, %94 : vector<8x128xf32>
    %cst_46 = arith.constant 5.000000e-01 : f32
    %96 = vector.broadcast %cst_46 : f32 to vector<8x128xf32>
    %97 = arith.mulf %96, %95 : vector<8x128xf32>
    %98 = arith.truncf %97 : vector<8x128xf32> to vector<8x128xbf16>
    %c0_47 = arith.constant 0 : index
    %c1 = arith.constant 1 : index
    %c0_48 = arith.constant 0 : index
    %c0_49 = arith.constant 0 : index
    %99 = vector.load %arg7[%c0_47, %c1, %c0_48, %c0_49] : memref<1x2x128x128xbf16, #tpu.memory_space<vmem>>, vector<1x1x128x128xbf16>
    %100 = vector.shape_cast %99 : vector<1x1x128x128xbf16> to vector<128x128xbf16>
    %cst_50 = arith.constant dense<0.000000e+00> : vector<8x128xf32>
    %101 = tpu.matmul %98, %100, %cst_50 {dimension_numbers = #tpu.dot_dimension_numbers<[1], [0], [0], [1], [0, 0, 1, 1], [], []>} : vector<8x128xbf16>, vector<128x128xbf16>, vector<8x128xf32> -> vector<8x128xf32>
    %102 = vector.extract_strided_slice %19 {offsets = [0, 128], sizes = [8, 128], strides = [1, 1]} : vector<8x256xf32> to vector<8x128xf32>
    %103 = arith.addf %102, %101 : vector<8x128xf32>
    %c0_51 = arith.constant 0 : index
    %c1_52 = arith.constant 1 : index
    %c0_53 = arith.constant 0 : index
    %c0_54 = arith.constant 0 : index
    %104 = vector.load %arg8[%c0_51, %c1_52, %c0_53, %c0_54] : memref<1x2x1x128xf32, #tpu.memory_space<vmem>>, vector<1x1x1x128xf32>
    %105 = vector.shape_cast %104 : vector<1x1x1x128xf32> to vector<1x128xf32>
    %106 = vector.broadcast %105 : vector<1x128xf32> to vector<8x128xf32>
    %107 = arith.addf %103, %106 : vector<8x128xf32>
    %108 = vector.shape_cast %107 : vector<8x128xf32> to vector<8x1x128xf32>
    %109 = vector.extract_strided_slice %16 {offsets = [0, 128], sizes = [128, 128], strides = [1, 1]} : vector<128x256xf32> to vector<128x128xf32>
    %110 = vector.shape_cast %109 : vector<128x128xf32> to vector<8x16x128xf32>
    %111 = vector.broadcast %108 : vector<8x1x128xf32> to vector<8x16x128xf32>
    %112 = arith.addf %110, %111 : vector<8x16x128xf32>
    %113 = math.tanh %112 : vector<8x16x128xf32>
    %c0_55 = arith.constant 0 : index
    %c1_56 = arith.constant 1 : index
    %c0_57 = arith.constant 0 : index
    %c0_58 = arith.constant 0 : index
    %114 = vector.load %arg9[%c0_55, %c1_56, %c0_57, %c0_58] : memref<1x2x1x128xf32, #tpu.memory_space<vmem>>, vector<1x1x1x128xf32>
    %115 = vector.shape_cast %114 : vector<1x1x1x128xf32> to vector<1x128xf32>
    %116 = vector.shape_cast %115 : vector<1x128xf32> to vector<1x1x128xf32>
    %117 = vector.broadcast %116 : vector<1x1x128xf32> to vector<8x16x128xf32>
    %118 = arith.mulf %113, %117 : vector<8x16x128xf32>
    %cst_59 = arith.constant dense<0.000000e+00> : vector<8x16xf32>
    %119 = vector.multi_reduction <add>, %118, %cst_59 [2] : vector<8x16x128xf32> to vector<8x16xf32>
    %cst_60 = arith.constant dense<0xFF800000> : vector<8xf32>
    %120 = vector.multi_reduction <maximumf>, %119, %cst_60 [1] : vector<8x16xf32> to vector<8xf32>
    %121 = vector.shape_cast %120 : vector<8xf32> to vector<8x1xf32>
    %122 = vector.broadcast %121 : vector<8x1xf32> to vector<8x16xf32>
    %123 = arith.subf %119, %122 : vector<8x16xf32>
    %124 = math.exp %123 : vector<8x16xf32>
    %cst_61 = arith.constant dense<0.000000e+00> : vector<8xf32>
    %125 = vector.multi_reduction <add>, %124, %cst_61 [1] : vector<8x16xf32> to vector<8xf32>
    %126 = vector.shape_cast %125 : vector<8xf32> to vector<8x1xf32>
    %127 = tpu.reciprocal %126 {approx = true} : vector<8x1xf32> -> vector<8x1xf32>
    %128 = vector.broadcast %127 : vector<8x1xf32> to vector<8x16xf32>
    %129 = arith.mulf %124, %128 : vector<8x16xf32>
    %130 = vector.shape_cast %129 : vector<8x16xf32> to vector<8x16x1xf32>
    %131 = vector.broadcast %130 : vector<8x16x1xf32> to vector<8x16x128xf32>
    %132 = arith.mulf %131, %10 : vector<8x16x128xf32>
    %cst_62 = arith.constant dense<0.000000e+00> : vector<8x128xf32>
    %133 = vector.multi_reduction <add>, %132, %cst_62 [1] : vector<8x16x128xf32> to vector<8x128xf32>
    %134 = arith.addf %133, %97 : vector<8x128xf32>
    %c0_63 = arith.constant 0 : index
    %c0_64 = arith.constant 0 : index
    %135 = vector.load %arg17[%c0_63, %c0_64] : memref<8x128xf32, #tpu.memory_space<vmem>>, vector<8x128xf32>
    tpu.vector_store %arg17[%c0_63, %c0_64], %134 {strides = array<i32>} : memref<8x128xf32, #tpu.memory_space<vmem>>, vector<8x128xf32>,
    %136 = arith.truncf %134 : vector<8x128xf32> to vector<8x128xbf16>
    %c0_65 = arith.constant 0 : index
    %c0_66 = arith.constant 0 : index
    %c0_67 = arith.constant 0 : index
    %137 = vector.load %arg12[%c0_65, %c0_66, %c0_67] : memref<1x128x128xbf16, #tpu.memory_space<vmem>>, vector<1x128x128xbf16>
    %138 = vector.shape_cast %137 : vector<1x128x128xbf16> to vector<128x128xbf16>
    %cst_68 = arith.constant dense<0.000000e+00> : vector<8x128xf32>
    %139 = tpu.matmul %136, %138, %cst_68 {dimension_numbers = #tpu.dot_dimension_numbers<[1], [0], [0], [1], [0, 0, 1, 1], [], []>} : vector<8x128xbf16>, vector<128x128xbf16>, vector<8x128xf32> -> vector<8x128xf32>
    %c0_69 = arith.constant 0 : index
    %c0_70 = arith.constant 0 : index
    %c0_71 = arith.constant 0 : index
    %140 = vector.load %arg13[%c0_69, %c0_70, %c0_71] : memref<1x1x128xf32, #tpu.memory_space<vmem>>, vector<1x1x128xf32>
    %141 = vector.shape_cast %140 : vector<1x1x128xf32> to vector<1x128xf32>
    %142 = vector.broadcast %141 : vector<1x128xf32> to vector<8x128xf32>
    %143 = arith.addf %139, %142 : vector<8x128xf32>
    %cst_72 = arith.constant dense<0xFF800000> : vector<8xf32>
    %144 = vector.multi_reduction <maximumf>, %143, %cst_72 [1] : vector<8x128xf32> to vector<8xf32>
    %145 = vector.shape_cast %144 : vector<8xf32> to vector<8x1xf32>
    %146 = vector.broadcast %145 : vector<8x1xf32> to vector<8x128xf32>
    %147 = arith.subf %143, %146 : vector<8x128xf32>
    %148 = math.exp %147 : vector<8x128xf32>
    %cst_73 = arith.constant dense<0.000000e+00> : vector<8xf32>
    %149 = vector.multi_reduction <add>, %148, %cst_73 [1] : vector<8x128xf32> to vector<8xf32>
    %150 = vector.shape_cast %149 : vector<8xf32> to vector<8x1xf32>
    %151 = math.log %150 : vector<8x1xf32>
    %152 = arith.addf %145, %151 : vector<8x1xf32>
    %c0_74 = arith.constant 0 : index
    %c0_75 = arith.constant 0 : index
    %c0_76 = arith.constant 0 : index
    %153 = vector.load %arg14[%c0_74, %c0_75, %c0_76] : memref<1x8x128xf32, #tpu.memory_space<vmem>>, vector<1x8x128xf32>
    %154 = vector.shape_cast %153 : vector<1x8x128xf32> to vector<8x128xf32>
    %155 = vector.shape_cast %90 : vector<8x128xf32> to vector<1x8x128xf32>
    tpu.vector_store %arg14[%c0_74, %c0_75, %c0_76], %155 {strides = array<i32>} : memref<1x8x128xf32, #tpu.memory_space<vmem>>, vector<1x8x128xf32>,
    %c0_77 = arith.constant 0 : index
    %c0_78 = arith.constant 0 : index
    %c0_79 = arith.constant 0 : index
    %156 = vector.load %arg15[%c0_77, %c0_78, %c0_79] : memref<1x8x128xf32, #tpu.memory_space<vmem>>, vector<1x8x128xf32>
    %157 = vector.shape_cast %156 : vector<1x8x128xf32> to vector<8x128xf32>
    %158 = vector.shape_cast %134 : vector<8x128xf32> to vector<1x8x128xf32>
    tpu.vector_store %arg15[%c0_77, %c0_78, %c0_79], %158 {strides = array<i32>} : memref<1x8x128xf32, #tpu.memory_space<vmem>>, vector<1x8x128xf32>,
    %159 = vector.broadcast %152 : vector<8x1xf32> to vector<8x128xf32>
    %160 = arith.subf %143, %159 : vector<8x128xf32>
    %c0_80 = arith.constant 0 : index
    %c0_81 = arith.constant 0 : index
    %c0_82 = arith.constant 0 : index
    %161 = vector.load %arg16[%c0_80, %c0_81, %c0_82] : memref<1x8x128xf32, #tpu.memory_space<vmem>>, vector<1x8x128xf32>
    %162 = vector.shape_cast %161 : vector<1x8x128xf32> to vector<8x128xf32>
    %163 = vector.shape_cast %160 : vector<8x128xf32> to vector<1x8x128xf32>
    tpu.vector_store %arg16[%c0_80, %c0_81, %c0_82], %163 {strides = array<i32>} : memref<1x8x128xf32, #tpu.memory_space<vmem>>, vector<1x8x128xf32>,
    return
  }
  func.func @transform_0(%arg0: i32) -> (i32, i32) {
    %c0_i32 = arith.constant 0 : i32
    %c0_i32_0 = arith.constant 0 : i32
    %c0_i32_1 = arith.constant 0 : i32
    return %c0_i32, %c0_i32_0 : i32, i32
  }
  func.func @transform_1(%arg0: i32) -> (i32, i32, i32) {
    %c0_i32 = arith.constant 0 : i32
    %c0_i32_0 = arith.constant 0 : i32
    %c0_i32_1 = arith.constant 0 : i32
    %c0_i32_2 = arith.constant 0 : i32
    return %c0_i32, %c0_i32_0, %c0_i32_1 : i32, i32, i32
  }
  func.func @transform_2(%arg0: i32) -> (i32, i32, i32) {
    %c0_i32 = arith.constant 0 : i32
    %c0_i32_0 = arith.constant 0 : i32
    %c0_i32_1 = arith.constant 0 : i32
    return %arg0, %c0_i32, %c0_i32_0 : i32, i32, i32
  }
  func.func @transform_3(%arg0: i32) -> (i32, i32, i32) {
    %c0_i32 = arith.constant 0 : i32
    %c0_i32_0 = arith.constant 0 : i32
    %c0_i32_1 = arith.constant 0 : i32
    return %arg0, %c0_i32, %c0_i32_0 : i32, i32, i32
  }
  func.func @transform_4(%arg0: i32) -> (i32, i32, i32) {
    %c0_i32 = arith.constant 0 : i32
    %c0_i32_0 = arith.constant 0 : i32
    %c0_i32_1 = arith.constant 0 : i32
    return %arg0, %c0_i32, %c0_i32_0 : i32, i32, i32
  }
  func.func @transform_5(%arg0: i32) -> (i32, i32, i32) {
    %c0_i32 = arith.constant 0 : i32
    %c0_i32_0 = arith.constant 0 : i32
    %c0_i32_1 = arith.constant 0 : i32
    return %arg0, %c0_i32, %c0_i32_0 : i32, i32, i32
  }
  func.func @transform_6(%arg0: i32) -> (i32, i32, i32, i32) {
    %c0_i32 = arith.constant 0 : i32
    %c0_i32_0 = arith.constant 0 : i32
    %c0_i32_1 = arith.constant 0 : i32
    %c0_i32_2 = arith.constant 0 : i32
    return %arg0, %c0_i32, %c0_i32_0, %c0_i32_1 : i32, i32, i32, i32
  }
  func.func @transform_7(%arg0: i32) -> (i32, i32, i32, i32) {
    %c0_i32 = arith.constant 0 : i32
    %c0_i32_0 = arith.constant 0 : i32
    %c0_i32_1 = arith.constant 0 : i32
    %c0_i32_2 = arith.constant 0 : i32
    return %arg0, %c0_i32, %c0_i32_0, %c0_i32_1 : i32, i32, i32, i32
  }
  func.func @transform_8(%arg0: i32) -> (i32, i32, i32, i32) {
    %c0_i32 = arith.constant 0 : i32
    %c0_i32_0 = arith.constant 0 : i32
    %c0_i32_1 = arith.constant 0 : i32
    %c0_i32_2 = arith.constant 0 : i32
    return %arg0, %c0_i32, %c0_i32_0, %c0_i32_1 : i32, i32, i32, i32
  }
  func.func @transform_9(%arg0: i32) -> (i32, i32, i32) {
    %c0_i32 = arith.constant 0 : i32
    %c0_i32_0 = arith.constant 0 : i32
    %c0_i32_1 = arith.constant 0 : i32
    return %arg0, %c0_i32, %c0_i32_0 : i32, i32, i32
  }
  func.func @transform_10(%arg0: i32) -> (i32, i32, i32) {
    %c0_i32 = arith.constant 0 : i32
    %c0_i32_0 = arith.constant 0 : i32
    %c0_i32_1 = arith.constant 0 : i32
    return %arg0, %c0_i32, %c0_i32_0 : i32, i32, i32
  }
  func.func @transform_11(%arg0: i32) -> (i32, i32, i32) {
    %c0_i32 = arith.constant 0 : i32
    %c0_i32_0 = arith.constant 0 : i32
    %c0_i32_1 = arith.constant 0 : i32
    return %arg0, %c0_i32, %c0_i32_0 : i32, i32, i32
  }
  func.func @transform_12(%arg0: i32) -> (i32, i32, i32) {
    %c0_i32 = arith.constant 0 : i32
    %c0_i32_0 = arith.constant 0 : i32
    %c0_i32_1 = arith.constant 0 : i32
    return %arg0, %c0_i32, %c0_i32_0 : i32, i32, i32
  }
  func.func @transform_13(%arg0: i32) -> (i32, i32, i32) {
    %c0_i32 = arith.constant 0 : i32
    %c0_i32_0 = arith.constant 0 : i32
    %c0_i32_1 = arith.constant 0 : i32
    return %arg0, %c0_i32, %c0_i32_0 : i32, i32, i32
  }
  func.func @transform_14(%arg0: i32) -> (i32, i32, i32) {
    %c0_i32 = arith.constant 0 : i32
    %c0_i32_0 = arith.constant 0 : i32
    %c0_i32_1 = arith.constant 0 : i32
    return %arg0, %c0_i32, %c0_i32_0 : i32, i32, i32
  }
  func.func @transform_15(%arg0: i32) -> (i32, i32, i32) {
    %c0_i32 = arith.constant 0 : i32
    %c0_i32_0 = arith.constant 0 : i32
    %c0_i32_1 = arith.constant 0 : i32
    return %arg0, %c0_i32, %c0_i32_0 : i32, i32, i32
  }
}

</mosaic_0001>

<bundles_post_ra>
// kernel: forward.1
= control target key start
LH: loop header
LB: loop body
LE: loop exit
PB: predicated region body
PF: predicated region fallthrough
CT: control target
= control target key end

     0   :  { %s7805_s0 = inlined_call_operand.hbm [shape: f32[8,128], index: 0, kind: input, shape index: {}]   ;;  %s7806_s1 = inlined_call_operand.hbm [shape: f32[8,16,128], index: 1, kind: input, shape index: {}]   ;;  %s7807_s2 = inlined_call_operand.vmem [shape: f32[2,8,128], index: 2, kind: input, shape index: {}]   ;;  %s7808_s3 = inlined_call_operand.vmem [shape: f32[2,8,128], index: 3, kind: input, shape index: {}]   ;;  %s7809_s4 = inlined_call_operand.hbm [shape: bf16[2,128,256], index: 4, kind: input, shape index: {}]   ;;  %s7810_s5 = inlined_call_operand.hbm [shape: bf16[2,128,256], index: 5, kind: input, shape index: {}]   ;;  %s7811_s6 = inlined_call_operand.hbm [shape: bf16[2,2,128,128], index: 6, kind: input, shape index: {}]   ;;  %s7812_s7 = inlined_call_operand.hbm [shape: f32[2,2,1,128], index: 7, kind: input, shape index: {}]   ;;  %s7813_s8 = inlined_call_operand.hbm [shape: f32[2,2,1,128], index: 8, kind: input, shape index: {}]   ;;  %s7814_s9 = inlined_call_operand.hbm [shape: bf16[2,384,1024], index: 9, kind: input, shape index: {}]   ;;  %s7815_s10 = inlined_call_operand.hbm [shape: f32[2,1,1024], index: 10, kind: input, shape index: {}]   ;;  %s7816_s11 = inlined_call_operand.hbm [shape: bf16[2,128,128], index: 11, kind: input, shape index: {}]   ;;  %s7817_s12 = inlined_call_operand.hbm [shape: f32[2,1,128], index: 12, kind: input, shape index: {}]   ;;  %s7818_s13 = inlined_call_operand.vmem [shape: f32[2,8,128], index: 13, kind: output, shape index: {0}]   ;;  %s7819_s14 = inlined_call_operand.vmem [shape: f32[2,8,128], index: 14, kind: output, shape index: {1}]   ;;  %s7820_s15 = inlined_call_operand.vmem [shape: f32[2,8,128], index: 15, kind: output, shape index: {2}]  }
   0x1   :  { %7841 = sst [smem:[#allocation31_spill]] %s7805_s0 }
   0x2   :  { %7842 = sst [smem:[#allocation32_spill]] %s7806_s1 }
   0x3   :  { %7843 = sst [smem:[#allocation33_spill]] %s7807_s2 }
   0x4   :  { %7844 = sst [smem:[#allocation34_spill]] %s7808_s3 }
   0x5   :  { %7845 = sst [smem:[#allocation35_spill]] %s7809_s4 }
   0x6   :  { %7846 = sst [smem:[#allocation36_spill]] %s7810_s5 }
   0x7   :  { %7847 = sst [smem:[#allocation37_spill]] %s7811_s6 }
   0x8   :  { %7848 = sst [smem:[#allocation38_spill]] %s7812_s7 }
   0x9   :  { %7849 = sst [smem:[#allocation39_spill]] %s7813_s8 }
   0xa   :  { %7850 = sst [smem:[#allocation40_spill]] %s7814_s9 }
   0xb   :  { %7851 = sst [smem:[#allocation41_spill]] %s7815_s10 }
   0xc   :  { %7852 = sst [smem:[#allocation42_spill]] %s7818_s13 }
   0xd   :  { %7853 = sst [smem:[#allocation43_spill]] %s7819_s14 }
   0xe   :  { %7854 = sst [smem:[#allocation44_spill]] %s7820_s15 }
   0xf   :  { %21 = vsyncpa [#allocation4], 0 }
  0x10   :  { %22 = vsyncpa [#allocation6], 0  ;;  %s6356_s18 = smov 0   ;;  %s6358_s19 = smov 0  }
  0x11   :  { %s6360_s20 = smov 0   ;;  %s6362_s21 = smov 0  }
  0x12 LB: > { %7855 = sst [smem:[#allocation19_spill]] %s6242_s19  ;;  %s6375_s22 = sadd.s32 4294967295, %s6250_s21   ;;  %s6250_s21 = sphi %s6362_s21, %s7915_s21   ;;  %s6246_s20 = sphi %s6360_s20, %s7918_s20   ;;  %s6242_s19 = sphi %s6358_s19, %s7917_s19   ;;  %s6238_s18 = sphi %s6356_s18, %s7916_s18  }
  0x13   : > { %7856 = sst [smem:[#allocation20_spill]] %s6246_s20  ;;  %s6378_s23 = sadd.s32 1, %s6250_s21  }
  0x14   : > { %7857 = sst [smem:[#allocation21_spill]] %s6375_s22  ;;  %s126_s24 = ssub.s32 %s6250_s21, %s6378_s23 }
  0x15   : > { %7858 = sst [smem:[#allocation22_spill]] %s6378_s23  ;;  %s129_s25 = sadd.s32 1, %s6246_s20 }
  0x16   : > { %p127_p0 = scmp.eq.s32.totalorder %s126_s24, 0  ;;  %p136_p1 = scmp.ne.s32.totalorder %s6246_s20, %s6242_s19 }
  0x17   : > { %p137_p2 = scmp.eq.s32.totalorder %s6250_s21, 0  ;;  %p142_p3 = scmp.ne.s32.totalorder %s6242_s19, %s6238_s18 }
  0x18   : > { %s6388_s26 = scalar_select %p127_p0, %s6246_s20, %s129_s25  }
  0x19   : > { %p6390_p4 = por %p137_p2, %p136_p1  ;;  %p7821_p5 = scmp.eq.s32.totalorder %s6375_s22, 0 }
  0x1a   : > { %7859 = sst [smem:[#allocation23_spill]] %s6388_s26  ;;  %p5098_p6 = scmp.ge.s32.totalorder %s6250_s21, 1 }
  0x1b   : > { %p439_p7 = scmp.lt.s32.totalorder %s6250_s21, 3  ;;  %p6399_p8 = por %p7821_p5, %p142_p3 }
  0x1c   : > { %s6252_s30 = smov [#allocation3]   ;;  %p5580_p12 = scmp.lt.s32.totalorder %s6250_s21, 2 }
  0x1d   : > { %s7861_s28 = scalar_select %p6399_p8, 1, 0 }
  0x1e   : > { %p6404_p10 = pnand %p5098_p6, %p439_p7  ;;  %s452_s16 = sshll.u32 %s6252_s30, 4  ;;  %s453_s16 = int_to_ptr.vmem [resolvable:$true] %s452_s16 }
  0x1f   : > { %7862 = sst [smem:[#allocation24_spill]] %s7861_s28  ;;  %s6412_s17 = sand.u32 1, %s6246_s20  }
  0x20   : > { %s7863_s29 = scalar_select %p6404_p10, 1, 0 }
  0x21   : > { %p5543_p11 = pneg %p6404_p10  ;;  %p6422_p0 = pnand %p5580_p12, %p6390_p4 }
  0x22   : > { %7864 = sst [smem:[#allocation25_spill]] %s7863_s29  ;;  %s490_s25 = sand.u32 1, %s6250_s21  }
  0x23   : > { %p6416_p13 = pnand %p5543_p11, %p7821_p5  ;;  %s5915_s30 = scalar_lea.vmem %s453_s16, 128 }
  0x24   : > { %p5916_p2 = scmp.ne.s32.totalorder %s453_s16, %s5915_s30  ;;  %p5923_p7 = scmp.lt.s32.totalorder %s453_s16, %s453_s16 }
  0x25   : > { %s7865_s18 = scalar_select %p6416_p13, 1, 0 }
  0x26   : > { %p7828_p1 = pneg %p6416_p13  ;;  %p5924_p11 = scmp.lt.s32.totalorder %s5915_s30, %s5915_s30 }
  0x28   : > { %p5918_p3 = pnand %p5916_p2, %p7828_p1  ;;  %p5925_p9 = por %p5924_p11, %p5923_p7 }
  0x2a   : > { %p5919_p6 = pneg %p5918_p3 }
  0x2c   : > { %p5926_p5 = pnand %p5925_p9, %p5919_p6 }
  0x2e   : > { %5929 = shalt.err (!%p5926_p5)
}
  0x2f   : > { %s7867_s0 = sld [smem:[#allocation31_spill]]  ;;  %s6438_s20 = sshll.u32 %s6412_s17, 7 }
  0x30   : > { %s6441_s23 = sshll.u32 %s6250_s21, 11  ;;  %s7868_s4 = sld [smem:[#allocation35_spill]] }
  0x31   : > { %s494_s26 = scalar_lea.vmem [#allocation7], %s6438_s20  ;;  %s7869_s5 = sld [smem:[#allocation36_spill]] }
  0x32   : > { %s501_s27 = sshll.u32 %s494_s26, 4  ;;  %s6458_s3 = scalar_lea.sflag [#allocation4], %s490_s25  ;;  %s6450_s27 = int_to_ptr.vmem [resolvable:$true] %s501_s27 }
  0x33   : > { %p6464_p5 = pneg %p6422_p0 }
  0x35   : > { %5546 = dma.hbm_to_vmem [thread:$0]  (!%p6416_p13), %s7867_s0, 128, %s453_s16, [#allocation4]  }
  0x36   : > { %s6447_s14 = scalar_lea.hbm %s7868_s4, %s6441_s23  ;;  %s5935_s28 = scalar_lea.hbm %s7868_s4, 4096 }
  0x37   : > { %s6456_s13 = scalar_lea.hbm %s7869_s5, %s6441_s23  ;;  %s5930_s2 = scalar_lea.hbm %s6447_s14, 2048 }
  0x38   : > { %p5931_p4 = scmp.ne.s32.totalorder %s6447_s14, %s5930_s2  ;;  %p5936_p2 = scmp.lt.s32.totalorder %s6447_s14, %s7868_s4 }
  0x39   : > { %p5937_p3 = scmp.lt.s32.totalorder %s5935_s28, %s5930_s2 }
  0x3a   : > { %p5933_p9 = pnand %p6464_p5, %p5931_p4 }
  0x3b   : > { %p5938_p6 = por %p5937_p3, %p5936_p2 }
  0x3c   : > { %p5934_p12 = pneg %p5933_p9 }
  0x3e   : > { %p5939_p7 = pnand %p5938_p6, %p5934_p12 }
  0x40   : > { %5942 = shalt.err (!%p5939_p7)
}
  0x41   : > { %s5943_s25 = scalar_lea.vmem %s6450_s27, 2048  ;;  %s6253_s19 = smov [#allocation7]  }
  0x42   : > { %p5944_p11 = scmp.ne.s32.totalorder %s6450_s27, %s5943_s25  ;;  %s5948_s30 = sshll.u32 %s6253_s19, 4  ;;  %s5949_s30 = int_to_ptr.vmem [resolvable:$false] %s5948_s30 }
  0x43   : > { %s5950_s26 = scalar_lea.vmem %s5949_s30, 4096  ;;  %p5951_p1 = scmp.lt.s32.totalorder %s6450_s27, %s5949_s30 }
  0x44   : > { %p5946_p4 = pnand %p5944_p11, %p6464_p5  ;;  %p5952_p8 = scmp.lt.s32.totalorder %s5950_s26, %s5943_s25 }
  0x46   : > { %p5947_p9 = pneg %p5946_p4  ;;  %p5953_p10 = por %p5952_p8, %p5951_p1 }
  0x48   : > { %p5954_p13 = pnand %p5953_p10, %p5947_p9 }
  0x4a   : > { %5957 = shalt.err (!%p5954_p13)
}
  0x4b   : > { %s7836_s2 = smov 128   ;;  %s6255_s28 = smov 8  }
  0x4c   : > { %5553 = dma.hbm_to_vmem [thread:$0]  (!%p6422_p0), %s6447_s14, 2048, %s6450_s27, %s6458_s3, %s7836_s2, %s7836_s2, %s6255_s28  }
  0x4d   : > { %s515_s19 = scalar_lea.vmem [#allocation8], %s6438_s20  ;;  %s7871_s6 = sld [smem:[#allocation37_spill]] }
  0x4e   : > { %s522_s0 = sshll.u32 %s515_s19, 4  ;;  %s5958_s26 = scalar_lea.hbm %s6456_s13, 2048  ;;  %s6491_s0 = int_to_ptr.vmem [resolvable:$true] %s522_s0 }
  0x4f   : > { %p5959_p8 = scmp.ne.s32.totalorder %s6456_s13, %s5958_s26  ;;  %s5963_s29 = scalar_lea.hbm %s7869_s5, 4096 }
  0x50   : > { %p5964_p1 = scmp.lt.s32.totalorder %s6456_s13, %s7869_s5  ;;  %p5965_p12 = scmp.lt.s32.totalorder %s5963_s29, %s5958_s26 }
  0x51   : > { %p5961_p10 = pnand %p5959_p8, %p6464_p5 }
  0x52   : > { %p5966_p2 = por %p5965_p12, %p5964_p1 }
  0x53   : > { %s6497_s30 = scalar_lea.hbm %s7871_s6, %s6441_s23  ;;  %p5962_p13 = pneg %p5961_p10 }
  0x55   : > { %p5967_p3 = pnand %p5966_p2, %p5962_p13 }
  0x57   : > { %5970 = shalt.err (!%p5967_p3)
}
  0x58   : > { %s5971_s23 = scalar_lea.vmem %s6491_s0, 2048  ;;  %s6256_s27 = smov [#allocation8]  }
  0x59   : > { %p5972_p6 = scmp.ne.s32.totalorder %s6491_s0, %s5971_s23  ;;  %s5976_s4 = sshll.u32 %s6256_s27, 4  ;;  %s5977_s4 = int_to_ptr.vmem [resolvable:$false] %s5976_s4 }
  0x5a   : > { %s5978_s22 = scalar_lea.vmem %s5977_s4, 4096  ;;  %p5979_p4 = scmp.lt.s32.totalorder %s6491_s0, %s5977_s4 }
  0x5b   : > { %p5974_p7 = pnand %p5972_p6, %p6464_p5  ;;  %p5980_p9 = scmp.lt.s32.totalorder %s5978_s22, %s5971_s23 }
  0x5d   : > { %p5975_p11 = pneg %p5974_p7  ;;  %p5981_p8 = por %p5980_p9, %p5979_p4 }
  0x5f   : > { %p5982_p10 = pnand %p5981_p8, %p5975_p11 }
  0x61   : > { %5985 = shalt.err (!%p5982_p10)
}
  0x62   : > { %5556 = dma.hbm_to_vmem [thread:$0]  (!%p6422_p0), %s6456_s13, 2048, %s6491_s0, %s6458_s3, %s7836_s2, %s7836_s2, %s6255_s28  }
  0x63   : > { %s536_s1 = scalar_lea.vmem [#allocation9], %s6438_s20  ;;  %s5986_s19 = scalar_lea.hbm %s6497_s30, 2048 }
  0x64   : > { %s543_s29 = sshll.u32 %s536_s1, 4  ;;  %p5987_p13 = scmp.ne.s32.totalorder %s6497_s30, %s5986_s19  ;;  %s6524_s29 = int_to_ptr.vmem [resolvable:$true] %s543_s29 }
  0x65   : > { %s5991_s26 = scalar_lea.hbm %s7871_s6, 4096  ;;  %p5992_p2 = scmp.lt.s32.totalorder %s6497_s30, %s7871_s6 }
  0x66   : > { %p5989_p1 = pnand %p5987_p13, %p6464_p5  ;;  %p5993_p3 = scmp.lt.s32.totalorder %s5991_s26, %s5986_s19 }
  0x68   : > { %p5990_p12 = pneg %p5989_p1  ;;  %p5994_p6 = por %p5993_p3, %p5992_p2 }
  0x6a   : > { %p5995_p7 = pnand %p5994_p6, %p5990_p12 }
  0x6c   : > { %5998 = shalt.err (!%p5995_p7)
}
  0x6d   : > { %s5999_s13 = scalar_lea.vmem %s6524_s29, 2048  ;;  %s6257_s20 = smov [#allocation9]  }
  0x6e   : > { %p6000_p11 = scmp.ne.s32.totalorder %s6524_s29, %s5999_s13  ;;  %s6004_s0 = sshll.u32 %s6257_s20, 4  ;;  %s6005_s0 = int_to_ptr.vmem [resolvable:$false] %s6004_s0 }
  0x6f   : > { %s6006_s27 = scalar_lea.vmem %s6005_s0, 4096  ;;  %p6007_p8 = scmp.lt.s32.totalorder %s6524_s29, %s6005_s0 }
  0x70   : > { %p6002_p4 = pnand %p6000_p11, %p6464_p5  ;;  %p6008_p10 = scmp.lt.s32.totalorder %s6006_s27, %s5999_s13 }
  0x72   : > { %p6003_p9 = pneg %p6002_p4  ;;  %p6009_p13 = por %p6008_p10, %p6007_p8 }
  0x74   : > { %p6010_p1 = pnand %p6009_p13, %p6003_p9 }
  0x76   : > { %6013 = shalt.err (!%p6010_p1)
}
  0x77   : > { %s6258_s4 = smov 64   ;;  %s6259_s22 = smov 4  }
  0x78   : > { %5559 = dma.hbm_to_vmem [thread:$0]  (!%p6422_p0), %s6497_s30, 2048, %s6524_s29, %s6458_s3, %s6258_s4, %s6258_s4, %s6259_s22  }
  0x79   : > { %s5111_s1 = sshll.u32 %s6412_s17, 1  ;;  %s5423_s19 = sshll.u32 %s6250_s21, 5 }
  0x7a   : > { %s7872_s7 = sld [smem:[#allocation38_spill]]  ;;  %s557_s14 = scalar_lea.vmem [#allocation10], %s5111_s1 }
  0x7b   : > { %s564_s23 = sshll.u32 %s557_s14, 4  ;;  %s6561_s23 = int_to_ptr.vmem [resolvable:$true] %s564_s23 }
  0x80   : > { %s6557_s26 = scalar_lea.hbm %s7872_s7, %s5423_s19  ;;  %s6019_s20 = scalar_lea.hbm %s7872_s7, 64 }
  0x81   : > { %s6014_s13 = scalar_lea.hbm %s6557_s26, 32  ;;  %p6020_p6 = scmp.lt.s32.totalorder %s6557_s26, %s7872_s7 }
  0x82   : > { %p6015_p12 = scmp.ne.s32.totalorder %s6557_s26, %s6014_s13  ;;  %p6021_p7 = scmp.lt.s32.totalorder %s6019_s20, %s6014_s13 }
  0x84   : > { %p6017_p2 = pnand %p6015_p12, %p6464_p5  ;;  %p6022_p11 = por %p6021_p7, %p6020_p6 }
  0x86   : > { %p6018_p3 = pneg %p6017_p2 }
  0x88   : > { %p6023_p4 = pnand %p6022_p11, %p6018_p3 }
  0x8a   : > { %6026 = shalt.err (!%p6023_p4)
}
  0x8b   : > { %s6027_s16 = scalar_lea.vmem %s6561_s23, 32  ;;  %s6260_s25 = smov [#allocation10]  }
  0x8c   : > { %p6028_p9 = scmp.ne.s32.totalorder %s6561_s23, %s6027_s16  ;;  %s6032_s14 = sshll.u32 %s6260_s25, 4  ;;  %s6033_s14 = int_to_ptr.vmem [resolvable:$false] %s6032_s14 }
  0x8d   : > { %s6034_s30 = scalar_lea.vmem %s6033_s14, 64  ;;  %p6035_p13 = scmp.lt.s32.totalorder %s6561_s23, %s6033_s14 }
  0x8e   : > { %p6030_p8 = pnand %p6028_p9, %p6464_p5  ;;  %p6036_p1 = scmp.lt.s32.totalorder %s6034_s30, %s6027_s16 }
  0x90   : > { %p6031_p10 = pneg %p6030_p8  ;;  %p6037_p12 = por %p6036_p1, %p6035_p13 }
  0x92   : > { %p6038_p2 = pnand %p6037_p12, %p6031_p10 }
  0x94   : > { %6041 = shalt.err (!%p6038_p2)
}
  0x95   : > { %s6261_s13 = smov 16   ;;  %s6262_s29 = smov 1  }
  0x96   : > { %5562 = dma.hbm_to_vmem [thread:$0]  (!%p6422_p0), %s6557_s26, 32, %s6561_s23, %s6458_s3, %s6261_s13, %s6261_s13, %s6262_s29  }
  0x97   : > { %s7873_s8 = sld [smem:[#allocation39_spill]]  ;;  %s578_s16 = scalar_lea.vmem [#allocation11], %s5111_s1 }
  0x98   : > { %s585_s25 = sshll.u32 %s578_s16, 4  ;;  %s5514_s14 = smul.u32 1536, %s6412_s17  ;;  %s6597_s25 = int_to_ptr.vmem [resolvable:$true] %s585_s25 }
  0x99   : > { %s5515_s30 = smul.u32 24576, %s6250_s21 }
  0x9d   : > { %s6592_s27 = scalar_lea.hbm %s7873_s8, %s5423_s19  ;;  %s6047_s19 = scalar_lea.hbm %s7873_s8, 64 }
  0x9e   : > { %s6042_s2 = scalar_lea.hbm %s6592_s27, 32  ;;  %p6048_p11 = scmp.lt.s32.totalorder %s6592_s27, %s7873_s8 }
  0x9f   : > { %p6043_p3 = scmp.ne.s32.totalorder %s6592_s27, %s6042_s2  ;;  %p6049_p4 = scmp.lt.s32.totalorder %s6047_s19, %s6042_s2 }
  0xa1   : > { %p6045_p6 = pnand %p6043_p3, %p6464_p5  ;;  %p6050_p9 = por %p6049_p4, %p6048_p11 }
  0xa3   : > { %p6046_p7 = pneg %p6045_p6 }
  0xa5   : > { %p6051_p8 = pnand %p6050_p9, %p6046_p7 }
  0xa7   : > { %6054 = shalt.err (!%p6051_p8)
}
  0xa8   : > { %s6055_s1 = scalar_lea.vmem %s6597_s25, 32  ;;  %s6263_s16 = smov [#allocation11]  }
  0xa9   : > { %p6056_p10 = scmp.ne.s32.totalorder %s6597_s25, %s6055_s1  ;;  %s6060_s26 = sshll.u32 %s6263_s16, 4  ;;  %s6061_s26 = int_to_ptr.vmem [resolvable:$false] %s6060_s26 }
  0xaa   : > { %s6062_s23 = scalar_lea.vmem %s6061_s26, 64  ;;  %p6063_p12 = scmp.lt.s32.totalorder %s6597_s25, %s6061_s26 }
  0xab   : > { %p6058_p13 = pnand %p6056_p10, %p6464_p5  ;;  %p6064_p2 = scmp.lt.s32.totalorder %s6062_s23, %s6055_s1 }
  0xad   : > { %p6059_p1 = pneg %p6058_p13  ;;  %p6065_p3 = por %p6064_p2, %p6063_p12 }
  0xaf   : > { %p6066_p6 = pnand %p6065_p3, %p6059_p1 }
  0xb1   : > { %6069 = shalt.err (!%p6066_p6)
}
  0xb2   : > { %5565 = dma.hbm_to_vmem [thread:$0]  (!%p6422_p0), %s6592_s27, 32, %s6597_s25, %s6458_s3, %s6261_s13, %s6261_s13, %s6262_s29  }
  0xb3   : > { %s7874_s9 = sld [smem:[#allocation40_spill]]  ;;  %s599_s0 = scalar_lea.vmem [#allocation12], %s5514_s14 }
  0xb4   : > { %s606_s1 = sshll.u32 %s599_s0, 4  ;;  %s6633_s1 = int_to_ptr.vmem [resolvable:$true] %s606_s1 }
  0xb9   : > { %s6629_s20 = scalar_lea.hbm %s7874_s9, %s5515_s30  ;;  %s6075_s27 = scalar_lea.hbm %s7874_s9, 49152 }
  0xba   : > { %s6070_s16 = scalar_lea.hbm %s6629_s20, 24576  ;;  %p6076_p9 = scmp.lt.s32.totalorder %s6629_s20, %s7874_s9 }
  0xbb   : > { %p6071_p7 = scmp.ne.s32.totalorder %s6629_s20, %s6070_s16  ;;  %p6077_p8 = scmp.lt.s32.totalorder %s6075_s27, %s6070_s16 }
  0xbd   : > { %p6073_p11 = pnand %p6071_p7, %p6464_p5  ;;  %p6078_p10 = por %p6077_p8, %p6076_p9 }
  0xbf   : > { %p6074_p4 = pneg %p6073_p11 }
  0xc1   : > { %p6079_p13 = pnand %p6078_p10, %p6074_p4 }
  0xc3   : > { %6082 = shalt.err (!%p6079_p13)
}
  0xc4   : > { %s6083_s14 = scalar_lea.vmem %s6633_s1, 24576  ;;  %s6264_s26 = smov [#allocation12]  }
  0xc5   : > { %p6084_p1 = scmp.ne.s32.totalorder %s6633_s1, %s6083_s14  ;;  %s6088_s23 = sshll.u32 %s6264_s26, 4  ;;  %s6089_s23 = int_to_ptr.vmem [resolvable:$false] %s6088_s23 }
  0xc6   : > { %s6090_s2 = scalar_lea.vmem %s6089_s23, 49152  ;;  %p6091_p3 = scmp.lt.s32.totalorder %s6633_s1, %s6089_s23 }
  0xc7   : > { %p6086_p12 = pnand %p6084_p1, %p6464_p5  ;;  %p6092_p6 = scmp.lt.s32.totalorder %s6090_s2, %s6083_s14 }
  0xc9   : > { %p6087_p2 = pneg %p6086_p12  ;;  %p6093_p7 = por %p6092_p6, %p6091_p3 }
  0xcb   : > { %p6094_p11 = pnand %p6093_p7, %p6087_p2 }
  0xcd   : > { %6097 = shalt.err (!%p6094_p11)
}
  0xce   : > { %s6265_s19 = smov 512   ;;  %s6266_s0 = smov 32  }
  0xcf   : > { %5568 = dma.hbm_to_vmem [thread:$0]  (!%p6422_p0), %s6629_s20, 24576, %s6633_s1, %s6458_s3, %s6265_s19, %s6265_s19, %s6266_s0  }
  0xd0   : > { %s5118_s16 = sshll.u32 %s6412_s17, 3  ;;  %s5425_s13 = sshll.u32 %s6250_s21, 7 }
  0xd1   : > { %s7875_s10 = sld [smem:[#allocation41_spill]]  ;;  %s620_s30 = scalar_lea.vmem [#allocation13], %s5118_s16 }
  0xd2   : > { %s628_s14 = sshll.u32 %s620_s30, 4  ;;  %s5121_s26 = sshll.u32 %s6412_s17, 6  ;;  %s629_s14 = int_to_ptr.vmem [resolvable:$true] %s628_s14 }
  0xd7   : > { %s6661_s25 = scalar_lea.hbm %s7875_s10, %s5425_s13  ;;  %s6103_s2 = scalar_lea.hbm %s7875_s10, 256 }
  0xd8   : > { %s6098_s23 = scalar_lea.hbm %s6661_s25, 128  ;;  %p6104_p10 = scmp.lt.s32.totalorder %s6661_s25, %s7875_s10 }
  0xd9   : > { %p6099_p4 = scmp.ne.s32.totalorder %s6661_s25, %s6098_s23  ;;  %p6105_p13 = scmp.lt.s32.totalorder %s6103_s2, %s6098_s23 }
  0xdb   : > { %p6101_p9 = pnand %p6099_p4, %p6464_p5  ;;  %p6106_p1 = por %p6105_p13, %p6104_p10 }
  0xdd   : > { %p6102_p8 = pneg %p6101_p9 }
  0xdf   : > { %p6107_p12 = pnand %p6106_p1, %p6102_p8 }
  0xe1   : > { %6110 = shalt.err (!%p6107_p12)
}
  0xe2   : > { %s6111_s16 = scalar_lea.vmem %s629_s14, 128  ;;  %s6267_s13 = smov [#allocation13]  }
  0xe3   : > { %p6112_p2 = scmp.ne.s32.totalorder %s629_s14, %s6111_s16  ;;  %s6116_s29 = sshll.u32 %s6267_s13, 4  ;;  %s6117_s29 = int_to_ptr.vmem [resolvable:$false] %s6116_s29 }
  0xe4   : > { %s6118_s27 = scalar_lea.vmem %s6117_s29, 256  ;;  %p6119_p7 = scmp.lt.s32.totalorder %s629_s14, %s6117_s29 }
  0xe5   : > { %p6114_p3 = pnand %p6112_p2, %p6464_p5  ;;  %p6120_p11 = scmp.lt.s32.totalorder %s6118_s27, %s6111_s16 }
  0xe7   : > { %p6115_p6 = pneg %p6114_p3  ;;  %p6121_p4 = por %p6120_p11, %p6119_p7 }
  0xe9   : > { %p6122_p9 = pnand %p6121_p4, %p6115_p6 }
  0xeb   : > { %6125 = shalt.err (!%p6122_p9)
}
  0xec   : > { %5571 = dma.hbm_to_vmem [thread:$0]  (!%p6422_p0), %s6661_s25, 128, %s629_s14, %s6458_s3  }
  0xed   : > { %s5426_s30 = sshll.u32 %s6250_s21, 10  ;;  %s639_s23 = scalar_lea.vmem [#allocation14], %s5121_s26 }
  0xee   : > { %s646_s20 = sshll.u32 %s639_s23, 4  ;;  %s6685_s19 = scalar_lea.hbm %s7816_s11, %s5426_s30  ;;  %s647_s20 = int_to_ptr.vmem [resolvable:$true] %s646_s20 }
  0xef   : > { %s6126_s0 = scalar_lea.hbm %s6685_s19, 1024  ;;  %s6131_s25 = scalar_lea.hbm %s7816_s11, 2048 }
  0xf0   : > { %p6127_p8 = scmp.ne.s32.totalorder %s6685_s19, %s6126_s0  ;;  %p6132_p1 = scmp.lt.s32.totalorder %s6685_s19, %s7816_s11 }
  0xf1   : > { %p6133_p12 = scmp.lt.s32.totalorder %s6131_s25, %s6126_s0 }
  0xf2   : > { %p6129_p10 = pnand %p6127_p8, %p6464_p5 }
  0xf3   : > { %p6134_p2 = por %p6133_p12, %p6132_p1 }
  0xf4   : > { %p6130_p13 = pneg %p6129_p10 }
  0xf6   : > { %p6135_p3 = pnand %p6134_p2, %p6130_p13 }
  0xf8   : > { %6138 = shalt.err (!%p6135_p3)
}
  0xf9   : > { %s6139_s29 = scalar_lea.vmem %s647_s20, 1024  ;;  %s6268_s27 = smov [#allocation14]  }
  0xfa   : > { %p6140_p6 = scmp.ne.s32.totalorder %s647_s20, %s6139_s29  ;;  %s6144_s30 = sshll.u32 %s6268_s27, 4  ;;  %s6145_s30 = int_to_ptr.vmem [resolvable:$false] %s6144_s30 }
  0xfb   : > { %s6146_s23 = scalar_lea.vmem %s6145_s30, 2048  ;;  %p6147_p4 = scmp.lt.s32.totalorder %s647_s20, %s6145_s30 }
  0xfc   : > { %p6142_p7 = pnand %p6140_p6, %p6464_p5  ;;  %p6148_p9 = scmp.lt.s32.totalorder %s6146_s23, %s6139_s29 }
  0xfe   : > { %p6143_p11 = pneg %p6142_p7  ;;  %p6149_p8 = por %p6148_p9, %p6147_p4 }
 0x100   : > { %p6150_p10 = pnand %p6149_p8, %p6143_p11 }
 0x102   : > { %6153 = shalt.err (!%p6150_p10)
}
 0x103   : > { %5574 = dma.hbm_to_vmem [thread:$0]  (!%p6422_p0), %s6685_s19, 1024, %s647_s20, %s6458_s3, %s6258_s4, %s6258_s4, %s6259_s22  }
 0x104   : > { %s6269_s1 = smov [#allocation5]   ;;  %s5124_s0 = sshll.u32 %s6250_s21, 4 }
 0x105   : > { %s462_s2 = sshll.u32 %s6269_s1, 4  ;;  %s6711_s25 = scalar_lea.hbm %s7817_s12, %s5124_s0  ;;  %s463_s2 = int_to_ptr.vmem [resolvable:$true] %s462_s2 }
 0x106   : > { %s6165_s14 = scalar_lea.vmem %s463_s2, 2048  ;;  %p7876_p1 = scmp.ne.s32.totalorder %s7865_s18, 0 }
 0x107   : > { %p6166_p13 = scmp.ne.s32.totalorder %s463_s2, %s6165_s14  ;;  %p6173_p6 = scmp.lt.s32.totalorder %s463_s2, %s463_s2 }
 0x108   : > { %p7877_p12 = pneg %p7876_p1  ;;  %p6174_p7 = scmp.lt.s32.totalorder %s6165_s14, %s6165_s14 }
 0x10a   : > { %p6168_p2 = pnand %p6166_p13, %p7877_p12  ;;  %p6175_p11 = por %p6174_p7, %p6173_p6 }
 0x10c   : > { %p6169_p3 = pneg %p6168_p2 }
 0x10e   : > { %p6176_p4 = pnand %p6175_p11, %p6169_p3 }
 0x110   : > { %6179 = shalt.err (!%p6176_p4)
}
 0x111   : > { %s7878_s21 = smov 128   ;;  %s7879_s20 = sld [smem:[#allocation32_spill]] }
 0x112   : > { %s659_s19 = scalar_lea.vmem [#allocation15], %s6412_s17  ;;  %s6180_s29 = scalar_lea.hbm %s6711_s25, 16 }
 0x113   : > { %s666_s26 = sshll.u32 %s659_s19, 4  ;;  %p6181_p9 = scmp.ne.s32.totalorder %s6711_s25, %s6180_s29  ;;  %s667_s26 = int_to_ptr.vmem [resolvable:$true] %s666_s26 }
 0x114   : > { %s6185_s30 = scalar_lea.hbm %s7817_s12, 32  ;;  %p6186_p13 = scmp.lt.s32.totalorder %s6711_s25, %s7817_s12 }
 0x115   : > { %p6183_p8 = pnand %p6181_p9, %p6464_p5  ;;  %p6187_p12 = scmp.lt.s32.totalorder %s6185_s30, %s6180_s29 }
 0x117   : > { %5549 = dma.hbm_to_vmem [thread:$0]  (!%p7876_p1), %s7879_s20, 2048, %s463_s2, [#allocation6], %s7878_s21, %s7878_s21, %s6255_s28  }
 0x118   : > { %p6184_p10 = pneg %p6183_p8  ;;  %p6188_p2 = por %p6187_p12, %p6186_p13 }
 0x11a   : > { %p6189_p3 = pnand %p6188_p2, %p6184_p10 }
 0x11c   : > { %6192 = shalt.err (!%p6189_p3)
}
 0x11d   : > { %s6193_s17 = scalar_lea.vmem %s667_s26, 16  ;;  %s6270_s28 = smov [#allocation15]  }
 0x11e   : > { %p6194_p1 = scmp.ne.s32.totalorder %s667_s26, %s6193_s17  ;;  %s6198_s2 = sshll.u32 %s6270_s28, 4  ;;  %s6199_s2 = int_to_ptr.vmem [resolvable:$false] %s6198_s2 }
 0x11f   : > { %s6200_s0 = scalar_lea.vmem %s6199_s2, 32  ;;  %p6201_p11 = scmp.lt.s32.totalorder %s667_s26, %s6199_s2 }
 0x120   : > { %p6196_p6 = pnand %p6194_p1, %p6464_p5  ;;  %p6202_p4 = scmp.lt.s32.totalorder %s6200_s0, %s6193_s17 }
 0x122   : > { %p6197_p7 = pneg %p6196_p6  ;;  %p6203_p9 = por %p6202_p4, %p6201_p11 }
 0x124   : > { %p6204_p8 = pnand %p6203_p9, %p6197_p7 }
 0x126   : > { %6207 = shalt.err (!%p6204_p8)
}
 0x127   : > { %5577 = dma.hbm_to_vmem [thread:$0]  (!%p6422_p0), %s6711_s25, 16, %s667_s26, %s6458_s3  }
 0x128   : > { %s7880_s16 = sld [smem:[#allocation25_spill]] }
 0x12e   : > { %p7881_p10 = scmp.ne.s32.totalorder %s7880_s16, 0 }
 0x130   : > { %675 = sbr.rel (%p7881_p10) target bundleno = 3445 (0xd75), region = 72 }
 0x135   : > { %s7882_s15 = sld [smem:[#allocation21_spill]] }
 0x13b   : > { %p7883_p5 = scmp.eq.s32.totalorder %s7882_s15, 0 }
 0x13d   : > { %6225 = dma.done.wait (%p7883_p5), [#allocation4], 128   ;;  %p7884_p13 = pmov %p7883_p5 }
 0x13e   : > { %p7885_p12 = pmov %p7883_p5 }
 0x13f   : > { %6227 = vsyncadd (%p7884_p13), [#allocation4], 4294967168 }
 0x140   : > { %6229 = dma.done.wait (%p7885_p12), [#allocation6], 2048   ;;  %p7886_p2 = pmov %p7883_p5 }
 0x141   : > { %s7887_s24 = sld [smem:[#allocation19_spill]]  ;;  %s685_s14 = sand.u32 1, %s7882_s15  }
 0x142   : > { %6231 = vsyncadd (%p7886_p2), [#allocation6], 4294965248  ;;  %s7888_s13 = sld [smem:[#allocation24_spill]]  ;;  %s686_s21 = scalar_lea.sflag [#allocation4], %s685_s14 }
 0x147   : > { %s6754_s3 = sand.u32 1, %s7887_s24  }
 0x148   : > { %s5128_s25 = sshll.u32 %s6754_s3, 7  ;;  %p7889_p0 = scmp.ne.s32.totalorder %s7888_s13, 0 }
 0x149   : > { %s6757_s4 = scalar_lea.vmem [#allocation7], %s5128_s25 }
 0x14a   : > { %6233 = dma.done.wait (%p7889_p0), %s686_s21, 31952  }
 0x14b   : > { %6235 = vsyncadd (%p7889_p0), %s686_s21, 4294935344  ;;  %s5131_s22 = sshll.u32 %s6754_s3, 1  ;;  %s5516_s20 = smul.u32 1536, %s6754_s3 }
 0x14c   : > { %s5133_s19 = sshll.u32 %s6754_s3, 3  ;;  %s5134_s26 = sshll.u32 %s6754_s3, 6 }
 0x14d   : > { %p861_p3 = scmp.lt.s32.totalorder %s7882_s15, 1  ;;  %s7890_s23 = sld [smem:[#allocation33_spill]] }
 0x14e   : > { %s7891_s2 = sld [smem:[#allocation34_spill]]  ;;  %s6791_s9 = scalar_lea.vmem [#allocation8], %s5128_s25 }
 0x14f   : > { %s862_s29 = scalar_select %p861_p3, %s7882_s15, 1 }
 0x150   : > { %s7892_s13 = sld [smem:[#allocation42_spill]]  ;;  %s6793_s10 = scalar_lea.vmem [#allocation9], %s5128_s25 }
 0x151   : > { %s6769_s18 = sshll.u32 %s862_s29, 3  ;;  %s7893_s5 = sld [smem:[#allocation43_spill]] }
 0x152   : > { %s7894_s27 = sld [smem:[#allocation44_spill]]  ;;  %s6797_s17 = scalar_lea.vmem [#allocation11], %s5131_s22 }
 0x153   : > { %s864_s1 = scalar_lea.vmem %s7890_s23, %s6769_s18  ;;  %s6795_s23 = scalar_lea.vmem [#allocation10], %s5131_s22 }
 0x154   : > { %s868_s0 = scalar_lea.vmem %s7891_s2, %s6769_s18  ;;  %s6799_s28 = scalar_lea.vmem [#allocation12], %s5516_s20 }
 0x155   : > { %s6801_s2 = scalar_lea.vmem [#allocation13], %s5133_s19  ;;  %s6803_s16 = scalar_lea.vmem [#allocation14], %s5134_s26 }
 0x156   : > { %s872_s14 = scalar_lea.vmem %s7892_s13, %s6769_s18  ;;  %s760_s24 = scalar_lea.vmem [#allocation15], %s6754_s3 }
 0x157   : > { %s876_s6 = scalar_lea.vmem %s7893_s5, %s6769_s18  ;;  %p7895_p1 = scmp.ne.s32.totalorder %s7882_s15, 0 }
 0x158   : > { %s880_s30 = scalar_lea.vmem %s7894_s27, %s6769_s18 }
 0x159   : > { %885 = sbr.rel (%p7895_p1) target bundleno = 352 (0x160), region = 120 }
 0x15e   : > { %v6271_v0 = vmov 0.0  }
 0x15f   : > { %886 = vst [vmem:[#allocation2] sm:$0xff] %v6271_v0 }
 0x160 PF: > { %v5632_v1 = vld [vmem:[%s6757_s4 + $0x74] ss:$8 sps:$4 sm:$0xff]   ;;  %v7839_v3 = vmov 0   ;;  %v5636_v4 = vld [vmem:[%s6757_s4 + $0x70] ss:$8 sps:$4 sm:$0xff]   ;;  %v892_v36 = vld [vmem:[#allocation5] sm:$0xff] }
 0x161   : > { %v5634_v2 = vld [vmem:[%s6791_s9 + $0x74] ss:$8 sps:$4 sm:$0xff]   ;;  %1045 = vmatprep.mubr.bf16.mxu0 %v7839_v3  ;;  %1254 = vmatprep.mubr.bf16.mxu1 %v7839_v3  ;;  %v5637_v5 = vld [vmem:[%s6791_s9 + $0x70] ss:$8 sps:$4 sm:$0xff]   ;;  %v5638_v6 = vld [vmem:[%s6757_s4 + $0x64] ss:$8 sps:$4 sm:$0xff]  }
 0x162   : > { %1013 = vmatprep.subr.bf16.mxu0 %v5632_v1  ;;  %5631 = vset.pattern.permute.xlu0 %v7839_v3  ;;  %v5640_v7 = vld [vmem:[%s6791_s9 + $0x64] ss:$8 sps:$4 sm:$0xff]   ;;  %v5642_v8 = vld [vmem:[%s6757_s4 + $0x60] ss:$8 sps:$4 sm:$0xff]   ;;  %v5644_v10 = vld [vmem:[%s6757_s4 + $0x54] ss:$8 sps:$4 sm:$0xff]  }
 0x163   : > { %1222 = vmatprep.subr.bf16.mxu1 %v5634_v2  ;;  %5630 = vset.pattern.permute.xlu1 %v7839_v3  ;;  %v5643_v9 = vld [vmem:[%s6791_s9 + $0x60] ss:$8 sps:$4 sm:$0xff]   ;;  %v5646_v11 = vld [vmem:[%s6791_s9 + $0x54] ss:$8 sps:$4 sm:$0xff]   ;;  %v5648_v12 = vld [vmem:[%s6757_s4 + $0x50] ss:$8 sps:$4 sm:$0xff]  }
 0x164   : > { %1014 = vmatpush1.bf16.msra.mxu0 %v5636_v4  ;;  %1223 = vmatpush1.bf16.msra.mxu1 %v5637_v5  ;;  %v5649_v13 = vld [vmem:[%s6791_s9 + $0x50] ss:$8 sps:$4 sm:$0xff]   ;;  %v5650_v14 = vld [vmem:[%s6757_s4 + $0x44] ss:$8 sps:$4 sm:$0xff]   ;;  %v5654_v16 = vld [vmem:[%s6757_s4 + $0x40] ss:$8 sps:$4 sm:$0xff]  }
 0x165   : > { %1015 = vmatprep.subr.bf16.mxu0 %v5638_v6  ;;  %1224 = vmatprep.subr.bf16.mxu1 %v5640_v7  ;;  %v5652_v15 = vld [vmem:[%s6791_s9 + $0x44] ss:$8 sps:$4 sm:$0xff]   ;;  %v5655_v17 = vld [vmem:[%s6791_s9 + $0x40] ss:$8 sps:$4 sm:$0xff]   ;;  %v5656_v18 = vld [vmem:[%s6757_s4 + $0x34] ss:$8 sps:$4 sm:$0xff]  }
 0x166   : > { %v5658_v19 = vld [vmem:[%s6791_s9 + $0x34] ss:$8 sps:$4 sm:$0xff]   ;;  %v5660_v20 = vld [vmem:[%s6757_s4 + $0x30] ss:$8 sps:$4 sm:$0xff]   ;;  %v5662_v22 = vld [vmem:[%s6757_s4 + $0x24] ss:$8 sps:$4 sm:$0xff]  }
 0x167   : > { %v5661_v21 = vld [vmem:[%s6791_s9 + $0x30] ss:$8 sps:$4 sm:$0xff]   ;;  %v5664_v23 = vld [vmem:[%s6791_s9 + $0x24] ss:$8 sps:$4 sm:$0xff]   ;;  %v5666_v24 = vld [vmem:[%s6757_s4 + $0x20] ss:$8 sps:$4 sm:$0xff]  }
 0x168   : > { %1016 = vmatpush1.bf16.msra.mxu0 %v5642_v8  ;;  %1225 = vmatpush1.bf16.msra.mxu1 %v5643_v9  ;;  %v5667_v25 = vld [vmem:[%s6791_s9 + $0x20] ss:$8 sps:$4 sm:$0xff]   ;;  %v5668_v26 = vld [vmem:[%s6757_s4 + $0x14] ss:$8 sps:$4 sm:$0xff]   ;;  %v5672_v28 = vld [vmem:[%s6757_s4 + $0x10] ss:$8 sps:$4 sm:$0xff]  }
 0x169   : > { %1017 = vmatprep.subr.bf16.mxu0 %v5644_v10  ;;  %1226 = vmatprep.subr.bf16.mxu1 %v5646_v11  ;;  %v5670_v27 = vld [vmem:[%s6791_s9 + $0x14] ss:$8 sps:$4 sm:$0xff]   ;;  %v5673_v29 = vld [vmem:[%s6791_s9 + $0x10] ss:$8 sps:$4 sm:$0xff]   ;;  %v5674_v30 = vld [vmem:[%s6757_s4 + $0x4] ss:$8 sps:$4 sm:$0xff]  }
 0x16a   : > { %v887_v31 = vld [vmem:[#allocation3] sm:$0xff]  ;;  %v888_v32 = vld [vmem:[#allocation2] sm:$0xff]  ;;  %v5676_v33 = vld [vmem:[%s6791_s9 + $0x4] ss:$8 sps:$4 sm:$0xff]   ;;  %v7837_v42 = vmov 0.0   ;;  %vm6274_vm0 = vmmov 0  }
 0x16b   : > { %v5678_v34 = vld [vmem:[%s6757_s4] ss:$8 sps:$4 sm:$0xff]   ;;  %v889_v37 = vadd.f32 %v888_v32, %v887_v31  ;;  %v5680_v41 = vld [vmem:[%s6793_s10 + $0x38] sm:$0xff]   ;;  %v5681_v43 = vld [vmem:[%s6793_s10 + $0x30] sm:$0xff]   ;;  %vm1581_vm1 = vcmask 130112   ;;  %vm1646_vm2 = vcmask 1041409  }
 0x16c   : > { %1018 = vmatpush1.bf16.msra.mxu0 %v5648_v12  ;;  %1227 = vmatpush1.bf16.msra.mxu1 %v5649_v13  ;;  %v5679_v35 = vld [vmem:[%s6791_s9] ss:$8 sps:$4 sm:$0xff]   ;;  %v894_v44 = vld [vmem:[#allocation5 + $0x10] sm:$0xff]  ;;  %v895_v45 = vld [vmem:[#allocation5 + $0x18] sm:$0xff]  ;;  %vm1648_vm3 = vcmask 1042434   ;;  %vm1650_vm4 = vcmask 1043459  }
 0x16d   : > { %1019 = vmatprep.subr.bf16.mxu0 %v5650_v14  ;;  %1228 = vmatprep.subr.bf16.mxu1 %v5652_v15  ;;  %v893_v38 = vld [vmem:[#allocation5 + $0x8] sm:$0xff]  ;;  %v6844_v40 = vpack.c.bf16 %v889_v37, %v889_v37  ;;  %v909_v47 = vpack.c.bf16 %v895_v45, %v894_v44  ;;  %v5683_v48 = vld [vmem:[%s6793_s10 + $0x20] sm:$0xff]   ;;  %v5684_v52 = vld [vmem:[%s6793_s10 + $0x18] sm:$0xff]   ;;  %vm1652_vm5 = vcmask 1044484   ;;  %vm1654_vm6 = vcmask 1045509  }
 0x16e   : > { %v908_v39 = vpack.c.bf16 %v893_v38, %v892_v36  ;;  %v5682_v46 = vld [vmem:[%s6793_s10 + $0x28] sm:$0xff]   ;;  %v896_v49 = vld [vmem:[#allocation5 + $0x20] sm:$0xff]  ;;  %v5685_v53 = vld [vmem:[%s6793_s10 + $0x10] sm:$0xff]   ;;  %vm1656_vm7 = vcmask 1046534   ;;  %vm1658_vm8 = vcmask 1047559   ;;  %vm1661_vm9 = vcmask 130048  }
 0x16f   : > { %v897_v50 = vld [vmem:[#allocation5 + $0x28] sm:$0xff]  ;;  %v898_v54 = vld [vmem:[#allocation5 + $0x30] sm:$0xff]  ;;  %v899_v55 = vld [vmem:[#allocation5 + $0x38] sm:$0xff] }
 0x170   : > { %1020 = vmatpush1.bf16.msra.mxu0 %v5654_v16  ;;  %1229 = vmatpush1.bf16.msra.mxu1 %v5655_v17  ;;  %v910_v51 = vpack.c.bf16 %v897_v50, %v896_v49  ;;  %v911_v56 = vpack.c.bf16 %v899_v55, %v898_v54  ;;  %v5686_v57 = vld [vmem:[%s6793_s10 + $0x8] sm:$0xff]   ;;  %v5687_v58 = vld [vmem:[%s6793_s10] sm:$0xff]   ;;  %v891_v61 = vld [vmem:[%s868_s0] sm:$0xff] }
 0x171   : > { %1021 = vmatprep.subr.bf16.mxu0 %v5656_v18  ;;  %1230 = vmatprep.subr.bf16.mxu1 %v5658_v19  ;;  %v900_v59 = vld [vmem:[#allocation5 + $0x40] sm:$0xff]  ;;  %v901_v60 = vld [vmem:[#allocation5 + $0x48] sm:$0xff]  ;;  %v6874_v63 = vpack.c.bf16 %v891_v61, %v891_v61  ;;  %v902_v0 = vld [vmem:[#allocation5 + $0x50] sm:$0xff] }
 0x172   : > { %v912_v62 = vpack.c.bf16 %v901_v60, %v900_v59  ;;  %v903_v1 = vld [vmem:[#allocation5 + $0x58] sm:$0xff]  ;;  %v904_v4 = vld [vmem:[#allocation5 + $0x60] sm:$0xff]  ;;  %v905_v5 = vld [vmem:[#allocation5 + $0x68] sm:$0xff] }
 0x173   : > { %v913_v2 = vpack.c.bf16 %v903_v1, %v902_v0  ;;  %v914_v6 = vpack.c.bf16 %v905_v5, %v904_v4  ;;  %v906_v7 = vld [vmem:[#allocation5 + $0x70] sm:$0xff]  ;;  %v907_v8 = vld [vmem:[#allocation5 + $0x78] sm:$0xff]  ;;  %v5181_v37 = vld [vmem:[%s6795_s23] ss:$0 sm:$0xff] }
 0x174   : > { %1022 = vmatpush1.bf16.msra.mxu0 %v5660_v20  ;;  %1231 = vmatpush1.bf16.msra.mxu1 %v5661_v21  ;;  %v915_v9 = vpack.c.bf16 %v907_v8, %v906_v7 }
 0x175   : > { %1023 = vmatprep.subr.bf16.mxu0 %v5662_v22  ;;  %1232 = vmatprep.subr.bf16.mxu1 %v5664_v23 }
 0x178   : > { %1024 = vmatpush1.bf16.msra.mxu0 %v5666_v24  ;;  %1233 = vmatpush1.bf16.msra.mxu1 %v5667_v25 }
 0x179   : > { %1025 = vmatprep.subr.bf16.mxu0 %v5668_v26  ;;  %1234 = vmatprep.subr.bf16.mxu1 %v5670_v27  ;;  %v6275_v27 = vmov 1966171168  }
 0x17c   : > { %1026 = vmatpush1.bf16.msra.mxu0 %v5672_v28  ;;  %1235 = vmatpush1.bf16.msra.mxu1 %v5673_v29  ;;  %v1380_v28 = vunpack.c.l.s4 %v6275_v27  ;;  %v1382_v29 = vlaneseq }
 0x17d   : > { %1027 = vmatprep.subr.bf16.mxu0 %v5674_v30  ;;  %1236 = vmatprep.subr.bf16.mxu1 %v5676_v33 }
 0x17e   : > { %v1381_v32 = vunpack.c.0.s8 %v1380_v28  ;;  %v6899_v33 = vshrl.u32 %v1382_v29, 7 }
 0x180   : > { %1028 = vmatpush1.bf16.msra.mxu0 %v5678_v34  ;;  %1237 = vmatpush1.bf16.msra.mxu1 %v5679_v35  ;;  %v6911_v49 = vsub.s32 0, %v6899_v33 }
 0x181   : > { %5454 = vmatprep.subr.bf16.mxu1 %v7837_v42 }
 0x183   : > { %1046 = vmatmul.mubr.bf16.vlgmr.msra.gmra.mxu0 %v908_v39  ;;  %1255 = vmatmul.mubr.bf16.vlgmr.msra.gmra.mxu1 %v6844_v40  ;;  %v6905_v39 = vsub.s32 %v1381_v32, %v6899_v33 }
 0x184   : > { %5455 = vmatpush3.bf16.msra.mxu1 %v5680_v41  ;;  %1055 = vmatprep.mubr.bf16.mxu0 %v7839_v3 }
 0x185   : > { %5456 = vmatprep.subr.bf16.mxu1 %v7837_v42  ;;  %5470 = vmatprep.mubr.msk.bf16.mxu1 %vm6274_vm0, %v7837_v42 }
 0x188   : > { %5457 = vmatpush3.bf16.msra.mxu1 %v5681_v43 }
 0x189   : > { %5458 = vmatprep.subr.bf16.mxu1 %v7837_v42 }
 0x18b   : > { %1056 = vmatmul.mubr.bf16.gmra.mxu0 %v909_v47 }
 0x18c   : > { %5459 = vmatpush3.bf16.msra.mxu1 %v5682_v46  ;;  %1065 = vmatprep.mubr.bf16.mxu0 %v7839_v3 }
 0x18d   : > { %5460 = vmatprep.subr.bf16.mxu1 %v7837_v42 }
 0x190   : > { %5461 = vmatpush3.bf16.msra.mxu1 %v5683_v48 }
 0x191   : > { %5462 = vmatprep.subr.bf16.mxu1 %v7837_v42 }
 0x193   : > { %1066 = vmatmul.mubr.bf16.gmra.mxu0 %v910_v51 }
 0x194   : > { %5463 = vmatpush3.bf16.msra.mxu1 %v5684_v52  ;;  %1075 = vmatprep.mubr.bf16.mxu0 %v7839_v3 }
 0x195   : > { %5464 = vmatprep.subr.bf16.mxu1 %v7837_v42 }
 0x198   : > { %5465 = vmatpush3.bf16.msra.mxu1 %v5685_v53 }
 0x199   : > { %5466 = vmatprep.subr.bf16.mxu1 %v7837_v42 }
 0x19b   : > { %1076 = vmatmul.mubr.bf16.gmra.mxu0 %v911_v56 }
 0x19c   : > { %5467 = vmatpush3.bf16.msra.mxu1 %v5686_v57  ;;  %1085 = vmatprep.mubr.bf16.mxu0 %v7839_v3 }
 0x19d   : > { %5468 = vmatprep.subr.bf16.mxu1 %v7837_v42 }
 0x1a0   : > { %5469 = vmatpush3.bf16.msra.mxu1 %v5687_v58 }
 0x1a3   : > { %1086 = vmatmul.mubr.bf16.gmra.mxu0 %v912_v62  ;;  %5471 = vmatmul.mubr.bf16.vlgmr.msra.gmra.mxu1 %v6874_v63 }
 0x1a4   : > { %1095 = vmatprep.mubr.bf16.mxu0 %v7839_v3  ;;  %3411 = vmatprep.mubr.bf16.mxu1 %v7839_v3 }
 0x1ab   : > { %1096 = vmatmul.mubr.bf16.gmra.mxu0 %v913_v2 }
 0x1ac   : > { %1105 = vmatprep.mubr.bf16.mxu0 %v7839_v3 }
 0x1b3   : > { %1106 = vmatmul.mubr.bf16.gmra.mxu0 %v914_v6 }
 0x1b4   : > { %1115 = vmatprep.mubr.bf16.mxu0 %v7839_v3 }
 0x1bb   : > { %1116 = vmatmul.mubr.bf16.gmra.mxu0 %v915_v9 }
 0x1bc   : > { %3370 = vmatprep.mubr.bf16.mxu0 %v6874_v63 }
 0x243   : > { %v1047_v10 = vpop.f32.mrf.mxu0  ;;  %v1256_v11 = vpop.f32.mrf.mxu1 }
 0x245   : > { %v6882_v12 = vpop.f32.mrf.mxu0  ;;  %v6884_v13 = vpop.f32.mrf.mxu1 }
 0x247   : > { %v1051_v14 = vpop.f32.mrf.mxu0  ;;  %v1260_v15 = vpop.f32.mrf.mxu1 }
 0x249   : > { %v6886_v16 = vpop.f32.mrf.mxu0  ;;  %v1261_v17 = vpop.f32.mrf.mxu1 }
 0x24b   : > { %v1057_v18 = vpop.f32.mrf.mxu0 }
 0x24d   : > { %v6888_v19 = vpop.f32.mrf.mxu0 }
 0x24f   : > { %v1061_v20 = vpop.f32.mrf.mxu0 }
 0x251   : > { %v6890_v21 = vpop.f32.mrf.mxu0 }
 0x253   : > { %v1067_v22 = vpop.f32.mrf.mxu0 }
 0x255   : > { %v6892_v23 = vpop.f32.mrf.mxu0 }
 0x257   : > { %v1071_v24 = vpop.f32.mrf.mxu0 }
 0x259   : > { %v6894_v25 = vpop.f32.mrf.mxu0 }
 0x25b   : > { %v1077_v26 = vpop.f32.mrf.mxu0 }
 0x25d   : > { %v6896_v30 = vpop.f32.mrf.mxu0 }
 0x25f   : > { %v1081_v31 = vpop.f32.mrf.mxu0 }
 0x261   : > { %v6901_v34 = vpop.f32.mrf.mxu0 }
 0x262   : > { %7897 = vst [vmem:[#allocation26_spill] sm:$0xff] %v6901_v34 }
 0x263   : > { %v1087_v35 = vpop.f32.mrf.mxu0  ;;  %v1362_v36 = vpop.f32.mrf.mxu1 }
 0x264   : > { %v1368_v38 = vadd.f32 %v1362_v36, %v1256_v11 }
 0x265   : > { %v6907_v41 = vpop.f32.mrf.mxu0  ;;  %v5472_v43 = vpop.f32.mrf.mxu1 }
 0x266   : > { %v1376_v44 = vadd.f32 %v5181_v37, %v1368_v38 }
 0x267   : > { %v1091_v45 = vpop.f32.mrf.mxu0  ;;  %v1365_v46 = vpop.f32.mrf.mxu1 }
 0x268   : > { %v1378_v47 = vcombine.high %v1376_v44, %v1376_v44  ;;  %v1385_v48 = vrot.slane %v1376_v44, %v6905_v39 }
 0x269   : > { %v6913_v50 = vpop.f32.mrf.mxu0  ;;  %v5473_v51 = vpop.f32.mrf.mxu1 }
 0x26a   : > { %v1393_v52 = vcombine.high %v1385_v48, %v1385_v48  ;;  %v1401_v53 = vrot.slane %v1385_v48, %v6905_v39  ;;  %v1392_v54 = vrot.slane %v1378_v47, %v6905_v39 }
 0x26b   : > { %v1097_v55 = vpop.f32.mrf.mxu0 }
 0x26c   : > { %v1415_v56 = vrot.slane %v1393_v52, %v6905_v39  ;;  %v1423_v57 = vcombine.high %v1401_v53, %v1401_v53  ;;  %v1430_v58 = vrot.slane %v1401_v53, %v6911_v49  ;;  %v1408_v1 = vrot.slane %v1392_v54, %v6905_v39 }
 0x26d   : > { %v6919_v59 = vpop.f32.mrf.mxu0  ;;  %v1394_v7 = vcombine.high %v1392_v54, %v1392_v54 }
 0x26e   : > { %v1434_v60 = vrot.slane %v1415_v56, %v6911_v49  ;;  %v1467_v61 = vadd.f32 %v1430_v58, %v1047_v10  ;;  %v1438_v62 = vrot.slane %v1423_v57, %v6911_v49  ;;  %v1468_v0 = vadd.f32 %v1430_v58, %v1051_v14 }
 0x26f   : > { %v1101_v2 = vpop.f32.mrf.mxu0  ;;  %v1425_v8 = vcombine.high %v1415_v56, %v1415_v56  ;;  %v1446_v11 = vrot.slane %v1408_v1, %v6911_v49  ;;  %v1424_v37 = vcombine.high %v1408_v1, %v1408_v1 }
 0x270   : > { %v1469_v4 = vadd.f32 %v1434_v60, %v1057_v18  ;;  %v1470_v5 = vadd.f32 %v1434_v60, %v1061_v20  ;;  %5704 = vtanh.f32 %v1467_v61  ;;  %v1471_v9 = vadd.f32 %v1438_v62, %v1067_v22 }
 0x271   : > { %v6924_v6 = vpop.f32.mrf.mxu0  ;;  %5706 = vtanh.f32 %v1468_v0  ;;  %v1472_v10 = vadd.f32 %v1438_v62, %v1071_v24  ;;  %v1442_v17 = vrot.slane %v1425_v8, %v6911_v49  ;;  %v1475_v18 = vadd.f32 %v1446_v11, %v1087_v35  ;;  %v6935_v24 = vld [vmem:[%s6797_s17] ss:$0 sm:$0xff] }
 0x272   : > { %7898 = vst [vmem:[#allocation27_spill] sm:$0xff] %v6924_v6  ;;  %5708 = vtanh.f32 %v1469_v4  ;;  %v1422_v20 = vrot.slane %v1394_v7, %v6905_v39  ;;  %v1476_v28 = vadd.f32 %v1446_v11, %v1091_v45  ;;  %v1454_v45 = vrot.slane %v1424_v37, %v6911_v49 }
 0x273   : > { %v1107_v15 = vpop.f32.mrf.mxu0  ;;  %5710 = vtanh.f32 %v1470_v5  ;;  %v1473_v22 = vadd.f32 %v1442_v17, %v1077_v26  ;;  %v1474_v38 = vadd.f32 %v1442_v17, %v1081_v31 }
 0x274   : > { %5712 = vtanh.f32 %v1471_v9  ;;  %v1450_v36 = vrot.slane %v1422_v20, %v6911_v49  ;;  %v1426_v51 = vcombine.high %v1422_v20, %v1422_v20  ;;  %v1479_v31 = vadd.f32 %v1454_v45, %v1107_v15 }
 0x275   : > { %v6927_v14 = vpop.f32.mrf.mxu0  ;;  %5714 = vtanh.f32 %v1472_v10 }
 0x276   : > { %7899 = vst [vmem:[#allocation28_spill] sm:$0xff] %v6927_v14  ;;  %5716 = vtanh.f32 %v1475_v18  ;;  %v1477_v35 = vadd.f32 %v1450_v36, %v1097_v55  ;;  %v1478_v26 = vadd.f32 %v1450_v36, %v1101_v2  ;;  %v1458_v58 = vrot.slane %v1426_v51, %v6911_v49 }
 0x277   : > { %v1111_v27 = vpop.f32.mrf.mxu0  ;;  %5718 = vtanh.f32 %v1476_v28 }
 0x278   : > { %5720 = vtanh.f32 %v1473_v22  ;;  %v1480_v57 = vadd.f32 %v1454_v45, %v1111_v27 }
 0x279   : > { %v6931_v32 = vpop.f32.mrf.mxu0  ;;  %5722 = vtanh.f32 %v1474_v38 }
 0x27a   : > { %7900 = vst [vmem:[#allocation29_spill] sm:$0xff] %v6931_v32  ;;  %5724 = vtanh.f32 %v1477_v35 }
 0x27b   : > { %v1117_v44 = vpop.f32.mrf.mxu0  ;;  %5726 = vtanh.f32 %v1478_v26 }
 0x27c   : > { %5728 = vtanh.f32 %v1479_v31  ;;  %v1481_v0 = vadd.f32 %v1458_v58, %v1117_v44 }
 0x27d   : > { %v5705_v43 = vpop.eup %5704  ;;  %v6940_v54 = vpop.f32.mrf.mxu0  ;;  %5730 = vtanh.f32 %v1480_v57 }
 0x27e   : > { %v5707_v46 = vpop.eup %5706  ;;  %v1506_v47 = vmul.f32 %v5705_v43, %v6935_v24  ;;  %7901 = vst [vmem:[#allocation30_spill] sm:$0xff] %v6940_v54  ;;  %5732 = vtanh.f32 %v1481_v0 }
 0x27f   : > { %v5709_v48 = vpop.eup %5708  ;;  %v1507_v56 = vmul.f32 %v5707_v46, %v6935_v24  ;;  %v1121_v62 = vpop.f32.mrf.mxu0 }
 0x280   : > { %1522 = vadd.xlane.f32.xlu0 %v1506_v47  ;;  %v1508_v52 = vmul.f32 %v5709_v48, %v6935_v24  ;;  %v5711_v53 = vpop.eup %5710  ;;  %v1482_v4 = vadd.f32 %v1458_v58, %v1121_v62 }
 0x281   : > { %v5713_v55 = vpop.eup %5712  ;;  %v1509_v60 = vmul.f32 %v5711_v53, %v6935_v24  ;;  %v1571_v53 = vand.u32 127, %v1382_v29 }
 0x282   : > { %1526 = vadd.xlane.f32.xlu1 %v1508_v52  ;;  %v5715_v61 = vpop.eup %5714  ;;  %v1510_v1 = vmul.f32 %v5713_v55, %v6935_v24  ;;  %5734 = vtanh.f32 %v1482_v4 }
 0x283   : > { %v5717_v2 = vpop.eup %5716  ;;  %v1511_v5 = vmul.f32 %v5715_v61, %v6935_v24 }
 0x284   : > { %1524 = vadd.xlane.f32.xlu0 %v1507_v56  ;;  %v5719_v7 = vpop.eup %5718  ;;  %v1514_v8 = vmul.f32 %v5717_v2, %v6935_v24  ;;  %v1576_v56 = vadd.s32 4294967288, %v1571_v53 }
 0x285   : > { %v5721_v9 = vpop.eup %5720  ;;  %v1515_v11 = vmul.f32 %v5719_v7, %v6935_v24 }
 0x286   : > { %1528 = vadd.xlane.f32.xlu1 %v1509_v60  ;;  %v5723_v15 = vpop.eup %5722  ;;  %v1512_v10 = vmul.f32 %v5721_v9, %v6935_v24  ;;  %v6977_v57 = vsub.s32 %v1576_v56, %v6899_v33  ;;  %v6982_v60 = vsub.s32 %v1571_v53, %v6899_v33 }
 0x287   : > { %v5725_v17 = vpop.eup %5724  ;;  %v1513_v18 = vmul.f32 %v5723_v15, %v6935_v24 }
 0x288   : > { %1530 = vadd.xlane.f32.xlu0 %v1510_v1  ;;  %v5727_v20 = vpop.eup %5726  ;;  %v1516_v27 = vmul.f32 %v5725_v17, %v6935_v24 }
 0x289   : > { %v5729_v28 = vpop.eup %5728  ;;  %v1517_v22 = vmul.f32 %v5727_v20, %v6935_v24 }
 0x28a   : > { %1532 = vadd.xlane.f32.xlu1 %v1511_v5  ;;  %v5731_v36 = vpop.eup %5730  ;;  %v1518_v37 = vmul.f32 %v5729_v28, %v6935_v24 }
 0x28b   : > { %v5733_v38 = vpop.eup %5732  ;;  %v1519_v43 = vmul.f32 %v5731_v36, %v6935_v24 }
 0x28c   : > { %1538 = vadd.xlane.f32.xlu0 %v1514_v8  ;;  %v1520_v46 = vmul.f32 %v5733_v38, %v6935_v24 }
 0x28e   : > { %1540 = vadd.xlane.f32.xlu1 %v1515_v11 }
 0x28f   : > { %v5735_v44 = vpop.eup %5734 }
 0x290   : > { %1534 = vadd.xlane.f32.xlu0 %v1512_v10  ;;  %v1521_v35 = vmul.f32 %v5735_v44, %v6935_v24 }
 0x292   : > { %1536 = vadd.xlane.f32.xlu1 %v1513_v18 }
 0x294   : > { %1542 = vadd.xlane.f32.xlu0 %v1516_v27 }
 0x296   : > { %1544 = vadd.xlane.f32.xlu1 %v1517_v22 }
 0x298   : > { %1546 = vadd.xlane.f32.xlu0 %v1518_v37 }
 0x29a   : > { %1548 = vadd.xlane.f32.xlu1 %v1519_v43 }
 0x29c   : > { %1550 = vadd.xlane.f32.xlu0 %v1520_v46 }
 0x29e   : > { %1552 = vadd.xlane.f32.xlu1 %v1521_v35 }
 0x309   : > { %v6957_v47 = vpop.xlane.xlu0 %1522 }
 0x30a   : > { %v1575_v7 = vrot.slane %v6957_v47, %v6982_v60 }
 0x30b   : > { %v6959_v48 = vpop.xlane.xlu1 %1526 }
 0x30c   : > { %v1586_v0 = vrot.slane %v6959_v48, %v6982_v60 }
 0x30d   : > { %v6961_v45 = vpop.xlane.xlu0 %1524 }
 0x30e   : > { %v1580_v1 = vrot.slane %v6961_v45, %v6977_v57 }
 0x30f   : > { %v6963_v26 = vpop.xlane.xlu1 %1528 }
 0x310   : > { %v1590_v61 = vrot.slane %v6963_v26, %v6977_v57  ;;  %v1582_v10 = vsel %vm1581_vm1, %v1580_v1, %v1575_v7 }
 0x311   : > { %v6965_v51 = vpop.xlane.xlu0 %1530 }
 0x312   : > { %v1595_v4 = vrot.slane %v6965_v51, %v6982_v60  ;;  %v1591_v8 = vsel %vm1581_vm1, %v1590_v61, %v1586_v0 }
 0x313   : > { %v6967_v52 = vpop.xlane.xlu1 %1532  ;;  %v1647_v20 = vsel %vm1646_vm2, %v1591_v8, %v1582_v10 }
 0x314   : > { %v1599_v29 = vrot.slane %v6967_v52, %v6977_v57 }
 0x315   : > { %v6970_v31 = vpop.xlane.xlu0 %1538 }
 0x316   : > { %v1600_v11 = vsel %vm1581_vm1, %v1599_v29, %v1595_v4  ;;  %v1613_v38 = vrot.slane %v6970_v31, %v6982_v60 }
 0x317   : > { %v6972_v55 = vpop.xlane.xlu1 %1540  ;;  %v1649_v22 = vsel %vm1648_vm3, %v1600_v11, %v1647_v20  ;;  %v7042_v11 = vsub.s32 1, %v6899_v33  ;;  %v7047_v20 = vsub.s32 5, %v6899_v33 }
 0x318   : > { %v1617_v27 = vrot.slane %v6972_v55, %v6977_v57 }
 0x319   : > { %v6974_v24 = vpop.xlane.xlu0 %1534 }
 0x31a   : > { %v1604_v9 = vrot.slane %v6974_v24, %v6982_v60  ;;  %v1618_v53 = vsel %vm1581_vm1, %v1617_v27, %v1613_v38  ;;  %v7056_v38 = vsub.s32 6, %v6899_v33 }
 0x31b   : > { %v6979_v58 = vpop.xlane.xlu1 %1536 }
 0x31c   : > { %v1608_v2 = vrot.slane %v6979_v58, %v6977_v57 }
 0x31d   : > { %v6988_v62 = vpop.xlane.xlu0 %1542 }
 0x31e   : > { %v1609_v17 = vsel %vm1581_vm1, %v1608_v2, %v1604_v9  ;;  %v1622_v36 = vrot.slane %v6988_v62, %v6982_v60 }
 0x31f   : > { %v6998_v5 = vpop.xlane.xlu1 %1544  ;;  %v1651_v43 = vsel %vm1650_vm4, %v1609_v17, %v1649_v22 }
 0x320   : > { %v1626_v18 = vrot.slane %v6998_v5, %v6977_v57  ;;  %v1653_v1 = vsel %vm1652_vm5, %v1618_v53, %v1651_v43 }
 0x321   : > { %v7006_v15 = vpop.xlane.xlu0 %1546 }
 0x322   : > { %v1631_v44 = vrot.slane %v7006_v15, %v6982_v60  ;;  %v1627_v35 = vsel %vm1581_vm1, %v1626_v18, %v1622_v36  ;;  %v7052_v36 = vsub.s32 2, %v6899_v33 }
 0x323   : > { %v7015_v28 = vpop.xlane.xlu1 %1548  ;;  %v1655_v2 = vsel %vm1654_vm6, %v1627_v35, %v1653_v1 }
 0x324   : > { %v1635_v37 = vrot.slane %v7015_v28, %v6977_v57 }
 0x325   : > { %v1551_v46 = vpop.xlane.xlu0 %1550 }
 0x326   : > { %v1636_v61 = vsel %vm1581_vm1, %v1635_v37, %v1631_v44  ;;  %v1640_v29 = vrot.slane %v1551_v46, %v6982_v60 }
 0x327   : > { %v7029_v56 = vpop.xlane.xlu1 %1552  ;;  %v1657_v7 = vsel %vm1656_vm7, %v1636_v61, %v1655_v2 }
 0x328   : > { %v1644_v0 = vrot.slane %v7029_v56, %v6977_v57 }
 0x32a   : > { %v1645_v4 = vsel %vm1581_vm1, %v1644_v0, %v1640_v29  ;;  %v7070_v0 = vsub.s32 3, %v6899_v33 }
 0x32b   : > { %v1659_v8 = vsel %vm1658_vm8, %v1645_v4, %v1657_v7 }
 0x32c   : > { %v1662_v9 = vsel %vm1661_vm9, %v1659_v8, -inf }
 0x32d   : > { %1663 = vmax.xlane.f32.xlu0 %v1662_v9 }
 0x3b6   : > { %v1664_v10 = vpop.xlane.xlu0 %1663 }
 0x3b7   : > { %v1669_v17 = vrot.slane %v1664_v10, %v6911_v49  ;;  %v1673_v18 = vrot.slane %v1664_v10, %v7042_v11  ;;  %v7059_v43 = vrot.slane %v1664_v10, %v7047_v20  ;;  %v1677_v53 = vrot.slane %v1664_v10, %v7052_v36 }
 0x3b8   : > { %v1681_v8 = vrot.slane %v1664_v10, %v7070_v0 }
 0x3b9   : > { %v1706_v27 = vsub.f32 %v6957_v47, %v1669_v17  ;;  %v1707_v22 = vsub.f32 %v6961_v45, %v1669_v17  ;;  %v1708_v37 = vsub.f32 %v6959_v48, %v1673_v18  ;;  %v1709_v61 = vsub.f32 %v6963_v26, %v1673_v18 }
 0x3ba   : > { %v7064_v45 = vsub.s32 7, %v6899_v33  ;;  %v1693_v48 = vrot.slane %v1664_v10, %v7056_v38  ;;  %v1716_v29 = vsub.f32 %v6988_v62, %v7059_v43  ;;  %v1710_v1 = vsub.f32 %v6965_v51, %v1677_v53 }
 0x3bb   : > { %v1722_v44 = vmul.f32 1.442695, %v1706_v27  ;;  %v1724_v35 = vmul.f32 1.442695, %v1707_v22  ;;  %v1726_v47 = vmul.f32 1.442695, %v1708_v37  ;;  %v1711_v9 = vsub.f32 %v6967_v52, %v1677_v53 }
 0x3bc   : > { %v1728_v2 = vmul.f32 1.442695, %v1709_v61  ;;  %v1697_v26 = vrot.slane %v1664_v10, %v7064_v45  ;;  %v1718_v4 = vsub.f32 %v7006_v15, %v1693_v48  ;;  %v1742_v7 = vmul.f32 1.442695, %v1716_v29 }
 0x3bd   : > { %5736 = vpow2.f32 %v1722_v44  ;;  %v1730_v17 = vmul.f32 1.442695, %v1710_v1  ;;  %v7078_v27 = vsub.s32 4, %v6899_v33  ;;  %v1712_v51 = vsub.f32 %v6974_v24, %v1681_v8 }
 0x3be   : > { %5738 = vpow2.f32 %v1724_v35  ;;  %v1720_v18 = vsub.f32 %v1551_v46, %v1697_v26  ;;  %v1746_v62 = vmul.f32 1.442695, %v1718_v4  ;;  %v1732_v22 = vmul.f32 1.442695, %v1711_v9 }
 0x3bf   : > { %5740 = vpow2.f32 %v1726_v47  ;;  %v1685_v52 = vrot.slane %v1664_v10, %v7078_v27  ;;  %v1713_v46 = vsub.f32 %v6979_v58, %v1681_v8  ;;  %v1734_v33 = vmul.f32 1.442695, %v1712_v51 }
 0x3c0   : > { %5742 = vpow2.f32 %v1728_v2  ;;  %v1750_v44 = vmul.f32 1.442695, %v1720_v18 }
 0x3c1   : > { %5744 = vpow2.f32 %v1742_v7  ;;  %v1714_v24 = vsub.f32 %v6970_v31, %v1685_v52  ;;  %v1736_v53 = vmul.f32 1.442695, %v1713_v46  ;;  %v1715_v10 = vsub.f32 %v6972_v55, %v1685_v52 }
 0x3c2   : > { %5746 = vpow2.f32 %v1730_v17  ;;  %v1717_v31 = vsub.f32 %v6998_v5, %v7059_v43  ;;  %v1719_v7 = vsub.f32 %v7015_v28, %v1693_v48  ;;  %v1721_v5 = vsub.f32 %v7029_v56, %v1697_v26 }
 0x3c3   : > { %5748 = vpow2.f32 %v1746_v62  ;;  %v1738_v58 = vmul.f32 1.442695, %v1714_v24  ;;  %v1740_v2 = vmul.f32 1.442695, %v1715_v10 }
 0x3c4   : > { %5750 = vpow2.f32 %v1732_v22  ;;  %v1744_v8 = vmul.f32 1.442695, %v1717_v31  ;;  %v1748_v43 = vmul.f32 1.442695, %v1719_v7  ;;  %v1752_v18 = vmul.f32 1.442695, %v1721_v5 }
 0x3c5   : > { %5752 = vpow2.f32 %v1750_v44 }
 0x3c6   : > { %5754 = vpow2.f32 %v1734_v33 }
 0x3c7   : > { %5756 = vpow2.f32 %v1736_v53 }
 0x3c8   : > { %5758 = vpow2.f32 %v1738_v58 }
 0x3c9   : > { %5760 = vpow2.f32 %v1740_v2 }
 0x3ca   : > { %v7081_v37 = vpop.eup %5736  ;;  %5762 = vpow2.f32 %v1744_v8 }
 0x3cb   : > { %v7083_v15 = vpop.eup %5738  ;;  %1771 = vperm.xlu1 %5630, %v7081_v37   ;;  %5764 = vpow2.f32 %v1748_v43 }
 0x3cc   : > { %1774 = vperm.xlu0 %5631, %v7083_v15   ;;  %v7089_v35 = vpop.eup %5740  ;;  %5766 = vpow2.f32 %v1752_v18 }
 0x3cd   : > { %v7093_v61 = vpop.eup %5742 }
 0x3ce   : > { %v7096_v47 = vpop.eup %5744 }
 0x3cf   : > { %1777 = vperm.xlu1 %5630, %v7089_v35   ;;  %v7100_v29 = vpop.eup %5746 }
 0x3d0   : > { %1801 = vperm.xlu0 %5631, %v7096_v47   ;;  %v7103_v1 = vpop.eup %5748 }
 0x3d1   : > { %v7108_v4 = vpop.eup %5750 }
 0x3d2   : > { %v7111_v55 = vpop.eup %5752 }
 0x3d3   : > { %1780 = vperm.xlu1 %5630, %v7093_v61   ;;  %v7115_v9 = vpop.eup %5754 }
 0x3d4   : > { %1807 = vperm.xlu0 %5631, %v7103_v1   ;;  %v7119_v17 = vpop.eup %5756 }
 0x3d5   : > { %v7122_v62 = vpop.eup %5758 }
 0x3d6   : > { %v7125_v28 = vpop.eup %5760 }
 0x3d7   : > { %1783 = vperm.xlu1 %5630, %v7100_v29   ;;  %v7128_v48 = vpop.eup %5762 }
 0x3d8   : > { %1813 = vperm.xlu0 %5631, %v7111_v55   ;;  %v7131_v56 = vpop.eup %5764 }
 0x3d9   : > { %v7134_v26 = vpop.eup %5766 }
 0x3db   : > { %1786 = vperm.xlu1 %5630, %v7108_v4  }
 0x3df   : > { %1789 = vperm.xlu1 %5630, %v7115_v9  }
 0x3e3   : > { %1792 = vperm.xlu1 %5630, %v7119_v17  }
 0x3e7   : > { %1795 = vperm.xlu1 %5630, %v7122_v62  }
 0x3eb   : > { %1798 = vperm.xlu1 %5630, %v7125_v28  }
 0x3ef   : > { %1804 = vperm.xlu1 %5630, %v7128_v48  }
 0x3f3   : > { %1810 = vperm.xlu1 %5630, %v7131_v56  }
 0x3f7   : > { %1816 = vperm.xlu1 %5630, %v7134_v26  }
 0x446   : > { %v1772_v51 = vpop.permute.xlu1 %1771 }
 0x447   : > { %v1775_v24 = vpop.permute.xlu0 %1774  ;;  %v1821_v18 = vrot.slane %v1772_v51, %v6982_v60 }
 0x448   : > { %v1825_v43 = vrot.slane %v1775_v24, %v6977_v57 }
 0x44a   : > { %v1778_v22 = vpop.permute.xlu1 %1777  ;;  %v1826_v51 = vsel %vm1581_vm1, %v1825_v43, %v1821_v18 }
 0x44b   : > { %v1802_v58 = vpop.permute.xlu0 %1801  ;;  %v1830_v42 = vrot.slane %v1778_v22, %v6982_v60 }
 0x44c   : > { %v1866_v22 = vrot.slane %v1802_v58, %v6982_v60 }
 0x44e   : > { %v1781_v44 = vpop.permute.xlu1 %1780 }
 0x44f   : > { %v1834_v2 = vrot.slane %v1781_v44, %v6977_v57  ;;  %v1808_v7 = vpop.permute.xlu0 %1807 }
 0x451   : > { %v1835_v6 = vsel %vm1581_vm1, %v1834_v2, %v1830_v42 }
 0x452   : > { %v1784_v52 = vpop.permute.xlu1 %1783  ;;  %v1890_v42 = vsel %vm1646_vm2, %v1835_v6, %v1826_v51 }
 0x453   : > { %v1839_v32 = vrot.slane %v1784_v52, %v6982_v60 }
 0x456   : > { %v1787_v46 = vpop.permute.xlu1 %1786 }
 0x457   : > { %v1843_v8 = vrot.slane %v1787_v46, %v6977_v57 }
 0x459   : > { %v1844_v46 = vsel %vm1581_vm1, %v1843_v8, %v1839_v32 }
 0x45a   : > { %v1790_v33 = vpop.permute.xlu1 %1789  ;;  %v1891_v32 = vsel %vm1648_vm3, %v1844_v46, %v1890_v42  ;;  %v2204_v46 = vld [vmem:[%s6799_s28 + $0x1e0] sm:$0xff] }
 0x45b   : > { %v1848_v44 = vrot.slane %v1790_v33, %v6982_v60  ;;  %v1814_v33 = vpop.permute.xlu0 %1813  ;;  %v2184_v42 = vld [vmem:[%s6799_s28 + $0x140] sm:$0xff] }
 0x45e   : > { %v1793_v53 = vpop.permute.xlu1 %1792 }
 0x45f   : > { %v1852_v3 = vrot.slane %v1793_v53, %v6977_v57 }
 0x461   : > { %v1853_v53 = vsel %vm1581_vm1, %v1852_v3, %v1848_v44  ;;  %v2200_v44 = vld [vmem:[%s6799_s28 + $0x1c0] sm:$0xff] }
 0x462   : > { %v1796_v10 = vpop.permute.xlu1 %1795  ;;  %v1892_v8 = vsel %vm1650_vm4, %v1853_v53, %v1891_v32  ;;  %v5240_v51 = vcombine.high %v2200_v44, %v2204_v46  ;;  %v2196_v53 = vld [vmem:[%s6799_s28 + $0x1a0] sm:$0xff] }
 0x463   : > { %v1857_v24 = vrot.slane %v1796_v10, %v6982_v60 }
 0x464   : > { %3338 = vmatprep.subr.bf16.mxu0 %v5240_v51  ;;  %v2144_v51 = vld [vmem:[%s6799_s28] sm:$0xff] }
 0x466   : > { %v1799_v31 = vpop.permute.xlu1 %1798 }
 0x467   : > { %v1861_v54 = vrot.slane %v1799_v31, %v6977_v57  ;;  %v1875_v31 = vrot.slane %v1808_v7, %v6982_v60 }
 0x469   : > { %v1862_v2 = vsel %vm1581_vm1, %v1861_v54, %v1857_v24  ;;  %v5239_v24 = vcombine.low %v2200_v44, %v2204_v46  ;;  %v2156_v44 = vld [vmem:[%s6799_s28 + $0x60] sm:$0xff] }
 0x46a   : > { %v1805_v5 = vpop.permute.xlu1 %1804  ;;  %v1893_v6 = vsel %vm1652_vm5, %v1862_v2, %v1892_v8  ;;  %v2180_v8 = vld [vmem:[%s6799_s28 + $0x120] sm:$0xff] }
 0x46b   : > { %v1870_v14 = vrot.slane %v1805_v5, %v6977_v57  ;;  %3339 = vmatpush1.bf16.msra.mxu0 %v5239_v24 }
 0x46d   : > { %v1871_v10 = vsel %vm1581_vm1, %v1870_v14, %v1866_v22  ;;  %v2192_v22 = vld [vmem:[%s6799_s28 + $0x180] sm:$0xff] }
 0x46e   : > { %v1811_v34 = vpop.permute.xlu1 %1810  ;;  %v1894_v54 = vsel %vm1654_vm6, %v1871_v10, %v1893_v6  ;;  %v2176_v10 = vld [vmem:[%s6799_s28 + $0x100] sm:$0xff] }
 0x46f   : > { %v1879_v52 = vrot.slane %v1811_v34, %v6977_v57  ;;  %v1884_v34 = vrot.slane %v1814_v33, %v6982_v60  ;;  %v2188_v33 = vld [vmem:[%s6799_s28 + $0x160] sm:$0xff] }
 0x470   : > { %v5223_v2 = vcombine.low %v2184_v42, %v2188_v33  ;;  %v5224_v32 = vcombine.high %v2184_v42, %v2188_v33  ;;  %v2172_v6 = vld [vmem:[%s6799_s28 + $0xe0] sm:$0xff] }
 0x471   : > { %v1880_v58 = vsel %vm1581_vm1, %v1879_v52, %v1875_v31  ;;  %v5231_v52 = vcombine.low %v2192_v22, %v2196_v53  ;;  %v5232_v31 = vcombine.high %v2192_v22, %v2196_v53  ;;  %v2148_v22 = vld [vmem:[%s6799_s28 + $0x20] sm:$0xff] }
 0x472   : > { %v1817_v3 = vpop.permute.xlu1 %1816  ;;  %v1895_v43 = vsel %vm1656_vm7, %v1880_v58, %v1894_v54  ;;  %v5215_v58 = vcombine.low %v2176_v10, %v2180_v8  ;;  %v2268_v42 = vld [vmem:[%s6799_s28 + $0x3e0] sm:$0xff]  ;;  %v5183_v33 = vcombine.low %v2144_v51, %v2148_v22 }
 0x473   : > { %v1888_v7 = vrot.slane %v1817_v3, %v6977_v57  ;;  %3340 = vmatprep.subr.bf16.mxu0 %v5232_v31  ;;  %v5216_v3 = vcombine.high %v2176_v10, %v2180_v8  ;;  %v2264_v31 = vld [vmem:[%s6799_s28 + $0x3c0] sm:$0xff] }
 0x474   : > { %3341 = vmatpush1.bf16.msra.mxu0 %v5231_v52  ;;  %v5184_v52 = vcombine.high %v2144_v51, %v2148_v22  ;;  %v2260_v10 = vld [vmem:[%s6799_s28 + $0x3a0] sm:$0xff]  ;;  %v5303_v8 = vcombine.low %v2264_v31, %v2268_v42 }
 0x475   : > { %v1889_v5 = vsel %vm1581_vm1, %v1888_v7, %v1884_v34  ;;  %3342 = vmatprep.subr.bf16.mxu0 %v5224_v32  ;;  %v2168_v34 = vld [vmem:[%s6799_s28 + $0xc0] sm:$0xff] }
 0x476   : > { %v1896_v14 = vsel %vm1658_vm8, %v1889_v5, %v1895_v43  ;;  %v2160_v7 = vld [vmem:[%s6799_s28 + $0x80] sm:$0xff]  ;;  %v5207_v54 = vcombine.low %v2168_v34, %v2172_v6  ;;  %v5208_v5 = vcombine.high %v2168_v34, %v2172_v6 }
 0x477   : > { %v1898_v18 = vsel %vm1661_vm9, %v1896_v14, 0.0  ;;  %v2164_v43 = vld [vmem:[%s6799_s28 + $0xa0] sm:$0xff] }
 0x478   : > { %1899 = vadd.xlane.f32.xlu0 %v1898_v18  ;;  %3343 = vmatpush1.bf16.msra.mxu0 %v5223_v2  ;;  %v5200_v14 = vcombine.high %v2160_v7, %v2164_v43  ;;  %v2152_v18 = vld [vmem:[%s6799_s28 + $0x40] sm:$0xff]  ;;  %v5199_v46 = vcombine.low %v2160_v7, %v2164_v43  ;;  %v5304_v2 = vcombine.high %v2264_v31, %v2268_v42 }
 0x479   : > { %3344 = vmatprep.subr.bf16.mxu0 %v5216_v3  ;;  %v5192_v24 = vcombine.high %v2152_v18, %v2156_v44  ;;  %v5191_v53 = vcombine.low %v2152_v18, %v2156_v44  ;;  %v2256_v32 = vld [vmem:[%s6799_s28 + $0x380] sm:$0xff] }
 0x47a   : > { %v2248_v3 = vld [vmem:[%s6799_s28 + $0x340] sm:$0xff]  ;;  %v5295_v6 = vcombine.low %v2256_v32, %v2260_v10 }
 0x47b   : > { %v2252_v34 = vld [vmem:[%s6799_s28 + $0x360] sm:$0xff] }
 0x47c   : > { %3345 = vmatpush1.bf16.msra.mxu0 %v5215_v58  ;;  %v5296_v58 = vcombine.high %v2256_v32, %v2260_v10  ;;  %v5288_v7 = vcombine.high %v2248_v3, %v2252_v34  ;;  %v5287_v43 = vcombine.low %v2248_v3, %v2252_v34  ;;  %v2232_v18 = vld [vmem:[%s6799_s28 + $0x2c0] sm:$0xff]  ;;  %v2201_v3 = vld [vmem:[%s6799_s28 + $0x1c8] sm:$0xff] }
 0x47d   : > { %3346 = vmatprep.subr.bf16.mxu0 %v5208_v5  ;;  %v2244_v5 = vld [vmem:[%s6799_s28 + $0x320] sm:$0xff]  ;;  %v2205_v34 = vld [vmem:[%s6799_s28 + $0x1e8] sm:$0xff] }
 0x47e   : > { %v2236_v44 = vld [vmem:[%s6799_s28 + $0x2e0] sm:$0xff] }
 0x47f   : > { %v2224_v51 = vld [vmem:[%s6799_s28 + $0x280] sm:$0xff] }
 0x480   : > { %3347 = vmatpush1.bf16.msra.mxu0 %v5207_v54  ;;  %v2240_v54 = vld [vmem:[%s6799_s28 + $0x300] sm:$0xff] }
 0x481   : > { %3348 = vmatprep.subr.bf16.mxu0 %v5200_v14  ;;  %v5280_v14 = vcombine.high %v2240_v54, %v2244_v5  ;;  %v2228_v22 = vld [vmem:[%s6799_s28 + $0x2a0] sm:$0xff] }
 0x482   : > { %v2216_v31 = vld [vmem:[%s6799_s28 + $0x240] sm:$0xff] }
 0x483   : > { %v2220_v42 = vld [vmem:[%s6799_s28 + $0x260] sm:$0xff] }
 0x484   : > { %3349 = vmatpush1.bf16.msra.mxu0 %v5199_v46  ;;  %v5279_v46 = vcombine.low %v2240_v54, %v2244_v5  ;;  %v2208_v32 = vld [vmem:[%s6799_s28 + $0x200] sm:$0xff]  ;;  %v2193_v54 = vld [vmem:[%s6799_s28 + $0x188] sm:$0xff] }
 0x485   : > { %3350 = vmatprep.subr.bf16.mxu0 %v5192_v24  ;;  %v5272_v24 = vcombine.high %v2232_v18, %v2236_v44  ;;  %v2212_v10 = vld [vmem:[%s6799_s28 + $0x220] sm:$0xff]  ;;  %v2197_v5 = vld [vmem:[%s6799_s28 + $0x1a8] sm:$0xff] }
 0x488   : > { %3351 = vmatpush1.bf16.msra.mxu0 %v5191_v53  ;;  %v5271_v53 = vcombine.low %v2232_v18, %v2236_v44  ;;  %v2185_v18 = vld [vmem:[%s6799_s28 + $0x148] sm:$0xff] }
 0x489   : > { %3352 = vmatprep.subr.bf16.mxu0 %v5184_v52  ;;  %v5264_v52 = vcombine.high %v2224_v51, %v2228_v22  ;;  %v2189_v44 = vld [vmem:[%s6799_s28 + $0x168] sm:$0xff] }
 0x48c   : > { %3353 = vmatpush1.bf16.msra.mxu0 %v5183_v33  ;;  %v5263_v33 = vcombine.low %v2224_v51, %v2228_v22  ;;  %v2177_v51 = vld [vmem:[%s6799_s28 + $0x108] sm:$0xff] }
 0x48d   : > { %3354 = vmatprep.subr.bf16.mxu0 %v5304_v2  ;;  %v5256_v2 = vcombine.high %v2216_v31, %v2220_v42  ;;  %v2181_v22 = vld [vmem:[%s6799_s28 + $0x128] sm:$0xff] }
 0x490   : > { %3355 = vmatpush2.bf16.msra.mxu0 %v5303_v8  ;;  %v5255_v8 = vcombine.low %v2216_v31, %v2220_v42  ;;  %v5218_v31 = vcombine.high %v2177_v51, %v2181_v22  ;;  %v2169_v42 = vld [vmem:[%s6799_s28 + $0xc8] sm:$0xff] }
 0x491   : > { %3356 = vmatprep.subr.bf16.mxu0 %v5296_v58  ;;  %v5248_v58 = vcombine.high %v2208_v32, %v2212_v10 }
 0x494   : > { %3357 = vmatpush2.bf16.msra.mxu0 %v5295_v6  ;;  %v5247_v6 = vcombine.low %v2208_v32, %v2212_v10  ;;  %v2161_v10 = vld [vmem:[%s6799_s28 + $0x88] sm:$0xff] }
 0x495   : > { %3358 = vmatprep.subr.bf16.mxu0 %v5288_v7  ;;  %v5242_v7 = vcombine.high %v2201_v3, %v2205_v34 }
 0x498   : > { %3359 = vmatpush2.bf16.msra.mxu0 %v5287_v43  ;;  %v5241_v43 = vcombine.low %v2201_v3, %v2205_v34 }
 0x499   : > { %3360 = vmatprep.subr.bf16.mxu0 %v5280_v14  ;;  %v5234_v14 = vcombine.high %v2193_v54, %v2197_v5 }
 0x49c   : > { %3361 = vmatpush2.bf16.msra.mxu0 %v5279_v46  ;;  %v5233_v46 = vcombine.low %v2193_v54, %v2197_v5 }
 0x49d   : > { %3362 = vmatprep.subr.bf16.mxu0 %v5272_v24  ;;  %v5226_v24 = vcombine.high %v2185_v18, %v2189_v44 }
 0x4a0   : > { %3363 = vmatpush2.bf16.msra.mxu0 %v5271_v53  ;;  %v5225_v53 = vcombine.low %v2185_v18, %v2189_v44  ;;  %v2153_v18 = vld [vmem:[%s6799_s28 + $0x48] sm:$0xff] }
 0x4a1   : > { %3364 = vmatprep.subr.bf16.mxu0 %v5264_v52  ;;  %v2157_v44 = vld [vmem:[%s6799_s28 + $0x68] sm:$0xff] }
 0x4a4   : > { %3365 = vmatpush2.bf16.msra.mxu0 %v5263_v33  ;;  %v2173_v33 = vld [vmem:[%s6799_s28 + $0xe8] sm:$0xff] }
 0x4a5   : > { %3366 = vmatprep.subr.bf16.mxu0 %v5256_v2  ;;  %v5217_v2 = vcombine.low %v2177_v51, %v2181_v22  ;;  %v5210_v32 = vcombine.high %v2169_v42, %v2173_v33  ;;  %v5193_v51 = vcombine.low %v2153_v18, %v2157_v44 }
 0x4a8   : > { %3367 = vmatpush2.bf16.msra.mxu0 %v5255_v8  ;;  %v2165_v8 = vld [vmem:[%s6799_s28 + $0xa8] sm:$0xff] }
 0x4a9   : > { %3368 = vmatprep.subr.bf16.mxu0 %v5248_v58  ;;  %v5209_v58 = vcombine.low %v2169_v42, %v2173_v33  ;;  %v5202_v3 = vcombine.high %v2161_v10, %v2165_v8  ;;  %v5201_v34 = vcombine.low %v2161_v10, %v2165_v8 }
 0x4ac   : > { %3369 = vmatpush2.bf16.msra.mxu0 %v5247_v6 }
 0x4ad   : > { %3420 = vmatprep.subr.bf16.mxu0 %v5242_v7 }
 0x4af   : > { %3371 = vmatmul.mubr.bf16.vlgmr.msra.gmra.mxu0 %v6844_v40 }
 0x4b0   : > { %3421 = vmatpush1.bf16.msra.mxu0 %v5241_v43  ;;  %3452 = vmatprep.mubr.bf16.mxu0 %v6874_v63 }
 0x4b1   : > { %3422 = vmatprep.subr.bf16.mxu0 %v5234_v14 }
 0x4b4   : > { %3423 = vmatpush1.bf16.msra.mxu0 %v5233_v46 }
 0x4b5   : > { %3424 = vmatprep.subr.bf16.mxu0 %v5226_v24 }
 0x4b8   : > { %3425 = vmatpush1.bf16.msra.mxu0 %v5225_v53 }
 0x4b9   : > { %3426 = vmatprep.subr.bf16.mxu0 %v5218_v31  ;;  %v2149_v31 = vld [vmem:[%s6799_s28 + $0x28] sm:$0xff] }
 0x4bc   : > { %3427 = vmatpush1.bf16.msra.mxu0 %v5217_v2 }
 0x4bd   : > { %3428 = vmatprep.subr.bf16.mxu0 %v5210_v32  ;;  %v2269_v32 = vld [vmem:[%s6799_s28 + $0x3e8] sm:$0xff] }
 0x4c0   : > { %3429 = vmatpush1.bf16.msra.mxu0 %v5209_v58  ;;  %v2257_v58 = vld [vmem:[%s6799_s28 + $0x388] sm:$0xff] }
 0x4c1   : > { %3430 = vmatprep.subr.bf16.mxu0 %v5202_v3  ;;  %v2261_v3 = vld [vmem:[%s6799_s28 + $0x3a8] sm:$0xff] }
 0x4c4   : > { %3431 = vmatpush1.bf16.msra.mxu0 %v5201_v34  ;;  %v5297_v34 = vcombine.low %v2257_v58, %v2261_v3 }
 0x501   : > { %v1900_v52 = vpop.xlane.xlu0 %1899 }
 0x502   : > { %5768 = vrcp.f32 %v1900_v52 }
 0x50f   : > { %v7215_v6 = vpop.eup %5768 }
 0x510   : > { %v1922_v7 = vrot.slane %v7215_v6, %v7078_v27  ;;  %v1906_v54 = vrot.slane %v7215_v6, %v6911_v49  ;;  %v7225_v14 = vrot.slane %v7215_v6, %v7064_v45  ;;  %v1910_v46 = vrot.slane %v7215_v6, %v7042_v11 }
 0x511   : > { %v1914_v52 = vrot.slane %v7215_v6, %v7052_v36  ;;  %v1918_v2 = vrot.slane %v7215_v6, %v7070_v0 }
 0x512   : > { %v1951_v5 = vmul.f32 %v7122_v62, %v1922_v7  ;;  %v1943_v43 = vmul.f32 %v7081_v37, %v1906_v54  ;;  %v1957_v24 = vmul.f32 %v7111_v55, %v7225_v14  ;;  %v1944_v62 = vmul.f32 %v7083_v15, %v1906_v54  ;;  %v2145_v15 = vld [vmem:[%s6799_s28 + $0x8] sm:$0xff] }
 0x513   : > { %v5194_v37 = vcombine.high %v2153_v18, %v2157_v44  ;;  %v1945_v22 = vmul.f32 %v7089_v35, %v1910_v46  ;;  %v1946_v53 = vmul.f32 %v7093_v61, %v1910_v46  ;;  %v1947_v55 = vmul.f32 %v7100_v29, %v1914_v52  ;;  %v2265_v61 = vld [vmem:[%s6799_s28 + $0x3c8] sm:$0xff] }
 0x514   : > { %2001 = vperm.xlu0 %5631, %v1951_v5   ;;  %1961 = vperm.xlu1 %5630, %v1943_v43   ;;  %v5186_v42 = vcombine.high %v2145_v15, %v2149_v31  ;;  %v5185_v33 = vcombine.low %v2145_v15, %v2149_v31  ;;  %v1948_v35 = vmul.f32 %v7108_v4, %v1914_v52  ;;  %v2249_v5 = vld [vmem:[%s6799_s28 + $0x348] sm:$0xff] }
 0x515   : > { %3432 = vmatprep.subr.bf16.mxu0 %v5194_v37  ;;  %v5305_v10 = vcombine.low %v2265_v61, %v2269_v32  ;;  %v5306_v29 = vcombine.high %v2265_v61, %v2269_v32  ;;  %v1949_v8 = vmul.f32 %v7115_v9, %v1918_v2  ;;  %v5298_v4 = vcombine.high %v2257_v58, %v2261_v3  ;;  %v2253_v43 = vld [vmem:[%s6799_s28 + $0x368] sm:$0xff]  ;;  %v2328_v58 = vld [vmem:[%s6799_s28 + $0x5c0] sm:$0xff] }
 0x516   : > { %3433 = vmatpush1.bf16.msra.mxu0 %v5193_v51  ;;  %v1950_v54 = vmul.f32 %v7119_v17, %v1918_v2  ;;  %v5289_v18 = vcombine.low %v2249_v5, %v2253_v43  ;;  %v5290_v44 = vcombine.high %v2249_v5, %v2253_v43  ;;  %v1952_v9 = vmul.f32 %v7125_v28, %v1922_v7  ;;  %v2225_v15 = vld [vmem:[%s6799_s28 + $0x288] sm:$0xff]  ;;  %v2332_v3 = vld [vmem:[%s6799_s28 + $0x5e0] sm:$0xff] }
 0x517   : > { %3434 = vmatprep.subr.bf16.mxu0 %v5186_v42  ;;  %v1926_v46 = vrot.slane %v7215_v6, %v7047_v20  ;;  %v2229_v31 = vld [vmem:[%s6799_s28 + $0x2a8] sm:$0xff] }
 0x518   : > { %2031 = vperm.xlu0 %5631, %v1957_v24   ;;  %1966 = vperm.xlu1 %5630, %v1944_v62   ;;  %v2241_v24 = vld [vmem:[%s6799_s28 + $0x308] sm:$0xff]  ;;  %v5265_v42 = vcombine.low %v2225_v15, %v2229_v31 }
 0x519   : > { %v2245_v62 = vld [vmem:[%s6799_s28 + $0x328] sm:$0xff]  ;;  %v1953_v37 = vmul.f32 %v7096_v47, %v1926_v46  ;;  %v1954_v52 = vmul.f32 %v7128_v48, %v1926_v46  ;;  %v5266_v47 = vcombine.high %v2225_v15, %v2229_v31  ;;  %v2326_v46 = vld [vmem:[%s6799_s28 + $0x5b0] sm:$0xff]  ;;  %v2304_v15 = vld [vmem:[%s6799_s28 + $0x500] sm:$0xff] }
 0x51a   : > { %3435 = vmatpush1.bf16.msra.mxu0 %v5185_v33  ;;  %v5282_v17 = vcombine.high %v2241_v24, %v2245_v62  ;;  %v5281_v51 = vcombine.low %v2241_v24, %v2245_v62  ;;  %v2221_v48 = vld [vmem:[%s6799_s28 + $0x268] sm:$0xff]  ;;  %v2308_v31 = vld [vmem:[%s6799_s28 + $0x520] sm:$0xff] }
 0x51b   : > { %3436 = vmatprep.subr.bf16.mxu0 %v5306_v29  ;;  %v2209_v32 = vld [vmem:[%s6799_s28 + $0x208] sm:$0xff] }
 0x51c   : > { %1971 = vperm.xlu1 %5630, %v1945_v22   ;;  %v2233_v22 = vld [vmem:[%s6799_s28 + $0x2c8] sm:$0xff] }
 0x51e   : > { %3437 = vmatpush2.bf16.msra.mxu0 %v5305_v10  ;;  %v2213_v10 = vld [vmem:[%s6799_s28 + $0x228] sm:$0xff] }
 0x51f   : > { %3438 = vmatprep.subr.bf16.mxu0 %v5298_v4  ;;  %v5249_v29 = vcombine.low %v2209_v32, %v2213_v10  ;;  %v5368_v4 = vcombine.high %v2328_v58, %v2332_v3 }
 0x520   : > { %1976 = vperm.xlu1 %5630, %v1946_v53   ;;  %v2237_v53 = vld [vmem:[%s6799_s28 + $0x2e8] sm:$0xff] }
 0x521   : > { %v5273_v28 = vcombine.low %v2233_v22, %v2237_v53  ;;  %v5274_v7 = vcombine.high %v2233_v22, %v2237_v53  ;;  %3379 = vmatprep.subr.bf16.mxu1 %v5368_v4  ;;  %v2314_v53 = vld [vmem:[%s6799_s28 + $0x550] sm:$0xff] }
 0x522   : > { %3439 = vmatpush2.bf16.msra.mxu0 %v5297_v34  ;;  %v2334_v34 = vld [vmem:[%s6799_s28 + $0x5f0] sm:$0xff] }
 0x523   : > { %3440 = vmatprep.subr.bf16.mxu0 %v5290_v44 }
 0x524   : > { %1981 = vperm.xlu1 %5630, %v1947_v55   ;;  %v1930_v55 = vrot.slane %v7215_v6, %v7056_v38 }
 0x526   : > { %3441 = vmatpush2.bf16.msra.mxu0 %v5289_v18  ;;  %v1955_v33 = vmul.f32 %v7103_v1, %v1930_v55  ;;  %v1956_v61 = vmul.f32 %v7131_v56, %v1930_v55  ;;  %v5250_v1 = vcombine.high %v2209_v32, %v2213_v10  ;;  %v2330_v56 = vld [vmem:[%s6799_s28 + $0x5d0] sm:$0xff] }
 0x527   : > { %3442 = vmatprep.subr.bf16.mxu0 %v5282_v17  ;;  %v5372_v5 = vcombine.high %v2330_v56, %v2334_v34  ;;  %v5371_v43 = vcombine.low %v2330_v56, %v2334_v34  ;;  %v2322_v18 = vld [vmem:[%s6799_s28 + $0x590] sm:$0xff]  ;;  %v7902_v17 = vmov 0  }
 0x528   : > { %1986 = vperm.xlu1 %5630, %v1948_v35   ;;  %v2217_v35 = vld [vmem:[%s6799_s28 + $0x248] sm:$0xff]  ;;  %v5363_v24 = vcombine.low %v2322_v18, %v2326_v46  ;;  %v5364_v62 = vcombine.high %v2322_v18, %v2326_v46  ;;  %v2298_v32 = vld [vmem:[%s6799_s28 + $0x4d0] sm:$0xff] }
 0x529   : > { %v5258_v2 = vcombine.high %v2217_v35, %v2221_v48  ;;  %v5257_v6 = vcombine.low %v2217_v35, %v2221_v48  ;;  %v5343_v35 = vcombine.low %v2304_v15, %v2308_v31  ;;  %v2290_v34 = vld [vmem:[%s6799_s28 + $0x490] sm:$0xff]  ;;  %v7304_v46 = vld [vmem:[%s6799_s28 + $0x5c8] sm:$0xff] }
 0x52a   : > { %3443 = vmatpush2.bf16.msra.mxu0 %v5281_v51  ;;  %v2312_v51 = vld [vmem:[%s6799_s28 + $0x540] sm:$0xff]  ;;  %v2282_v18 = vld [vmem:[%s6799_s28 + $0x450] sm:$0xff] }
 0x52b   : > { %3444 = vmatprep.subr.bf16.mxu0 %v5274_v7 }
 0x52c   : > { %1991 = vperm.xlu1 %5630, %v1949_v8   ;;  %v1958_v8 = vmul.f32 %v7134_v26, %v7225_v14  ;;  %v2320_v26 = vld [vmem:[%s6799_s28 + $0x580] sm:$0xff] }
 0x52d   : > { %v2324_v14 = vld [vmem:[%s6799_s28 + $0x5a0] sm:$0xff] }
 0x52e   : > { %3445 = vmatpush2.bf16.msra.mxu0 %v5273_v28  ;;  %v5359_v44 = vcombine.low %v2320_v26, %v2324_v14  ;;  %v2318_v28 = vld [vmem:[%s6799_s28 + $0x570] sm:$0xff] }
 0x52f   : > { %3446 = vmatprep.subr.bf16.mxu0 %v5266_v47  ;;  %v5355_v55 = vcombine.low %v2314_v53, %v2318_v28  ;;  %v5344_v47 = vcombine.high %v2304_v15, %v2308_v31 }
 0x530   : > { %1996 = vperm.xlu1 %5630, %v1950_v54   ;;  %v5367_v54 = vcombine.low %v2328_v58, %v2332_v3  ;;  %v2292_v58 = vld [vmem:[%s6799_s28 + $0x4a0] sm:$0xff] }
 0x532   : > { %3447 = vmatpush2.bf16.msra.mxu0 %v5265_v42  ;;  %3380 = vmatpush1.bf16.msra.mxu1 %v5367_v54  ;;  %v2306_v42 = vld [vmem:[%s6799_s28 + $0x510] sm:$0xff] }
 0x533   : > { %3448 = vmatprep.subr.bf16.mxu0 %v5258_v2  ;;  %v2294_v54 = vld [vmem:[%s6799_s28 + $0x4b0] sm:$0xff] }
 0x534   : > { %2006 = vperm.xlu1 %5630, %v1952_v9   ;;  %v5360_v9 = vcombine.high %v2320_v26, %v2324_v14  ;;  %v2284_v26 = vld [vmem:[%s6799_s28 + $0x460] sm:$0xff] }
 0x536   : > { %3449 = vmatpush2.bf16.msra.mxu0 %v5257_v6  ;;  %3381 = vmatprep.subr.bf16.mxu1 %v5360_v9  ;;  %v2296_v6 = vld [vmem:[%s6799_s28 + $0x4c0] sm:$0xff] }
 0x537   : > { %3450 = vmatprep.subr.bf16.mxu0 %v5250_v1  ;;  %3382 = vmatpush1.bf16.msra.mxu1 %v5359_v44  ;;  %v2302_v1 = vld [vmem:[%s6799_s28 + $0x4f0] sm:$0xff] }
 0x538   : > { %2011 = vperm.xlu1 %5630, %v1953_v37   ;;  %v2316_v37 = vld [vmem:[%s6799_s28 + $0x560] sm:$0xff]  ;;  %v5339_v3 = vcombine.low %v2298_v32, %v2302_v1  ;;  %v5340_v4 = vcombine.high %v2298_v32, %v2302_v1  ;;  %v2286_v44 = vld [vmem:[%s6799_s28 + $0x470] sm:$0xff] }
 0x539   : > { %v5352_v22 = vcombine.high %v2312_v51, %v2316_v37  ;;  %v5351_v7 = vcombine.low %v2312_v51, %v2316_v37  ;;  %v2272_v51 = vld [vmem:[%s6799_s28 + $0x400] sm:$0xff]  ;;  %v5323_v15 = vcombine.low %v2282_v18, %v2286_v44 }
 0x53a   : > { %3451 = vmatpush2.bf16.msra.mxu0 %v5249_v29  ;;  %v2276_v37 = vld [vmem:[%s6799_s28 + $0x420] sm:$0xff] }
 0x53b   : > { %3543 = vmatprep.subr.bf16.mxu0 %v5372_v5  ;;  %3383 = vmatprep.subr.bf16.mxu1 %v5352_v22  ;;  %v2280_v5 = vld [vmem:[%s6799_s28 + $0x440] sm:$0xff] }
 0x53c   : > { %2016 = vperm.xlu1 %5630, %v1954_v52   ;;  %v5356_v52 = vcombine.high %v2314_v53, %v2318_v28  ;;  %3384 = vmatpush1.bf16.msra.mxu1 %v5351_v7  ;;  %v5320_v9 = vcombine.high %v2280_v5, %v2284_v26  ;;  %v5324_v53 = vcombine.high %v2282_v18, %v2286_v44  ;;  %v2274_v7 = vld [vmem:[%s6799_s28 + $0x410] sm:$0xff] }
 0x53d   : > { %3453 = vmatmul.mubr.bf16.vlgmr.msra.gmra.mxu0 %v6844_v40  ;;  %3385 = vmatprep.subr.bf16.mxu1 %v5344_v47  ;;  %v5319_v28 = vcombine.low %v2280_v5, %v2284_v26  ;;  %v5311_v47 = vcombine.low %v2272_v51, %v2276_v37  ;;  %v5875_v26 = vld [vmem:[#allocation5 + $0x10] sm:$0xff]  ;;  %v5876_v18 = vld [vmem:[#allocation5 + $0x38] sm:$0xff] }
 0x53e   : > { %3544 = vmatpush1.bf16.msra.mxu0 %v5371_v43  ;;  %3575 = vmatprep.mubr.bf16.mxu0 %v7902_v17  ;;  %v5332_v43 = vcombine.high %v2290_v34, %v2294_v54 }
 0x53f   : > { %3545 = vmatprep.subr.bf16.mxu0 %v5364_v62  ;;  %v5331_v62 = vcombine.low %v2290_v34, %v2294_v54  ;;  %v5874_v54 = vld [vmem:[#allocation5 + $0x28] sm:$0xff] }
 0x540   : > { %2021 = vperm.xlu1 %5630, %v1955_v33   ;;  %v2310_v33 = vld [vmem:[%s6799_s28 + $0x530] sm:$0xff]  ;;  %3386 = vmatpush1.bf16.msra.mxu1 %v5343_v35 }
 0x541   : > { %v5348_v48 = vcombine.high %v2306_v42, %v2310_v33  ;;  %v5347_v2 = vcombine.low %v2306_v42, %v2310_v33 }
 0x542   : > { %3546 = vmatpush1.bf16.msra.mxu0 %v5363_v24  ;;  %v7307_v24 = vld [vmem:[%s6799_s28 + $0x5e8] sm:$0xff] }
 0x543   : > { %3547 = vmatprep.subr.bf16.mxu0 %v5356_v52  ;;  %v2278_v52 = vld [vmem:[%s6799_s28 + $0x430] sm:$0xff]  ;;  %v5370_v42 = vcombine.high %v7304_v46, %v7307_v24 }
 0x544   : > { %2026 = vperm.xlu1 %5630, %v1956_v61   ;;  %v2300_v61 = vld [vmem:[%s6799_s28 + $0x4e0] sm:$0xff]  ;;  %v5316_v31 = vcombine.high %v2274_v7, %v2278_v52  ;;  %v5315_v33 = vcombine.low %v2274_v7, %v2278_v52  ;;  %v5879_v7 = vld [vmem:[#allocation5 + $0x30] sm:$0xff] }
 0x545   : > { %v5335_v10 = vcombine.low %v2296_v6, %v2300_v61  ;;  %v5336_v29 = vcombine.high %v2296_v6, %v2300_v61 }
 0x546   : > { %3548 = vmatpush1.bf16.msra.mxu0 %v5355_v55  ;;  %v5312_v55 = vcombine.high %v2272_v51, %v2276_v37  ;;  %v5878_v37 = vld [vmem:[#allocation5 + $0x20] sm:$0xff] }
 0x547   : > { %3549 = vmatprep.subr.bf16.mxu0 %v5348_v48  ;;  %3387 = vmatprep.subr.bf16.mxu1 %v5336_v29  ;;  %v7318_v48 = vld [vmem:[%s6799_s28 + $0x1d8] sm:$0xff] }
 0x548   : > { %2036 = vperm.xlu1 %5630, %v1958_v8   ;;  %v2288_v8 = vld [vmem:[%s6799_s28 + $0x480] sm:$0xff]  ;;  %3388 = vmatpush1.bf16.msra.mxu1 %v5335_v10 }
 0x549   : > { %v5328_v56 = vcombine.high %v2288_v8, %v2292_v58  ;;  %v5327_v14 = vcombine.low %v2288_v8, %v2292_v58 }
 0x54a   : > { %3550 = vmatpush1.bf16.msra.mxu0 %v5347_v2  ;;  %v7321_v2 = vld [vmem:[%s6799_s28 + $0x1f8] sm:$0xff] }
 0x54b   : > { %3551 = vmatprep.subr.bf16.mxu0 %v5340_v4  ;;  %3389 = vmatprep.subr.bf16.mxu1 %v5328_v56  ;;  %v5246_v61 = vcombine.high %v7318_v48, %v7321_v2  ;;  %v5873_v56 = vld [vmem:[#allocation5 + $0x8] sm:$0xff] }
 0x54c   : > { %3390 = vmatpush1.bf16.msra.mxu1 %v5327_v14 }
 0x54d   : > { %3391 = vmatprep.subr.bf16.mxu1 %v5320_v9 }
 0x54e   : > { %3552 = vmatpush1.bf16.msra.mxu0 %v5339_v3  ;;  %v5872_v3 = vld [vmem:[#allocation5 + $0x18] sm:$0xff] }
 0x54f   : > { %3553 = vmatprep.subr.bf16.mxu0 %v5332_v43 }
 0x550   : > { %3392 = vmatpush1.bf16.msra.mxu1 %v5319_v28 }
 0x551   : > { %3393 = vmatprep.subr.bf16.mxu1 %v5312_v55 }
 0x552   : > { %3554 = vmatpush1.bf16.msra.mxu0 %v5331_v62  ;;  %v5877_v62 = vld [vmem:[#allocation5] sm:$0xff] }
 0x553   : > { %3555 = vmatprep.subr.bf16.mxu0 %v5324_v53 }
 0x554   : > { %3394 = vmatpush1.bf16.msra.mxu1 %v5311_v47  ;;  %v5880_v47 = vld [vmem:[#allocation5 + $0x40] sm:$0xff] }
 0x555   : > { %3461 = vmatprep.subr.bf16.mxu1 %v5370_v42 }
 0x556   : > { %3556 = vmatpush1.bf16.msra.mxu0 %v5323_v15 }
 0x557   : > { %3557 = vmatprep.subr.bf16.mxu0 %v5316_v31 }
 0x55a   : > { %3558 = vmatpush1.bf16.msra.mxu0 %v5315_v33 }
 0x55b   : > { %3584 = vmatprep.subr.bf16.mxu0 %v5246_v61  ;;  %v5881_v61 = vld [vmem:[#allocation5 + $0x48] sm:$0xff] }
 0x58f   : > { %v1962_v35 = vpop.permute.xlu1 %1961  ;;  %v2002_v9 = vpop.permute.xlu0 %2001 }
 0x590   : > { %v2039_v51 = vmul.f32 %v5877_v62, %v1962_v35  ;;  %v2047_v42 = vmul.f32 %v5880_v47, %v2002_v9 }
 0x593   : > { %v1967_v32 = vpop.permute.xlu1 %1966 }
 0x594   : > { %v2040_v34 = vmul.f32 %v5873_v56, %v1967_v32 }
 0x596   : > { %v2055_v55 = vadd.f32 %v2040_v34, %v2039_v51  ;;  %v5882_v34 = vld [vmem:[#allocation5 + $0x50] sm:$0xff] }
 0x597   : > { %v1972_v10 = vpop.permute.xlu1 %1971 }
 0x598   : > { %v2041_v14 = vmul.f32 %v5875_v26, %v1972_v10 }
 0x59b   : > { %v1977_v29 = vpop.permute.xlu1 %1976 }
 0x59c   : > { %v2042_v4 = vmul.f32 %v5872_v3, %v1977_v29 }
 0x59e   : > { %v2062_v28 = vadd.f32 %v2042_v4, %v2041_v14  ;;  %v5883_v14 = vld [vmem:[#allocation5 + $0x58] sm:$0xff] }
 0x59f   : > { %v1982_v1 = vpop.permute.xlu1 %1981 }
 0x5a0   : > { %v2043_v53 = vmul.f32 %v5878_v37, %v1982_v1  ;;  %v2063_v29 = vrot.slane %v2062_v28, 4 }
 0x5a3   : > { %v1987_v8 = vpop.permute.xlu1 %1986 }
 0x5a4   : > { %v2044_v5 = vmul.f32 %v5874_v54, %v1987_v8  ;;  %v2056_v8 = vrot.slane %v2055_v55, 4 }
 0x5a6   : > { %v2069_v15 = vadd.f32 %v2044_v5, %v2043_v53  ;;  %v2057_v1 = vadd.f32 %v2056_v8, %v2055_v55 }
 0x5a7   : > { %v1992_v58 = vpop.permute.xlu1 %1991 }
 0x5a8   : > { %v2045_v52 = vmul.f32 %v5879_v7, %v1992_v58  ;;  %v2070_v3 = vrot.slane %v2069_v15, 4  ;;  %v2058_v51 = vrot.slane %v2057_v1, 2 }
 0x5aa   : > { %v2071_v4 = vadd.f32 %v2070_v3, %v2069_v15  ;;  %v5885_v3 = vld [vmem:[#allocation5 + $0x68] sm:$0xff] }
 0x5ab   : > { %v1997_v43 = vpop.permute.xlu1 %1996 }
 0x5ac   : > { %v2046_v44 = vmul.f32 %v5876_v18, %v1997_v43  ;;  %v2064_v43 = vadd.f32 %v2063_v29, %v2062_v28  ;;  %v2072_v37 = vrot.slane %v2071_v4, 2  ;;  %v2059_v28 = vadd.f32 %v2058_v51, %v2057_v1  ;;  %v5884_v29 = vld [vmem:[#allocation5 + $0x60] sm:$0xff] }
 0x5ae   : > { %v2076_v33 = vadd.f32 %v2046_v44, %v2045_v52  ;;  %v2065_v44 = vrot.slane %v2064_v43, 2  ;;  %v2073_v55 = vadd.f32 %v2072_v37, %v2071_v4  ;;  %v5887_v4 = vld [vmem:[#allocation5 + $0x78] sm:$0xff] }
 0x5af   : > { %v2007_v31 = vpop.permute.xlu1 %2006 }
 0x5b0   : > { %v2048_v32 = vmul.f32 %v5881_v61, %v2007_v31  ;;  %v2077_v54 = vrot.slane %v2076_v33, 4  ;;  %v2066_v47 = vadd.f32 %v2065_v44, %v2064_v43  ;;  %v2032_v61 = vpop.permute.xlu0 %2031  ;;  %v2060_v43 = vrot.slane %v2059_v28, 1 }
 0x5b2   : > { %v2083_v10 = vadd.f32 %v2048_v32, %v2047_v42  ;;  %v2078_v58 = vadd.f32 %v2077_v54, %v2076_v33  ;;  %v2067_v54 = vrot.slane %v2066_v47, 1 }
 0x5b3   : > { %v2012_v56 = vpop.permute.xlu1 %2011 }
 0x5b4   : > { %v2084_v35 = vrot.slane %v2083_v10, 4  ;;  %v2049_v5 = vmul.f32 %v5882_v34, %v2012_v56  ;;  %v2079_v7 = vrot.slane %v2078_v58, 2  ;;  %v5886_v34 = vld [vmem:[#allocation5 + $0x70] sm:$0xff] }
 0x5b6   : > { %v2085_v9 = vadd.f32 %v2084_v35, %v2083_v10  ;;  %v2080_v33 = vadd.f32 %v2079_v7, %v2078_v58  ;;  %v2068_v58 = vadd.f32 %v2067_v54, %v2066_v47 }
 0x5b7   : > { %v2017_v26 = vpop.permute.xlu1 %2016 }
 0x5b8   : > { %v2050_v18 = vmul.f32 %v5883_v14, %v2017_v26  ;;  %v2086_v31 = vrot.slane %v2085_v9, 2  ;;  %v2074_v14 = vrot.slane %v2073_v55, 1  ;;  %v2081_v44 = vrot.slane %v2080_v33, 1 }
 0x5ba   : > { %v2090_v62 = vadd.f32 %v2050_v18, %v2049_v5  ;;  %v2087_v56 = vadd.f32 %v2086_v31, %v2085_v9  ;;  %v2053_v5 = vmul.f32 %v5886_v34, %v2032_v61  ;;  %v2082_v9 = vadd.f32 %v2081_v44, %v2080_v33 }
 0x5bb   : > { %v2022_v53 = vpop.permute.xlu1 %2021 }
 0x5bc   : > { %v2091_v52 = vrot.slane %v2090_v62, 4  ;;  %v2051_v8 = vmul.f32 %v5884_v29, %v2022_v53  ;;  %v2088_v51 = vrot.slane %v2087_v56, 1  ;;  %v2112_v29 = vpack.c.bf16 %v2068_v58, %v2068_v58 }
 0x5bd   : > { %v2114_v6 = vpack.c.bf16 %v2082_v9, %v2082_v9  ;;  %v2195_v9 = vld [vmem:[%s6799_s28 + $0x198] sm:$0xff] }
 0x5be   : > { %v2092_v42 = vadd.f32 %v2091_v52, %v2090_v62  ;;  %v2075_v52 = vadd.f32 %v2074_v14, %v2073_v55  ;;  %v2128_v47 = vunpack.c.l.b16 %v2112_v29 }
 0x5bf   : > { %v2027_v15 = vpop.permute.xlu1 %2026  ;;  %v2130_v33 = vunpack.c.l.b16 %v2114_v6 }
 0x5c0   : > { %v2093_v32 = vrot.slane %v2092_v42, 2  ;;  %v2052_v10 = vmul.f32 %v5885_v3, %v2027_v15  ;;  %v2061_v15 = vadd.f32 %v2060_v43, %v2059_v28 }
 0x5c2   : > { %v2094_v35 = vadd.f32 %v2093_v32, %v2092_v42  ;;  %v2097_v26 = vadd.f32 %v2052_v10, %v2051_v8  ;;  %v2089_v32 = vadd.f32 %v2088_v51, %v2087_v56  ;;  %v2113_v10 = vpack.c.bf16 %v2075_v52, %v2075_v52  ;;  %v2325_v52 = vld [vmem:[%s6799_s28 + $0x5a8] sm:$0xff] }
 0x5c3   : > { %v2037_v18 = vpop.permute.xlu1 %2036  ;;  %v2111_v34 = vpack.c.bf16 %v2061_v15, %v2061_v15 }
 0x5c4   : > { %v2098_v1 = vrot.slane %v2097_v26, 4  ;;  %v2054_v62 = vmul.f32 %v5887_v4, %v2037_v18  ;;  %v2095_v37 = vrot.slane %v2094_v35, 1  ;;  %v2115_v4 = vpack.c.bf16 %v2089_v32, %v2089_v32  ;;  %v7338_v32 = vpop.f32.mrf.mxu0 }
 0x5c5   : > { %v2129_v55 = vunpack.c.l.b16 %v2113_v10  ;;  %v2127_v28 = vunpack.c.l.b16 %v2111_v34  ;;  %v2187_v34 = vld [vmem:[%s6799_s28 + $0x158] sm:$0xff] }
 0x5c6   : > { %v2099_v7 = vadd.f32 %v2098_v1, %v2097_v26  ;;  %v2104_v53 = vadd.f32 %v2054_v62, %v2053_v5  ;;  %v2096_v61 = vadd.f32 %v2095_v37, %v2094_v35  ;;  %v2131_v14 = vunpack.c.l.b16 %v2115_v4  ;;  %v7348_v4 = vpop.f32.mrf.mxu0 }
 0x5c7   : > { %v2135_v43 = vsel %vm1646_vm2, %v2128_v47, %v2127_v28  ;;  %v7903_v47 = vcombine.low %v7304_v46, %v7307_v24  ;;  %v2179_v46 = vld [vmem:[%s6799_s28 + $0x118] sm:$0xff] }
 0x5c8   : > { %v2100_v31 = vrot.slane %v2099_v7, 2  ;;  %v2105_v42 = vrot.slane %v2104_v53, 4  ;;  %v2116_v54 = vpack.c.bf16 %v2096_v61, %v2096_v61  ;;  %v2136_v62 = vsel %vm1648_vm3, %v2129_v55, %v2135_v43  ;;  %v7357_v28 = vpop.f32.mrf.mxu0  ;;  %v2183_v24 = vld [vmem:[%s6799_s28 + $0x138] sm:$0xff] }
 0x5ca   : > { %v2101_v8 = vadd.f32 %v2100_v31, %v2099_v7  ;;  %v2106_v3 = vadd.f32 %v2105_v42, %v2104_v53  ;;  %v2132_v44 = vunpack.c.l.b16 %v2116_v54  ;;  %v2321_v53 = vld [vmem:[%s6799_s28 + $0x588] sm:$0xff]  ;;  %v2199_v31 = vld [vmem:[%s6799_s28 + $0x1b8] sm:$0xff] }
 0x5cb   : > { %v5362_v61 = vcombine.high %v2321_v53, %v2325_v52  ;;  %v5238_v10 = vcombine.high %v2195_v9, %v2199_v31  ;;  %v5361_v54 = vcombine.low %v2321_v53, %v2325_v52  ;;  %v5237_v55 = vcombine.low %v2195_v9, %v2199_v31  ;;  %v2289_v53 = vld [vmem:[%s6799_s28 + $0x488] sm:$0xff]  ;;  %v2163_v9 = vld [vmem:[%s6799_s28 + $0x98] sm:$0xff] }
 0x5cc   : > { %v2102_v22 = vrot.slane %v2101_v8, 1  ;;  %v2107_v18 = vrot.slane %v2106_v3, 2  ;;  %v2293_v52 = vld [vmem:[%s6799_s28 + $0x4a8] sm:$0xff]  ;;  %v2167_v31 = vld [vmem:[%s6799_s28 + $0xb8] sm:$0xff] }
 0x5ce   : > { %v2103_v26 = vadd.f32 %v2102_v22, %v2101_v8  ;;  %v2108_v5 = vadd.f32 %v2107_v18, %v2106_v3  ;;  %v2137_v22 = vsel %vm1650_vm4, %v2130_v33, %v2136_v62  ;;  %v2313_v8 = vld [vmem:[%s6799_s28 + $0x548] sm:$0xff]  ;;  %v2191_v18 = vld [vmem:[%s6799_s28 + $0x178] sm:$0xff] }
 0x5cf   : > { %v2138_v37 = vsel %vm1652_vm5, %v2131_v14, %v2137_v22  ;;  %v2317_v3 = vld [vmem:[%s6799_s28 + $0x568] sm:$0xff]  ;;  %v3376_v14 = vpop.f32.mrf.mxu0  ;;  %v2171_v22 = vld [vmem:[%s6799_s28 + $0xd8] sm:$0xff] }
 0x5d0   : > { %v2117_v56 = vpack.c.bf16 %v2103_v26, %v2103_v26  ;;  %v2109_v35 = vrot.slane %v2108_v5, 1  ;;  %v2139_v7 = vsel %vm1654_vm6, %v2132_v44, %v2138_v37  ;;  %v5354_v26 = vcombine.high %v2313_v8, %v2317_v3  ;;  %v2305_v33 = vld [vmem:[%s6799_s28 + $0x508] sm:$0xff] }
 0x5d1   : > { %v5353_v43 = vcombine.low %v2313_v8, %v2317_v3  ;;  %v3377_v44 = vpop.f32.mrf.mxu0  ;;  %v2301_v62 = vld [vmem:[%s6799_s28 + $0x4e8] sm:$0xff] }
 0x5d2   : > { %v2110_v1 = vadd.f32 %v2109_v35, %v2108_v5  ;;  %v2133_v51 = vunpack.c.l.b16 %v2117_v56  ;;  %v7904_v5 = vcombine.low %v7318_v48, %v7321_v2  ;;  %v2309_v56 = vld [vmem:[%s6799_s28 + $0x528] sm:$0xff]  ;;  %v5230_v35 = vcombine.high %v2187_v34, %v2191_v18 }
 0x5d3   : > { %v5346_v48 = vcombine.high %v2305_v33, %v2309_v56  ;;  %v5229_v2 = vcombine.low %v2187_v34, %v2191_v18  ;;  %v5345_v37 = vcombine.low %v2305_v33, %v2309_v56  ;;  %v2281_v3 = vld [vmem:[%s6799_s28 + $0x448] sm:$0xff]  ;;  %v5206_v34 = vcombine.high %v2163_v9, %v2167_v31  ;;  %v2155_v18 = vld [vmem:[%s6799_s28 + $0x58] sm:$0xff] }
 0x5d4   : > { %v2118_v58 = vpack.c.bf16 %v2110_v1, %v2110_v1  ;;  %v2140_v15 = vsel %vm1656_vm7, %v2133_v51, %v2139_v7  ;;  %v2297_v1 = vld [vmem:[%s6799_s28 + $0x4c8] sm:$0xff]  ;;  %v5222_v51 = vcombine.high %v2179_v46, %v2183_v24  ;;  %v5221_v7 = vcombine.low %v2179_v46, %v2183_v24  ;;  %v2151_v46 = vld [vmem:[%s6799_s28 + $0x38] sm:$0xff] }
 0x5d5   : > { %v2277_v33 = vld [vmem:[%s6799_s28 + $0x428] sm:$0xff] }
 0x5d6   : > { %v2134_v6 = vunpack.c.l.b16 %v2118_v58  ;;  %v2175_v58 = vld [vmem:[%s6799_s28 + $0xf8] sm:$0xff] }
 0x5d7   : > { %v5213_v8 = vcombine.low %v2171_v22, %v2175_v58 }
 0x5d8   : > { %v2141_v42 = vsel %vm1658_vm8, %v2134_v6, %v2140_v15  ;;  %v5338_v6 = vcombine.high %v2297_v1, %v2301_v62  ;;  %v5214_v15 = vcombine.high %v2171_v22, %v2175_v58 }
 0x5d9   : > { %v7340_v29 = vpack.c.b16 %v2141_v42, %v2141_v42  ;;  %v5337_v42 = vcombine.low %v2297_v1, %v2301_v62  ;;  %v2267_v1 = vld [vmem:[%s6799_s28 + $0x3d8] sm:$0xff] }
 0x5da   : > { %v2271_v62 = vld [vmem:[%s6799_s28 + $0x3f8] sm:$0xff] }
 0x5db   : > { %3412 = vmatmul.mubr.bf16.vlgmr.msra.gmra.mxu1 %v7340_v29  ;;  %3576 = vmatmul.mubr.bf16.vlgmr.msra.gmra.mxu0 %v7340_v29 }
 0x5dc   : > { %3462 = vmatpush1.bf16.msra.mxu1 %v7903_v47  ;;  %3493 = vmatprep.mubr.bf16.mxu1 %v7902_v17  ;;  %v2159_v47 = vld [vmem:[%s6799_s28 + $0x78] sm:$0xff] }
 0x5dd   : > { %3463 = vmatprep.subr.bf16.mxu1 %v5362_v61  ;;  %3585 = vmatpush1.bf16.msra.mxu0 %v7904_v5  ;;  %v5330_v61 = vcombine.high %v2289_v53, %v2293_v52  ;;  %v5205_v5 = vcombine.low %v2163_v9, %v2167_v31  ;;  %v5198_v56 = vcombine.high %v2155_v18, %v2159_v47 }
 0x5de   : > { %3586 = vmatprep.subr.bf16.mxu0 %v5238_v10  ;;  %3616 = vmatprep.mubr.bf16.mxu0 %v6874_v63  ;;  %v2285_v10 = vld [vmem:[%s6799_s28 + $0x468] sm:$0xff]  ;;  %v5309_v31 = vcombine.low %v2267_v1, %v2271_v62 }
 0x5df   : > { %v5321_v24 = vcombine.low %v2281_v3, %v2285_v10 }
 0x5e0   : > { %3464 = vmatpush1.bf16.msra.mxu1 %v5361_v54  ;;  %v5329_v54 = vcombine.low %v2289_v53, %v2293_v52  ;;  %v2259_v53 = vld [vmem:[%s6799_s28 + $0x398] sm:$0xff] }
 0x5e1   : > { %3465 = vmatprep.subr.bf16.mxu1 %v5354_v26  ;;  %3587 = vmatpush1.bf16.msra.mxu0 %v5237_v55  ;;  %v5322_v26 = vcombine.high %v2281_v3, %v2285_v10  ;;  %v2273_v55 = vld [vmem:[%s6799_s28 + $0x408] sm:$0xff]  ;;  %v2263_v52 = vld [vmem:[%s6799_s28 + $0x3b8] sm:$0xff] }
 0x5e2   : > { %3588 = vmatprep.subr.bf16.mxu0 %v5230_v35  ;;  %v2147_v35 = vld [vmem:[%s6799_s28 + $0x18] sm:$0xff]  ;;  %v5314_v14 = vcombine.high %v2273_v55, %v2277_v33 }
 0x5e3   : > { %v5190_v44 = vcombine.high %v2147_v35, %v2151_v46  ;;  %v5189_v58 = vcombine.low %v2147_v35, %v2151_v46  ;;  %v2251_v3 = vld [vmem:[%s6799_s28 + $0x358] sm:$0xff]  ;;  %v2170_v46 = vld [vmem:[%s6799_s28 + $0xd0] sm:$0xff] }
 0x5e4   : > { %3466 = vmatpush1.bf16.msra.mxu1 %v5353_v43  ;;  %v5197_v43 = vcombine.low %v2155_v18, %v2159_v47  ;;  %v2255_v10 = vld [vmem:[%s6799_s28 + $0x378] sm:$0xff]  ;;  %v5301_v47 = vcombine.low %v2259_v53, %v2263_v52 }
 0x5e5   : > { %3467 = vmatprep.subr.bf16.mxu1 %v5346_v48  ;;  %3589 = vmatpush1.bf16.msra.mxu0 %v5229_v2  ;;  %v2202_v48 = vld [vmem:[%s6799_s28 + $0x1d0] sm:$0xff] }
 0x5e6   : > { %3590 = vmatprep.subr.bf16.mxu0 %v5222_v51  ;;  %v2206_v2 = vld [vmem:[%s6799_s28 + $0x1f0] sm:$0xff]  ;;  %v5313_v51 = vcombine.low %v2273_v55, %v2277_v33  ;;  %v2243_v55 = vld [vmem:[%s6799_s28 + $0x318] sm:$0xff] }
 0x5e7   : > { %v5244_v22 = vcombine.high %v2202_v48, %v2206_v2  ;;  %v2247_v33 = vld [vmem:[%s6799_s28 + $0x338] sm:$0xff] }
 0x5e8   : > { %3468 = vmatpush1.bf16.msra.mxu1 %v5345_v37  ;;  %v2194_v37 = vld [vmem:[%s6799_s28 + $0x190] sm:$0xff] }
 0x5e9   : > { %3469 = vmatprep.subr.bf16.mxu1 %v5338_v6  ;;  %3591 = vmatpush1.bf16.msra.mxu0 %v5221_v7  ;;  %v2198_v6 = vld [vmem:[%s6799_s28 + $0x1b0] sm:$0xff]  ;;  %v5310_v7 = vcombine.high %v2267_v1, %v2271_v62  ;;  %v5285_v1 = vcombine.low %v2243_v55, %v2247_v33 }
 0x5ea   : > { %3592 = vmatprep.subr.bf16.mxu0 %v5214_v15  ;;  %v5243_v15 = vcombine.low %v2202_v48, %v2206_v2  ;;  %v5236_v9 = vcombine.high %v2194_v37, %v2198_v6  ;;  %v2239_v48 = vld [vmem:[%s6799_s28 + $0x2f8] sm:$0xff]  ;;  %v2162_v62 = vld [vmem:[%s6799_s28 + $0x90] sm:$0xff] }
 0x5ec   : > { %3470 = vmatpush1.bf16.msra.mxu1 %v5337_v42  ;;  %v2186_v42 = vld [vmem:[%s6799_s28 + $0x150] sm:$0xff] }
 0x5ed   : > { %3471 = vmatprep.subr.bf16.mxu1 %v5330_v61  ;;  %3593 = vmatpush1.bf16.msra.mxu0 %v5213_v8  ;;  %v2190_v61 = vld [vmem:[%s6799_s28 + $0x170] sm:$0xff]  ;;  %v5302_v8 = vcombine.high %v2259_v53, %v2263_v52 }
 0x5ee   : > { %3594 = vmatprep.subr.bf16.mxu0 %v5206_v34  ;;  %v5235_v34 = vcombine.low %v2194_v37, %v2198_v6  ;;  %v5228_v18 = vcombine.high %v2186_v42, %v2190_v61  ;;  %v2231_v37 = vld [vmem:[%s6799_s28 + $0x2b8] sm:$0xff]  ;;  %v2154_v52 = vld [vmem:[%s6799_s28 + $0x50] sm:$0xff] }
 0x5f0   : > { %3472 = vmatpush1.bf16.msra.mxu1 %v5329_v54  ;;  %v2178_v54 = vld [vmem:[%s6799_s28 + $0x110] sm:$0xff] }
 0x5f1   : > { %3473 = vmatprep.subr.bf16.mxu1 %v5322_v26  ;;  %3595 = vmatpush1.bf16.msra.mxu0 %v5205_v5  ;;  %v2182_v26 = vld [vmem:[%s6799_s28 + $0x130] sm:$0xff]  ;;  %v5294_v5 = vcombine.high %v2251_v3, %v2255_v10 }
 0x5f2   : > { %3596 = vmatprep.subr.bf16.mxu0 %v5198_v56  ;;  %v5227_v56 = vcombine.low %v2186_v42, %v2190_v61  ;;  %v5220_v35 = vcombine.high %v2178_v54, %v2182_v26  ;;  %v5219_v2 = vcombine.low %v2178_v54, %v2182_v26  ;;  %v2223_v42 = vld [vmem:[%s6799_s28 + $0x278] sm:$0xff] }
 0x5f3   : > { %v2211_v26 = vld [vmem:[%s6799_s28 + $0x218] sm:$0xff] }
 0x5f4   : > { %3474 = vmatpush1.bf16.msra.mxu1 %v5321_v24  ;;  %v2174_v24 = vld [vmem:[%s6799_s28 + $0xf0] sm:$0xff] }
 0x5f5   : > { %3475 = vmatprep.subr.bf16.mxu1 %v5314_v14  ;;  %3597 = vmatpush1.bf16.msra.mxu0 %v5197_v43  ;;  %v5286_v14 = vcombine.high %v2243_v55, %v2247_v33  ;;  %v2235_v43 = vld [vmem:[%s6799_s28 + $0x2d8] sm:$0xff]  ;;  %v5211_v6 = vcombine.low %v2170_v46, %v2174_v24 }
 0x5f6   : > { %3598 = vmatprep.subr.bf16.mxu0 %v5190_v44  ;;  %v5212_v44 = vcombine.high %v2170_v46, %v2174_v24  ;;  %v5277_v53 = vcombine.low %v2235_v43, %v2239_v48  ;;  %v2266_v46 = vld [vmem:[%s6799_s28 + $0x3d0] sm:$0xff] }
 0x5f7   : > { %v2270_v24 = vld [vmem:[%s6799_s28 + $0x3f0] sm:$0xff] }
 0x5f8   : > { %3476 = vmatpush1.bf16.msra.mxu1 %v5313_v51  ;;  %v2166_v51 = vld [vmem:[%s6799_s28 + $0xb0] sm:$0xff] }
 0x5f9   : > { %3502 = vmatprep.subr.bf16.mxu1 %v5244_v22  ;;  %3599 = vmatpush1.bf16.msra.mxu0 %v5189_v58  ;;  %v5278_v22 = vcombine.high %v2235_v43, %v2239_v48  ;;  %v2227_v58 = vld [vmem:[%s6799_s28 + $0x298] sm:$0xff]  ;;  %v5308_v48 = vcombine.high %v2266_v46, %v2270_v24 }
 0x5fa   : > { %3600 = vmatprep.subr.bf16.mxu0 %v5310_v7  ;;  %v5204_v7 = vcombine.high %v2162_v62, %v2166_v51 }
 0x5fb   : > { %3494 = vmatmul.mubr.bf16.vlgmr.msra.gmra.mxu1 %v7340_v29 }
 0x5fc   : > { %3503 = vmatpush1.bf16.msra.mxu1 %v5243_v15  ;;  %3534 = vmatprep.mubr.bf16.mxu1 %v6874_v63  ;;  %v5293_v63 = vcombine.low %v2251_v3, %v2255_v10  ;;  %v2158_v15 = vld [vmem:[%s6799_s28 + $0x70] sm:$0xff]  ;;  %v5269_v10 = vcombine.low %v2227_v58, %v2231_v37 }
 0x5fd   : > { %3504 = vmatprep.subr.bf16.mxu1 %v5236_v9  ;;  %3601 = vmatpush2.bf16.msra.mxu0 %v5309_v31  ;;  %v5270_v9 = vcombine.high %v2227_v58, %v2231_v37  ;;  %v2219_v31 = vld [vmem:[%s6799_s28 + $0x258] sm:$0xff]  ;;  %v7410_v61 = vpop.f32.mrf.mxu0  ;;  %v5196_v3 = vcombine.high %v2154_v52, %v2158_v15  ;;  %v5195_v33 = vcombine.low %v2154_v52, %v2158_v15  ;;  %v2254_v58 = vld [vmem:[%s6799_s28 + $0x370] sm:$0xff]  ;;  %v7905_v37 = vmov 0.0  }
 0x5fe   : > { %3602 = vmatprep.subr.bf16.mxu0 %v5302_v8  ;;  %v5203_v8 = vcombine.low %v2162_v62, %v2166_v51  ;;  %v5262_v54 = vcombine.high %v2219_v31, %v2223_v42  ;;  %v5307_v62 = vcombine.low %v2266_v46, %v2270_v24  ;;  %v2246_v52 = vld [vmem:[%s6799_s28 + $0x330] sm:$0xff]  ;;  %v2331_v24 = vld [vmem:[%s6799_s28 + $0x5d8] sm:$0xff] }
 0x600   : > { %3505 = vmatpush1.bf16.msra.mxu1 %v5235_v34  ;;  %v7412_v34 = vpop.f32.mrf.mxu0 }
 0x601   : > { %3506 = vmatprep.subr.bf16.mxu1 %v5228_v18  ;;  %3603 = vmatpush2.bf16.msra.mxu0 %v5301_v47  ;;  %v2146_v18 = vld [vmem:[%s6799_s28 + $0x10] sm:$0xff] }
 0x602   : > { %3604 = vmatprep.subr.bf16.mxu0 %v5294_v5  ;;  %v2150_v47 = vld [vmem:[%s6799_s28 + $0x30] sm:$0xff]  ;;  %v2215_v5 = vld [vmem:[%s6799_s28 + $0x238] sm:$0xff]  ;;  %v3458_v55 = vpop.f32.mrf.mxu0 }
 0x603   : > { %v5187_v43 = vcombine.low %v2146_v18, %v2150_v47 }
 0x604   : > { %3507 = vmatpush1.bf16.msra.mxu1 %v5227_v56  ;;  %v5188_v56 = vcombine.high %v2146_v18, %v2150_v47  ;;  %v2230_v18 = vld [vmem:[%s6799_s28 + $0x2b0] sm:$0xff] }
 0x605   : > { %3508 = vmatprep.subr.bf16.mxu1 %v5220_v35  ;;  %3605 = vmatpush2.bf16.msra.mxu0 %v5293_v63  ;;  %v5261_v35 = vcombine.low %v2219_v31, %v2223_v42  ;;  %v3459_v63 = vpop.f32.mrf.mxu0  ;;  %v2234_v31 = vld [vmem:[%s6799_s28 + $0x2d0] sm:$0xff] }
 0x606   : > { %3606 = vmatprep.subr.bf16.mxu0 %v5286_v14  ;;  %v5254_v14 = vcombine.high %v2211_v26, %v2215_v5  ;;  %v2238_v42 = vld [vmem:[%s6799_s28 + $0x2f0] sm:$0xff] }
 0x607   : > { %v5275_v47 = vcombine.low %v2234_v31, %v2238_v42 }
 0x608   : > { %3509 = vmatpush1.bf16.msra.mxu1 %v5219_v2  ;;  %v5253_v2 = vcombine.low %v2211_v26, %v2215_v5  ;;  %v2218_v26 = vld [vmem:[%s6799_s28 + $0x250] sm:$0xff] }
 0x609   : > { %3510 = vmatprep.subr.bf16.mxu1 %v5212_v44  ;;  %3607 = vmatpush2.bf16.msra.mxu0 %v5285_v1  ;;  %v2258_v44 = vld [vmem:[%s6799_s28 + $0x390] sm:$0xff] }
 0x60a   : > { %3608 = vmatprep.subr.bf16.mxu0 %v5278_v22  ;;  %v2262_v1 = vld [vmem:[%s6799_s28 + $0x3b0] sm:$0xff] }
 0x60b   : > { %v5300_v51 = vcombine.high %v2258_v44, %v2262_v1  ;;  %v2250_v22 = vld [vmem:[%s6799_s28 + $0x350] sm:$0xff] }
 0x60c   : > { %3511 = vmatpush1.bf16.msra.mxu1 %v5211_v6  ;;  %v5299_v6 = vcombine.low %v2258_v44, %v2262_v1  ;;  %v5291_v15 = vcombine.low %v2250_v22, %v2254_v58  ;;  %v2222_v5 = vld [vmem:[%s6799_s28 + $0x270] sm:$0xff]  ;;  %v2327_v44 = vld [vmem:[%s6799_s28 + $0x5b8] sm:$0xff] }
 0x60d   : > { %3512 = vmatprep.subr.bf16.mxu1 %v5204_v7  ;;  %3609 = vmatpush2.bf16.msra.mxu0 %v5277_v53  ;;  %v5292_v7 = vcombine.high %v2250_v22, %v2254_v58  ;;  %v2242_v53 = vld [vmem:[%s6799_s28 + $0x310] sm:$0xff]  ;;  %v5259_v63 = vcombine.low %v2218_v26, %v2222_v5  ;;  %v2319_v22 = vld [vmem:[%s6799_s28 + $0x578] sm:$0xff] }
 0x60e   : > { %3610 = vmatprep.subr.bf16.mxu0 %v5270_v9  ;;  %v5284_v9 = vcombine.high %v2242_v53, %v2246_v52 }
 0x610   : > { %3513 = vmatpush1.bf16.msra.mxu1 %v5203_v8  ;;  %v5283_v8 = vcombine.low %v2242_v53, %v2246_v52  ;;  %v2311_v53 = vld [vmem:[%s6799_s28 + $0x538] sm:$0xff] }
 0x611   : > { %3514 = vmatprep.subr.bf16.mxu1 %v5196_v3  ;;  %3611 = vmatpush2.bf16.msra.mxu0 %v5269_v10  ;;  %v5276_v3 = vcombine.high %v2234_v31, %v2238_v42  ;;  %v2226_v10 = vld [vmem:[%s6799_s28 + $0x290] sm:$0xff]  ;;  %v2303_v31 = vld [vmem:[%s6799_s28 + $0x4f8] sm:$0xff] }
 0x612   : > { %3612 = vmatprep.subr.bf16.mxu0 %v5262_v54  ;;  %v5268_v54 = vcombine.high %v2226_v10, %v2230_v18  ;;  %v5267_v55 = vcombine.low %v2226_v10, %v2230_v18  ;;  %v2283_v18 = vld [vmem:[%s6799_s28 + $0x458] sm:$0xff] }
 0x614   : > { %3515 = vmatpush1.bf16.msra.mxu1 %v5195_v33  ;;  %v5260_v33 = vcombine.high %v2218_v26, %v2222_v5  ;;  %v2275_v5 = vld [vmem:[%s6799_s28 + $0x418] sm:$0xff] }
 0x615   : > { %3516 = vmatprep.subr.bf16.mxu1 %v5188_v56  ;;  %3613 = vmatpush2.bf16.msra.mxu0 %v5261_v35  ;;  %v2210_v56 = vld [vmem:[%s6799_s28 + $0x210] sm:$0xff] }
 0x616   : > { %3614 = vmatprep.subr.bf16.mxu0 %v5254_v14  ;;  %v2214_v35 = vld [vmem:[%s6799_s28 + $0x230] sm:$0xff]  ;;  %v2335_v14 = vld [vmem:[%s6799_s28 + $0x5f8] sm:$0xff] }
 0x617   : > { %v5252_v46 = vcombine.high %v2210_v56, %v2214_v35  ;;  %v5373_v1 = vcombine.low %v2331_v24, %v2335_v14 }
 0x618   : > { %3517 = vmatpush1.bf16.msra.mxu1 %v5187_v43  ;;  %v5251_v43 = vcombine.low %v2210_v56, %v2214_v35 }
 0x619   : > { %3518 = vmatprep.subr.bf16.mxu1 %v5308_v48  ;;  %3615 = vmatpush2.bf16.msra.mxu0 %v5253_v2  ;;  %v5374_v48 = vcombine.high %v2331_v24, %v2335_v14  ;;  %v2323_v2 = vld [vmem:[%s6799_s28 + $0x598] sm:$0xff] }
 0x61a   : > { %5494 = vmatprep.subr.bf16.mxu0 %v7905_v37  ;;  %v5365_v58 = vcombine.low %v2323_v2, %v2327_v44 }
 0x61c   : > { %3519 = vmatpush2.bf16.msra.mxu1 %v5307_v62  ;;  %3617 = vmatmul.mubr.bf16.vlgmr.msra.gmra.mxu0 %v6844_v40  ;;  %v5366_v62 = vcombine.high %v2323_v2, %v2327_v44 }
 0x61d   : > { %3520 = vmatprep.subr.bf16.mxu1 %v5300_v51  ;;  %5510 = vmatprep.mubr.msk.bf16.mxu0 %vm6274_vm0, %v7905_v37  ;;  %v2315_v51 = vld [vmem:[%s6799_s28 + $0x558] sm:$0xff] }
 0x61e   : > { %v5357_v52 = vcombine.low %v2315_v51, %v2319_v22 }
 0x620   : > { %3521 = vmatpush2.bf16.msra.mxu1 %v5299_v6  ;;  %v5358_v6 = vcombine.high %v2315_v51, %v2319_v22 }
 0x621   : > { %3522 = vmatprep.subr.bf16.mxu1 %v5292_v7  ;;  %v2307_v7 = vld [vmem:[%s6799_s28 + $0x518] sm:$0xff] }
 0x624   : > { %3523 = vmatpush2.bf16.msra.mxu1 %v5291_v15  ;;  %v5350_v15 = vcombine.high %v2307_v7, %v2311_v53 }
 0x625   : > { %3524 = vmatprep.subr.bf16.mxu1 %v5284_v9  ;;  %v2299_v9 = vld [vmem:[%s6799_s28 + $0x4d8] sm:$0xff] }
 0x626   : > { %v5342_v42 = vcombine.high %v2299_v9, %v2303_v31 }
 0x628   : > { %3525 = vmatpush2.bf16.msra.mxu1 %v5283_v8  ;;  %v2295_v8 = vld [vmem:[%s6799_s28 + $0x4b8] sm:$0xff] }
 0x629   : > { %3526 = vmatprep.subr.bf16.mxu1 %v5276_v3  ;;  %v5341_v3 = vcombine.low %v2299_v9, %v2303_v31 }
 0x62c   : > { %3527 = vmatpush2.bf16.msra.mxu1 %v5275_v47  ;;  %v2287_v47 = vld [vmem:[%s6799_s28 + $0x478] sm:$0xff] }
 0x62d   : > { %3528 = vmatprep.subr.bf16.mxu1 %v5268_v54  ;;  %v5326_v26 = vcombine.high %v2283_v18, %v2287_v47 }
 0x630   : > { %3529 = vmatpush2.bf16.msra.mxu1 %v5267_v55  ;;  %v2279_v55 = vld [vmem:[%s6799_s28 + $0x438] sm:$0xff] }
 0x631   : > { %3530 = vmatprep.subr.bf16.mxu1 %v5260_v33  ;;  %v5325_v33 = vcombine.low %v2283_v18, %v2287_v47  ;;  %v5318_v56 = vcombine.high %v2275_v5, %v2279_v55  ;;  %v5317_v35 = vcombine.low %v2275_v5, %v2279_v55  ;;  %v5694_v18 = vld [vmem:[%s6793_s10 + $0x48] sm:$0xff]   ;;  %v5695_v47 = vld [vmem:[%s6793_s10 + $0x40] sm:$0xff]  }
 0x634   : > { %3531 = vmatpush2.bf16.msra.mxu1 %v5259_v63  ;;  %v7461_v63 = vld [vmem:[%s6801_s2] sm:$0xff] }
 0x635   : > { %3532 = vmatprep.subr.bf16.mxu1 %v5252_v46  ;;  %v2341_v46 = vrot.slane %v7461_v63, %v6911_v49  ;;  %v2345_v24 = vrot.slane %v7461_v63, %v7042_v11 }
 0x637   : > { %v3373_v14 = vadd.f32 %v7348_v4, %v2341_v46  ;;  %v5688_v4 = vld [vmem:[%s6793_s10 + $0x78] sm:$0xff]  }
 0x638   : > { %3533 = vmatpush2.bf16.msra.mxu1 %v5251_v43 }
 0x639   : > { %3625 = vmatprep.subr.bf16.mxu1 %v5374_v48 }
 0x63b   : > { %3535 = vmatmul.mubr.bf16.vlgmr.msra.gmra.mxu1 %v6844_v40  ;;  %v5349_v40 = vcombine.low %v2307_v7, %v2311_v53  ;;  %v2349_v7 = vrot.slane %v7461_v63, %v7052_v36  ;;  %v2353_v53 = vrot.slane %v7461_v63, %v7070_v0 }
 0x63c   : > { %3626 = vmatpush1.bf16.msra.mxu1 %v5373_v1  ;;  %3657 = vmatprep.mubr.bf16.mxu1 %v7902_v17  ;;  %v2291_v17 = vld [vmem:[%s6799_s28 + $0x498] sm:$0xff] }
 0x63d   : > { %3627 = vmatprep.subr.bf16.mxu1 %v5366_v62  ;;  %v5334_v10 = vcombine.high %v2291_v17, %v2295_v8  ;;  %v5333_v54 = vcombine.low %v2291_v17, %v2295_v8 }
 0x640   : > { %3628 = vmatpush1.bf16.msra.mxu1 %v5365_v58 }
 0x641   : > { %3629 = vmatprep.subr.bf16.mxu1 %v5358_v6 }
 0x644   : > { %3630 = vmatpush1.bf16.msra.mxu1 %v5357_v52  ;;  %v5689_v52 = vld [vmem:[%s6793_s10 + $0x70] sm:$0xff]  }
 0x645   : > { %3631 = vmatprep.subr.bf16.mxu1 %v5350_v15  ;;  %v3457_v15 = vadd.f32 %v7412_v34, %v2353_v53  ;;  %v5692_v34 = vld [vmem:[%s6793_s10 + $0x58] sm:$0xff]  }
 0x648   : > { %3632 = vmatpush1.bf16.msra.mxu1 %v5349_v40 }
 0x649   : > { %3633 = vmatprep.subr.bf16.mxu1 %v5342_v42  ;;  %v5690_v42 = vld [vmem:[%s6793_s10 + $0x68] sm:$0xff]  }
 0x64c   : > { %3634 = vmatpush1.bf16.msra.mxu1 %v5341_v3  ;;  %v5691_v3 = vld [vmem:[%s6793_s10 + $0x60] sm:$0xff]  }
 0x64d   : > { %3635 = vmatprep.subr.bf16.mxu1 %v5334_v10  ;;  %v5693_v10 = vld [vmem:[%s6793_s10 + $0x50] sm:$0xff]  }
 0x650   : > { %3636 = vmatpush1.bf16.msra.mxu1 %v5333_v54 }
 0x651   : > { %3637 = vmatprep.subr.bf16.mxu1 %v5326_v26 }
 0x654   : > { %3638 = vmatpush1.bf16.msra.mxu1 %v5325_v33 }
 0x655   : > { %3639 = vmatprep.subr.bf16.mxu1 %v5318_v56 }
 0x658   : > { %3640 = vmatpush1.bf16.msra.mxu1 %v5317_v35 }
 0x659   : > { %5474 = vmatprep.subr.bf16.mxu1 %v7905_v37 }
 0x65b   : > { %3658 = vmatmul.mubr.bf16.vlgmr.msra.gmra.mxu1 %v7340_v29  ;;  %v3375_v29 = vadd.f32 %v7357_v28, %v2345_v24  ;;  %v3455_v28 = vadd.f32 %v7410_v61, %v2349_v7 }
 0x65c   : > { %5490 = vmatprep.mubr.msk.bf16.mxu1 %vm6274_vm0, %v7905_v37  ;;  %5475 = vmatpush3.bf16.msra.mxu1 %v5688_v4  ;;  %v2365_v4 = vrot.slane %v7461_v63, %v7056_v38 }
 0x65d   : > { %5476 = vmatprep.subr.bf16.mxu1 %v7905_v37 }
 0x660   : > { %5477 = vmatpush3.bf16.msra.mxu1 %v5689_v52 }
 0x661   : > { %5478 = vmatprep.subr.bf16.mxu1 %v7905_v37 }
 0x664   : > { %5479 = vmatpush3.bf16.msra.mxu1 %v5690_v42  ;;  %v2369_v42 = vrot.slane %v7461_v63, %v7064_v45 }
 0x665   : > { %5480 = vmatprep.subr.bf16.mxu1 %v7905_v37 }
 0x668   : > { %5481 = vmatpush3.bf16.msra.mxu1 %v5691_v3 }
 0x669   : > { %5482 = vmatprep.subr.bf16.mxu1 %v7905_v37 }
 0x66c   : > { %5483 = vmatpush3.bf16.msra.mxu1 %v5692_v34 }
 0x66d   : > { %5484 = vmatprep.subr.bf16.mxu1 %v7905_v37 }
 0x670   : > { %5485 = vmatpush3.bf16.msra.mxu1 %v5693_v10 }
 0x671   : > { %5486 = vmatprep.subr.bf16.mxu1 %v7905_v37 }
 0x674   : > { %5487 = vmatpush3.bf16.msra.mxu1 %v5694_v18 }
 0x675   : > { %5488 = vmatprep.subr.bf16.mxu1 %v7905_v37 }
 0x678   : > { %5489 = vmatpush3.bf16.msra.mxu1 %v5695_v47 }
 0x69b   : > { %v3413_v43 = vpop.f32.mrf.mxu1  ;;  %v7468_v48 = vpop.f32.mrf.mxu0 }
 0x69c   : > { %v3414_v2 = vadd.f32 %v3413_v43, %v3373_v14 }
 0x69d   : > { %v3415_v44 = vpop.f32.mrf.mxu1  ;;  %v7471_v1 = vpop.f32.mrf.mxu0 }
 0x69e   : > { %v3416_v62 = vadd.f32 %v3415_v44, %v3375_v29  ;;  %v5375_v46 = vmul.f32 -1.442695, %v3414_v2  ;;  %v2357_v44 = vrot.slane %v7461_v63, %v7078_v27 }
 0x69f   : > { %v3417_v51 = vpop.f32.mrf.mxu1  ;;  %v3581_v22 = vpop.f32.mrf.mxu0 }
 0x6a0   : > { %5770 = vpow2.f32 %v5375_v46  ;;  %v5376_v29 = vmul.f32 -1.442695, %v3416_v62  ;;  %v2361_v51 = vrot.slane %v7461_v63, %v7047_v20 }
 0x6a1   : > { %v3418_v58 = vpop.f32.mrf.mxu1  ;;  %v3582_v6 = vpop.f32.mrf.mxu0 }
 0x6ad   : > { %v5771_v6 = vpop.eup %5770 }
 0x6bb   : > { %v3495_v9 = vpop.f32.mrf.mxu1 }
 0x6bc   : > { %v3496_v31 = vadd.f32 %v3495_v9, %v3455_v28  ;;  %v3684_v28 = vadd.f32 1.0, %v5771_v6 }
 0x6bd   : > { %v3497_v40 = vpop.f32.mrf.mxu1 }
 0x6be   : > { %v3498_v17 = vadd.f32 %v3497_v40, %v3457_v15  ;;  %v5377_v14 = vmul.f32 -1.442695, %v3496_v31 }
 0x6bf   : > { %v3499_v8 = vpop.f32.mrf.mxu1 }
 0x6c0   : > { %v5378_v43 = vmul.f32 -1.442695, %v3498_v17  ;;  %5772 = vpow2.f32 %v5377_v14 }
 0x6c1   : > { %v3500_v61 = vpop.f32.mrf.mxu1 }
 0x6c2   : > { %5774 = vpow2.f32 %v5378_v43 }
 0x6c3   : > { %5776 = vpow2.f32 %v5376_v29 }
 0x6c4   : > { %5778 = vrcp.f32 %v3684_v28 }
 0x6cd   : > { %v5773_v7 = vpop.eup %5772 }
 0x6ce   : > { %v3686_v52 = vadd.f32 1.0, %v5773_v7 }
 0x6cf   : > { %v5775_v53 = vpop.eup %5774 }
 0x6d0   : > { %v5777_v9 = vpop.eup %5776  ;;  %v3687_v31 = vadd.f32 1.0, %v5775_v53  ;;  %5780 = vrcp.f32 %v3686_v52 }
 0x6d1   : > { %v3685_v8 = vadd.f32 1.0, %v5777_v9  ;;  %v5779_v47 = vpop.eup %5778 }
 0x6dc   : > { %v3618_v54 = vpop.f32.mrf.mxu0 }
 0x6dd   : > { %v3619_v40 = vadd.f32 %v3618_v54, %v2365_v4  ;;  %v5781_v63 = vpop.eup %5780 }
 0x6de   : > { %v3620_v26 = vpop.f32.mrf.mxu0 }
 0x6df   : > { %v3621_v61 = vadd.f32 %v3620_v26, %v2369_v42 }
 0x6e0   : > { %v3622_v5 = vpop.f32.mrf.mxu0 }
 0x6e2   : > { %v3623_v55 = vpop.f32.mrf.mxu0 }
 0x6e3   : > { %v890_v55 = vld [vmem:[%s864_s1] sm:$0xff] }
 0x6e4   : > { %v3704_v46 = vmul.f32 %v5781_v63, %v890_v55 }
 0x6fb   : > { %v3536_v33 = vpop.f32.mrf.mxu1 }
 0x6fc   : > { %v3537_v22 = vadd.f32 %v3536_v33, %v2357_v44 }
 0x6fd   : > { %v3538_v56 = vpop.f32.mrf.mxu1 }
 0x6fe   : > { %v3539_v58 = vadd.f32 %v3538_v56, %v2361_v51  ;;  %v3578_v2 = vadd.f32 %v7468_v48, %v3537_v22 }
 0x6ff   : > { %v3540_v35 = vpop.f32.mrf.mxu1 }
 0x700   : > { %v3580_v62 = vadd.f32 %v7471_v1, %v3539_v58  ;;  %v5379_v15 = vmul.f32 -1.442695, %v3578_v2 }
 0x701   : > { %v3541_v24 = vpop.f32.mrf.mxu1 }
 0x702   : > { %v5380_v17 = vmul.f32 -1.442695, %v3580_v62  ;;  %5782 = vpow2.f32 %v5379_v15 }
 0x703   : > { %5784 = vrcp.f32 %v3687_v31 }
 0x704   : > { %5786 = vpow2.f32 %v5380_v17 }
 0x70f   : > { %v5783_v54 = vpop.eup %5782 }
 0x710   : > { %v5785_v5 = vpop.eup %5784  ;;  %v3688_v56 = vadd.f32 1.0, %v5783_v54 }
 0x711   : > { %v5787_v33 = vpop.eup %5786  ;;  %v3707_v44 = vmul.f32 %v5785_v5, %v890_v55 }
 0x712   : > { %v3689_v43 = vadd.f32 1.0, %v5787_v33 }
 0x71b   : > { %v3659_v48 = vpop.f32.mrf.mxu1 }
 0x71c   : > { %v3660_v3 = vadd.f32 %v3659_v48, %v3619_v40  ;;  %v5406_v40 = vld [vmem:[%s6795_s23 + $0x1] ss:$0 sm:$0xff] }
 0x71d   : > { %v3661_v1 = vpop.f32.mrf.mxu1 }
 0x71e   : > { %5788 = vtanh.f32 %v3660_v3  ;;  %v3662_v34 = vadd.f32 %v3661_v1, %v3621_v61 }
 0x71f   : > { %5790 = vrcp.f32 %v3685_v8  ;;  %v3663_v10 = vpop.f32.mrf.mxu1 }
 0x720   : > { %5792 = vtanh.f32 %v3662_v34 }
 0x721   : > { %v3664_v18 = vpop.f32.mrf.mxu1  ;;  %5794 = vrcp.f32 %v3688_v56 }
 0x72b   : > { %v5789_v26 = vpop.eup %5788 }
 0x72c   : > { %v5791_v35 = vpop.eup %5790  ;;  %v3705_v24 = vmul.f32 %v5789_v26, %v5779_v47 }
 0x72d   : > { %v5793_v14 = vpop.eup %5792 }
 0x72e   : > { %v3706_v29 = vadd.f32 %v3705_v24, %v3704_v46  ;;  %v3708_v51 = vmul.f32 %v5793_v14, %v5791_v35  ;;  %v5795_v7 = vpop.eup %5794 }
 0x730   : > { %5796 = vtanh.f32 %v3706_v29  ;;  %v3709_v22 = vadd.f32 %v3708_v51, %v3707_v44 }
 0x731   : > { %5798 = vrcp.f32 %v3689_v43 }
 0x732   : > { %v3710_v58 = vadd.f32 %v3709_v22, %v3706_v29  ;;  %5800 = vtanh.f32 %v3709_v22 }
 0x734   : > { %v3711_v6 = vmul.f32 0.5, %v3710_v58 }
 0x736   : > { %4766 = vst [vmem:[%s872_s14] sm:$0xff] %v3711_v6 }
 0x73d   : > { %v5797_v2 = vpop.eup %5796 }
 0x73e   : > { %v5799_v4 = vpop.eup %5798  ;;  %v3713_v28 = vmul.f32 %v5797_v2, %v5795_v7 }
 0x73f   : > { %v5801_v53 = vpop.eup %5800 }
 0x740   : > { %v3715_v62 = vmul.f32 %v5801_v53, %v5799_v4 }
 0x742   : > { %v3716_v52 = vadd.f32 %v3715_v62, %v3713_v28  ;;  %v7909_v28 = vld [vmem:[#allocation28_spill] sm:$0xff] }
 0x744   : > { %v7514_v15 = vmul.f32 0.5, %v3716_v52 }
 0x746   : > { %v3718_v9 = vpack.c.bf16 %v7514_v15, %v7514_v15 }
 0x748   : > { %5491 = vmatmul.mubr.bf16.vlgmr.msra.gmra.mxu1 %v3718_v9  ;;  %v7910_v9 = vld [vmem:[#allocation27_spill] sm:$0xff] }
 0x808   : > { %v3818_v31 = vpop.f32.mrf.mxu1 }
 0x809   : > { %v3824_v42 = vadd.f32 %v3818_v31, %v6884_v13 }
 0x80a   : > { %v5492_v17 = vpop.f32.mrf.mxu1 }
 0x80b   : > { %v3833_v8 = vadd.f32 %v5406_v40, %v3824_v42  ;;  %v7911_v17 = vld [vmem:[#allocation30_spill] sm:$0xff] }
 0x80c   : > { %v3821_v48 = vpop.f32.mrf.mxu1 }
 0x80d   : > { %v3835_v61 = vcombine.high %v3833_v8, %v3833_v8  ;;  %v3842_v3 = vrot.slane %v3833_v8, %v6905_v39 }
 0x80e   : > { %v5493_v1 = vpop.f32.mrf.mxu1 }
 0x80f   : > { %v3850_v34 = vcombine.high %v3842_v3, %v3842_v3  ;;  %v3858_v10 = vrot.slane %v3842_v3, %v6905_v39  ;;  %v3849_v18 = vrot.slane %v3835_v61, %v6905_v39  ;;  %v7912_v61 = vld [vmem:[#allocation29_spill] sm:$0xff] }
 0x811   : > { %v3872_v47 = vrot.slane %v3850_v34, %v6905_v39  ;;  %v3880_v63 = vcombine.high %v3858_v10, %v3858_v10  ;;  %v3887_v54 = vrot.slane %v3858_v10, %v6911_v49  ;;  %v3865_v13 = vrot.slane %v3849_v18, %v6905_v39 }
 0x812   : > { %v3851_v35 = vcombine.high %v3849_v18, %v3849_v18 }
 0x813   : > { %v3891_v5 = vrot.slane %v3872_v47, %v6911_v49  ;;  %v3895_v55 = vrot.slane %v3880_v63, %v6911_v49  ;;  %v3924_v33 = vadd.f32 %v3887_v54, %v6882_v12  ;;  %v3925_v26 = vadd.f32 %v3887_v54, %v6886_v16 }
 0x814   : > { %v3882_v46 = vcombine.high %v3872_v47, %v3872_v47  ;;  %v3903_v24 = vrot.slane %v3865_v13, %v6911_v49  ;;  %v3879_v29 = vrot.slane %v3851_v35, %v6905_v39  ;;  %v3881_v44 = vcombine.high %v3865_v13, %v3865_v13 }
 0x815   : > { %v3926_v56 = vadd.f32 %v3891_v5, %v6888_v19  ;;  %v3928_v14 = vadd.f32 %v3895_v55, %v6892_v23  ;;  %5802 = vtanh.f32 %v3924_v33  ;;  %v3927_v43 = vadd.f32 %v3891_v5, %v6890_v21 }
 0x816   : > { %5804 = vtanh.f32 %v3925_v26  ;;  %v3899_v12 = vrot.slane %v3882_v46, %v6911_v49  ;;  %v3932_v16 = vadd.f32 %v3903_v24, %v6907_v41  ;;  %v3929_v19 = vadd.f32 %v3895_v55, %v6894_v25  ;;  %v5408_v41 = vld [vmem:[%s6797_s17 + $0x1] ss:$0 sm:$0xff]  ;;  %v7908_v25 = vld [vmem:[#allocation26_spill] sm:$0xff] }
 0x817   : > { %5806 = vtanh.f32 %v3926_v56  ;;  %v3907_v51 = vrot.slane %v3879_v29, %v6911_v49  ;;  %v3933_v21 = vadd.f32 %v3903_v24, %v6913_v50  ;;  %v3883_v22 = vcombine.high %v3879_v29, %v3879_v29 }
 0x818   : > { %5808 = vtanh.f32 %v3928_v14  ;;  %v3930_v23 = vadd.f32 %v3899_v12, %v6896_v30  ;;  %v3911_v39 = vrot.slane %v3881_v44, %v6911_v49  ;;  %v3931_v2 = vadd.f32 %v3899_v12, %v7908_v25 }
 0x819   : > { %5810 = vtanh.f32 %v3927_v43  ;;  %v3934_v58 = vadd.f32 %v3907_v51, %v6919_v59  ;;  %v3915_v30 = vrot.slane %v3883_v22, %v6911_v49  ;;  %v3935_v59 = vadd.f32 %v3907_v51, %v7910_v9 }
 0x81a   : > { %5812 = vtanh.f32 %v3932_v16  ;;  %v3936_v62 = vadd.f32 %v3911_v39, %v7909_v28  ;;  %v3937_v3 = vadd.f32 %v3911_v39, %v7912_v61 }
 0x81b   : > { %5814 = vtanh.f32 %v3929_v19  ;;  %v3938_v8 = vadd.f32 %v3915_v30, %v7911_v17  ;;  %v3939_v63 = vadd.f32 %v3915_v30, %v7338_v32 }
 0x81c   : > { %5816 = vtanh.f32 %v3930_v23 }
 0x81d   : > { %5818 = vtanh.f32 %v3933_v21 }
 0x81e   : > { %5820 = vtanh.f32 %v3934_v58 }
 0x81f   : > { %5822 = vtanh.f32 %v3931_v2 }
 0x820   : > { %5824 = vtanh.f32 %v3936_v62 }
 0x821   : > { %5826 = vtanh.f32 %v3935_v59 }
 0x822   : > { %v5803_v6 = vpop.eup %5802  ;;  %5828 = vtanh.f32 %v3938_v8 }
 0x823   : > { %v5805_v7 = vpop.eup %5804  ;;  %v3964_v4 = vmul.f32 %v5803_v6, %v5408_v41  ;;  %5830 = vtanh.f32 %v3937_v3 }
 0x824   : > { %v5807_v53 = vpop.eup %5806  ;;  %v3965_v50 = vmul.f32 %v5805_v7, %v5408_v41  ;;  %5832 = vtanh.f32 %v3939_v63 }
 0x825   : > { %3980 = vadd.xlane.f32.xlu0 %v3964_v4  ;;  %v5809_v52 = vpop.eup %5808  ;;  %v3966_v31 = vmul.f32 %v5807_v53, %v5408_v41 }
 0x826   : > { %3982 = vadd.xlane.f32.xlu1 %v3965_v50  ;;  %v5811_v40 = vpop.eup %5810  ;;  %v3968_v42 = vmul.f32 %v5809_v52, %v5408_v41 }
 0x827   : > { %v5813_v48 = vpop.eup %5812  ;;  %v3967_v1 = vmul.f32 %v5811_v40, %v5408_v41 }
 0x828   : > { %v5815_v34 = vpop.eup %5814  ;;  %v3972_v10 = vmul.f32 %v5813_v48, %v5408_v41 }
 0x829   : > { %3984 = vadd.xlane.f32.xlu0 %v3966_v31  ;;  %v5817_v18 = vpop.eup %5816  ;;  %v3969_v47 = vmul.f32 %v5815_v34, %v5408_v41 }
 0x82a   : > { %3988 = vadd.xlane.f32.xlu1 %v3968_v42  ;;  %v5819_v54 = vpop.eup %5818  ;;  %v3970_v5 = vmul.f32 %v5817_v18, %v5408_v41 }
 0x82b   : > { %v5821_v13 = vpop.eup %5820  ;;  %v3973_v55 = vmul.f32 %v5819_v54, %v5408_v41 }
 0x82c   : > { %v5823_v33 = vpop.eup %5822  ;;  %v3974_v26 = vmul.f32 %v5821_v13, %v5408_v41 }
 0x82d   : > { %3986 = vadd.xlane.f32.xlu0 %v3967_v1  ;;  %v5825_v56 = vpop.eup %5824  ;;  %v3971_v35 = vmul.f32 %v5823_v33, %v5408_v41 }
 0x82e   : > { %3996 = vadd.xlane.f32.xlu1 %v3972_v10  ;;  %v5827_v46 = vpop.eup %5826  ;;  %v3976_v24 = vmul.f32 %v5825_v56, %v5408_v41 }
 0x82f   : > { %v5829_v14 = vpop.eup %5828  ;;  %v3975_v43 = vmul.f32 %v5827_v46, %v5408_v41 }
 0x830   : > { %v5831_v32 = vpop.eup %5830  ;;  %v3978_v29 = vmul.f32 %v5829_v14, %v5408_v41 }
 0x831   : > { %3990 = vadd.xlane.f32.xlu0 %v3969_v47  ;;  %v3977_v12 = vmul.f32 %v5831_v32, %v5408_v41  ;;  %v5833_v16 = vpop.eup %5832 }
 0x832   : > { %3992 = vadd.xlane.f32.xlu1 %v3970_v5  ;;  %v3979_v19 = vmul.f32 %v5833_v16, %v5408_v41 }
 0x835   : > { %3998 = vadd.xlane.f32.xlu0 %v3973_v55 }
 0x836   : > { %4000 = vadd.xlane.f32.xlu1 %v3974_v26 }
 0x839   : > { %3994 = vadd.xlane.f32.xlu0 %v3971_v35 }
 0x83a   : > { %4004 = vadd.xlane.f32.xlu1 %v3976_v24 }
 0x83d   : > { %4002 = vadd.xlane.f32.xlu0 %v3975_v43 }
 0x83e   : > { %4008 = vadd.xlane.f32.xlu1 %v3978_v29 }
 0x841   : > { %4006 = vadd.xlane.f32.xlu0 %v3977_v12 }
 0x845   : > { %4010 = vadd.xlane.f32.xlu0 %v3979_v19 }
 0x8ae   : > { %v3981_v44 = vpop.xlane.xlu0 %3980 }
 0x8af   : > { %v3983_v51 = vpop.xlane.xlu1 %3982  ;;  %v4031_v30 = vrot.slane %v3981_v44, %v6982_v60 }
 0x8b0   : > { %v4035_v53 = vrot.slane %v3983_v51, %v6977_v57 }
 0x8b2   : > { %v7551_v23 = vpop.xlane.xlu0 %3984  ;;  %v4036_v42 = vsel %vm1581_vm1, %v4035_v53, %v4031_v30 }
 0x8b3   : > { %v7553_v21 = vpop.xlane.xlu1 %3988  ;;  %v4040_v28 = vrot.slane %v7551_v23, %v6982_v60 }
 0x8b4   : > { %v4049_v50 = vrot.slane %v7553_v21, %v6982_v60 }
 0x8b6   : > { %v3987_v22 = vpop.xlane.xlu0 %3986 }
 0x8b7   : > { %v7555_v39 = vpop.xlane.xlu1 %3996  ;;  %v4044_v41 = vrot.slane %v3987_v22, %v6977_v57 }
 0x8b8   : > { %v4067_v18 = vrot.slane %v7555_v39, %v6982_v60 }
 0x8b9   : > { %v4045_v59 = vsel %vm1581_vm1, %v4044_v41, %v4040_v28 }
 0x8ba   : > { %v7557_v58 = vpop.xlane.xlu0 %3990  ;;  %v4100_v48 = vsel %vm1646_vm2, %v4045_v59, %v4036_v42 }
 0x8bb   : > { %v7559_v6 = vpop.xlane.xlu1 %3992  ;;  %v4053_v4 = vrot.slane %v7557_v58, %v6977_v57 }
 0x8bc   : > { %v4058_v31 = vrot.slane %v7559_v6, %v6982_v60 }
 0x8bd   : > { %v4054_v40 = vsel %vm1581_vm1, %v4053_v4, %v4049_v50 }
 0x8be   : > { %v7561_v7 = vpop.xlane.xlu0 %3998  ;;  %v4101_v1 = vsel %vm1648_vm3, %v4054_v40, %v4100_v48 }
 0x8bf   : > { %v7563_v25 = vpop.xlane.xlu1 %4000  ;;  %v4071_v61 = vrot.slane %v7561_v7, %v6977_v57 }
 0x8c0   : > { %v4076_v34 = vrot.slane %v7563_v25, %v6982_v60 }
 0x8c1   : > { %v4072_v13 = vsel %vm1581_vm1, %v4071_v61, %v4067_v18 }
 0x8c2   : > { %v7565_v2 = vpop.xlane.xlu0 %3994 }
 0x8c3   : > { %v4062_v62 = vrot.slane %v7565_v2, %v6977_v57  ;;  %v7578_v52 = vpop.xlane.xlu1 %4004 }
 0x8c4   : > { %v4085_v63 = vrot.slane %v7578_v52, %v6982_v60 }
 0x8c5   : > { %v4063_v17 = vsel %vm1581_vm1, %v4062_v62, %v4058_v31 }
 0x8c6   : > { %v7580_v9 = vpop.xlane.xlu0 %4002  ;;  %v4102_v47 = vsel %vm1650_vm4, %v4063_v17, %v4101_v1 }
 0x8c7   : > { %v4080_v8 = vrot.slane %v7580_v9, %v6977_v57  ;;  %v7605_v54 = vpop.xlane.xlu1 %4008  ;;  %v4103_v35 = vsel %vm1652_vm5, %v4072_v13, %v4102_v47 }
 0x8c8   : > { %v4094_v26 = vrot.slane %v7605_v54, %v6982_v60 }
 0x8c9   : > { %v4081_v5 = vsel %vm1581_vm1, %v4080_v8, %v4076_v34 }
 0x8ca   : > { %v7593_v3 = vpop.xlane.xlu0 %4006  ;;  %v4104_v46 = vsel %vm1654_vm6, %v4081_v5, %v4103_v35 }
 0x8cb   : > { %v4089_v10 = vrot.slane %v7593_v3, %v6977_v57 }
 0x8cd   : > { %v4090_v33 = vsel %vm1581_vm1, %v4089_v10, %v4085_v63 }
 0x8ce   : > { %v7609_v55 = vpop.xlane.xlu0 %4010  ;;  %v4105_v14 = vsel %vm1656_vm7, %v4090_v33, %v4104_v46 }
 0x8cf   : > { %v4098_v56 = vrot.slane %v7609_v55, %v6977_v57 }
 0x8d1   : > { %v4099_v24 = vsel %vm1581_vm1, %v4098_v56, %v4094_v26 }
 0x8d2   : > { %v4106_v43 = vsel %vm1658_vm8, %v4099_v24, %v4105_v14 }
 0x8d3   : > { %v4108_v32 = vsel %vm1661_vm9, %v4106_v43, -inf }
 0x8d4   : > { %4109 = vmax.xlane.f32.xlu1 %v4108_v32 }
 0x95d   : > { %v4110_v29 = vpop.xlane.xlu1 %4109 }
 0x95e   : > { %v4115_v12 = vrot.slane %v4110_v29, %v6911_v49  ;;  %v4119_v16 = vrot.slane %v4110_v29, %v7042_v11  ;;  %v4123_v4 = vrot.slane %v4110_v29, %v7052_v36  ;;  %v4127_v50 = vrot.slane %v4110_v29, %v7070_v0 }
 0x95f   : > { %v4135_v8 = vrot.slane %v4110_v29, %v7047_v20  ;;  %v4139_v1 = vrot.slane %v4110_v29, %v7056_v38 }
 0x960   : > { %v4152_v19 = vsub.f32 %v3981_v44, %v4115_v12  ;;  %v4153_v41 = vsub.f32 %v3983_v51, %v4115_v12  ;;  %v4155_v53 = vsub.f32 %v3987_v22, %v4119_v16  ;;  %v4154_v30 = vsub.f32 %v7551_v23, %v4119_v16 }
 0x961   : > { %v4157_v59 = vsub.f32 %v7557_v58, %v4123_v4  ;;  %v4156_v40 = vsub.f32 %v7553_v21, %v4123_v4  ;;  %v4131_v44 = vrot.slane %v4110_v29, %v7078_v27  ;;  %v4159_v51 = vsub.f32 %v7565_v2, %v4127_v50 }
 0x962   : > { %v4168_v28 = vmul.f32 1.442695, %v4152_v19  ;;  %v4170_v62 = vmul.f32 1.442695, %v4153_v41  ;;  %v4174_v31 = vmul.f32 1.442695, %v4155_v53  ;;  %v4158_v23 = vsub.f32 %v7559_v6, %v4127_v50 }
 0x963   : > { %v4172_v42 = vmul.f32 1.442695, %v4154_v30  ;;  %v4178_v22 = vmul.f32 1.442695, %v4157_v59  ;;  %v4176_v17 = vmul.f32 1.442695, %v4156_v40  ;;  %v4161_v58 = vsub.f32 %v7561_v7, %v4131_v44 }
 0x964   : > { %5834 = vpow2.f32 %v4168_v28  ;;  %v4182_v48 = vmul.f32 1.442695, %v4159_v51  ;;  %v4160_v21 = vsub.f32 %v7555_v39, %v4131_v44  ;;  %v4180_v61 = vmul.f32 1.442695, %v4158_v23 }
 0x965   : > { %5836 = vpow2.f32 %v4170_v62  ;;  %v4163_v2 = vsub.f32 %v7580_v9, %v4135_v8  ;;  %v4186_v34 = vmul.f32 1.442695, %v4161_v58  ;;  %v4162_v6 = vsub.f32 %v7563_v25, %v4135_v8 }
 0x966   : > { %5838 = vpow2.f32 %v4174_v31  ;;  %v4184_v18 = vmul.f32 1.442695, %v4160_v21  ;;  %v4143_v39 = vrot.slane %v4110_v29, %v7064_v45  ;;  %v4165_v7 = vsub.f32 %v7593_v3, %v4139_v1 }
 0x967   : > { %5840 = vpow2.f32 %v4172_v42  ;;  %v4190_v9 = vmul.f32 1.442695, %v4163_v2  ;;  %v4164_v5 = vsub.f32 %v7578_v52, %v4139_v1  ;;  %v4188_v25 = vmul.f32 1.442695, %v4162_v6 }
 0x968   : > { %5842 = vpow2.f32 %v4178_v22  ;;  %v4167_v33 = vsub.f32 %v7609_v55, %v4143_v39  ;;  %v4194_v26 = vmul.f32 1.442695, %v4165_v7  ;;  %v4166_v3 = vsub.f32 %v7605_v54, %v4143_v39 }
 0x969   : > { %5844 = vpow2.f32 %v4176_v17  ;;  %v4192_v35 = vmul.f32 1.442695, %v4164_v5 }
 0x96a   : > { %5846 = vpow2.f32 %v4182_v48  ;;  %v4198_v52 = vmul.f32 1.442695, %v4167_v33  ;;  %v4196_v55 = vmul.f32 1.442695, %v4166_v3 }
 0x96b   : > { %5848 = vpow2.f32 %v4180_v61 }
 0x96c   : > { %5850 = vpow2.f32 %v4186_v34 }
 0x96d   : > { %5852 = vpow2.f32 %v4184_v18 }
 0x96e   : > { %5854 = vpow2.f32 %v4190_v9 }
 0x96f   : > { %5856 = vpow2.f32 %v4188_v25 }
 0x970   : > { %5858 = vpow2.f32 %v4194_v26 }
 0x971   : > { %v7637_v10 = vpop.eup %5834  ;;  %5860 = vpow2.f32 %v4192_v35 }
 0x972   : > { %v7640_v47 = vpop.eup %5836  ;;  %4217 = vperm.xlu0 %5631, %v7637_v10   ;;  %5862 = vpow2.f32 %v4198_v52 }
 0x973   : > { %4220 = vperm.xlu1 %5630, %v7640_v47   ;;  %v7646_v63 = vpop.eup %5838  ;;  %5864 = vpow2.f32 %v4196_v55 }
 0x974   : > { %v7649_v13 = vpop.eup %5840 }
 0x975   : > { %v7654_v56 = vpop.eup %5842 }
 0x976   : > { %4226 = vperm.xlu0 %5631, %v7646_v63   ;;  %v7657_v46 = vpop.eup %5844 }
 0x977   : > { %4223 = vperm.xlu1 %5630, %v7649_v13   ;;  %v7661_v24 = vpop.eup %5846 }
 0x978   : > { %v7663_v14 = vpop.eup %5848 }
 0x979   : > { %v7667_v54 = vpop.eup %5850 }
 0x97a   : > { %4232 = vperm.xlu0 %5631, %v7654_v56   ;;  %v7669_v43 = vpop.eup %5852 }
 0x97b   : > { %4229 = vperm.xlu1 %5630, %v7657_v46   ;;  %v7673_v32 = vpop.eup %5854 }
 0x97c   : > { %v7675_v29 = vpop.eup %5856 }
 0x97d   : > { %v7679_v12 = vpop.eup %5858 }
 0x97e   : > { %4238 = vperm.xlu0 %5631, %v7661_v24   ;;  %v7681_v16 = vpop.eup %5860 }
 0x97f   : > { %4235 = vperm.xlu1 %5630, %v7663_v14   ;;  %v7685_v19 = vpop.eup %5862 }
 0x980   : > { %v5865_v41 = vpop.eup %5864 }
 0x982   : > { %4244 = vperm.xlu0 %5631, %v7667_v54  }
 0x983   : > { %4241 = vperm.xlu1 %5630, %v7669_v43  }
 0x986   : > { %4250 = vperm.xlu0 %5631, %v7673_v32  }
 0x987   : > { %4247 = vperm.xlu1 %5630, %v7675_v29  }
 0x98a   : > { %4256 = vperm.xlu0 %5631, %v7679_v12  }
 0x98b   : > { %4253 = vperm.xlu1 %5630, %v7681_v16  }
 0x98e   : > { %4262 = vperm.xlu0 %5631, %v7685_v19  }
 0x98f   : > { %4259 = vperm.xlu1 %5630, %v5865_v41  }
 0x9ed   : > { %v4218_v4 = vpop.permute.xlu0 %4217 }
 0x9ee   : > { %v4221_v53 = vpop.permute.xlu1 %4220  ;;  %v4267_v48 = vrot.slane %v4218_v4, %v6982_v60 }
 0x9ef   : > { %v4271_v58 = vrot.slane %v4221_v53, %v6977_v57 }
 0x9f1   : > { %v4227_v30 = vpop.permute.xlu0 %4226  ;;  %v4272_v25 = vsel %vm1581_vm1, %v4271_v58, %v4267_v48 }
 0x9f2   : > { %v4224_v28 = vpop.permute.xlu1 %4223  ;;  %v4280_v51 = vrot.slane %v4227_v30, %v6977_v57 }
 0x9f3   : > { %v4276_v44 = vrot.slane %v4224_v28, %v6982_v60 }
 0x9f5   : > { %v4233_v62 = vpop.permute.xlu0 %4232  ;;  %v4281_v34 = vsel %vm1581_vm1, %v4280_v51, %v4276_v44 }
 0x9f6   : > { %v4230_v50 = vpop.permute.xlu1 %4229  ;;  %v4289_v17 = vrot.slane %v4233_v62, %v6977_v57  ;;  %v4336_v3 = vsel %vm1646_vm2, %v4281_v34, %v4272_v25  ;;  %v5889_v25 = vld [vmem:[#allocation5 + $0x10] sm:$0xff] }
 0x9f7   : > { %v4285_v23 = vrot.slane %v4230_v50, %v6982_v60 }
 0x9f9   : > { %v4239_v59 = vpop.permute.xlu0 %4238  ;;  %v4290_v7 = vsel %vm1581_vm1, %v4289_v17, %v4285_v23 }
 0x9fa   : > { %v4236_v31 = vpop.permute.xlu1 %4235  ;;  %v4298_v61 = vrot.slane %v4239_v59, %v6977_v57  ;;  %v4337_v52 = vsel %vm1648_vm3, %v4290_v7, %v4336_v3  ;;  %v5888_v7 = vld [vmem:[#allocation5 + $0x18] sm:$0xff] }
 0x9fb   : > { %v4294_v21 = vrot.slane %v4236_v31, %v6982_v60 }
 0x9fd   : > { %v4245_v40 = vpop.permute.xlu0 %4244  ;;  %v4299_v33 = vsel %vm1581_vm1, %v4298_v61, %v4294_v21 }
 0x9fe   : > { %v4242_v42 = vpop.permute.xlu1 %4241  ;;  %v4307_v2 = vrot.slane %v4245_v40, %v6977_v57  ;;  %v4338_v53 = vsel %vm1650_vm4, %v4299_v33, %v4337_v52 }
 0x9ff   : > { %v4303_v1 = vrot.slane %v4242_v42, %v6982_v60 }
 0xa01   : > { %v4251_v22 = vpop.permute.xlu0 %4250  ;;  %v4308_v35 = vsel %vm1581_vm1, %v4307_v2, %v4303_v1 }
 0xa02   : > { %v4248_v8 = vpop.permute.xlu1 %4247  ;;  %v4316_v18 = vrot.slane %v4251_v22, %v6977_v57  ;;  %v4339_v50 = vsel %vm1652_vm5, %v4308_v35, %v4338_v53  ;;  %v5891_v35 = vld [vmem:[#allocation5 + $0x28] sm:$0xff] }
 0xa03   : > { %v4312_v6 = vrot.slane %v4248_v8, %v6982_v60 }
 0xa05   : > { %v4257_v39 = vpop.permute.xlu0 %4256  ;;  %v4317_v55 = vsel %vm1581_vm1, %v4316_v18, %v4312_v6 }
 0xa06   : > { %v4254_v9 = vpop.permute.xlu1 %4253  ;;  %v4325_v5 = vrot.slane %v4257_v39, %v6977_v57  ;;  %v4340_v31 = vsel %vm1654_vm6, %v4317_v55, %v4339_v50  ;;  %v5894_v50 = vld [vmem:[#allocation5 + $0x30] sm:$0xff] }
 0xa07   : > { %v4321_v26 = vrot.slane %v4254_v9, %v6982_v60 }
 0xa09   : > { %v4263_v4 = vpop.permute.xlu0 %4262  ;;  %v4326_v30 = vsel %vm1581_vm1, %v4325_v5, %v4321_v26  ;;  %v5890_v26 = vld [vmem:[#allocation5 + $0x8] sm:$0xff] }
 0xa0a   : > { %v4260_v28 = vpop.permute.xlu1 %4259  ;;  %v4334_v62 = vrot.slane %v4263_v4, %v6977_v57  ;;  %v4341_v42 = vsel %vm1656_vm7, %v4326_v30, %v4340_v31  ;;  %v5892_v4 = vld [vmem:[#allocation5] sm:$0xff]  ;;  %v5895_v31 = vld [vmem:[#allocation5 + $0x38] sm:$0xff] }
 0xa0b   : > { %v4330_v59 = vrot.slane %v4260_v28, %v6982_v60 }
 0xa0d   : > { %v4335_v40 = vsel %vm1581_vm1, %v4334_v62, %v4330_v59 }
 0xa0e   : > { %v4342_v44 = vsel %vm1658_vm8, %v4335_v40, %v4341_v42 }
 0xa0f   : > { %v4344_v51 = vsel %vm1661_vm9, %v4342_v44, 0.0 }
 0xa10   : > { %4345 = vadd.xlane.f32.xlu1 %v4344_v51 }
 0xa99   : > { %v4346_v22 = vpop.xlane.xlu1 %4345 }
 0xa9a   : > { %5866 = vrcp.f32 %v4346_v22 }
 0xaa7   : > { %v5867_v23 = vpop.eup %5866 }
 0xaa8   : > { %v4368_v57 = vrot.slane %v5867_v23, %v7078_v27  ;;  %v4356_v17 = vrot.slane %v5867_v23, %v7042_v11  ;;  %v4380_v58 = vrot.slane %v5867_v23, %v7064_v45  ;;  %v4360_v61 = vrot.slane %v5867_v23, %v7052_v36 }
 0xaa9   : > { %v4352_v27 = vrot.slane %v5867_v23, %v6911_v49  ;;  %v4372_v49 = vrot.slane %v5867_v23, %v7047_v20 }
 0xaaa   : > { %v4398_v60 = vmul.f32 %v7667_v54, %v4368_v57  ;;  %v4391_v8 = vmul.f32 %v7649_v13, %v4356_v17  ;;  %v4403_v48 = vmul.f32 %v5865_v41, %v4380_v58  ;;  %v4392_v21 = vmul.f32 %v7646_v63, %v4356_v17 }
 0xaab   : > { %v4393_v1 = vmul.f32 %v7657_v46, %v4360_v61  ;;  %v4394_v11 = vmul.f32 %v7654_v56, %v4360_v61  ;;  %v4389_v13 = vmul.f32 %v7637_v10, %v4352_v27  ;;  %v4390_v45 = vmul.f32 %v7640_v47, %v4352_v27 }
 0xaac   : > { %4452 = vperm.xlu1 %5630, %v4398_v60   ;;  %4417 = vperm.xlu0 %5631, %v4391_v8   ;;  %v4364_v54 = vrot.slane %v5867_v23, %v7070_v0  ;;  %v4397_v56 = vmul.f32 %v7669_v43, %v4368_v57  ;;  %v4399_v10 = vmul.f32 %v7675_v29, %v4372_v49  ;;  %v5697_v43 = vld [vmem:[%s6803_s16 + $0x30] sm:$0xff]   ;;  %v5700_v29 = vld [vmem:[%s6803_s16 + $0x18] sm:$0xff]  }
 0xaad   : > { %v4400_v0 = vmul.f32 %v7673_v32, %v4372_v49  ;;  %v4376_v47 = vrot.slane %v5867_v23, %v7056_v38  ;;  %v4404_v20 = vmul.f32 %v7685_v19, %v4380_v58  ;;  %v5698_v38 = vld [vmem:[%s6803_s16 + $0x28] sm:$0xff]   ;;  %v5699_v32 = vld [vmem:[%s6803_s16 + $0x20] sm:$0xff]   ;;  %v5896_v57 = vld [vmem:[#allocation5 + $0x48] sm:$0xff] }
 0xaae   : > { %v4395_v36 = vmul.f32 %v7663_v14, %v4364_v54  ;;  %v4396_v63 = vmul.f32 %v7661_v24, %v4364_v54  ;;  %v5696_v14 = vld [vmem:[%s6803_s16 + $0x38] sm:$0xff]   ;;  %v5703_v19 = vld [vmem:[%s6803_s16] sm:$0xff]   ;;  %v5897_v58 = vld [vmem:[#allocation5 + $0x40] sm:$0xff] }
 0xaaf   : > { %v4401_v46 = vmul.f32 %v7681_v16, %v4376_v47  ;;  %v4402_v24 = vmul.f32 %v7679_v12, %v4376_v47  ;;  %5495 = vmatpush3.bf16.msra.mxu0 %v5696_v14  ;;  %v5701_v12 = vld [vmem:[%s6803_s16 + $0x10] sm:$0xff]   ;;  %v5702_v16 = vld [vmem:[%s6803_s16 + $0x8] sm:$0xff]  }
 0xab0   : > { %4477 = vperm.xlu1 %5630, %v4403_v48   ;;  %4422 = vperm.xlu0 %5631, %v4392_v21  }
 0xab1   : > { %5496 = vmatprep.subr.bf16.mxu0 %v7905_v37 }
 0xab3   : > { %5497 = vmatpush3.bf16.msra.mxu0 %v5697_v43 }
 0xab4   : > { %4427 = vperm.xlu0 %5631, %v4393_v1   ;;  %5498 = vmatprep.subr.bf16.mxu0 %v7905_v37 }
 0xab7   : > { %5499 = vmatpush3.bf16.msra.mxu0 %v5698_v38 }
 0xab8   : > { %4432 = vperm.xlu0 %5631, %v4394_v11   ;;  %5500 = vmatprep.subr.bf16.mxu0 %v7905_v37 }
 0xabb   : > { %5501 = vmatpush3.bf16.msra.mxu0 %v5699_v32 }
 0xabc   : > { %4407 = vperm.xlu0 %5631, %v4389_v13   ;;  %5502 = vmatprep.subr.bf16.mxu0 %v7905_v37 }
 0xabf   : > { %5503 = vmatpush3.bf16.msra.mxu0 %v5700_v29 }
 0xac0   : > { %4412 = vperm.xlu0 %5631, %v4390_v45   ;;  %5504 = vmatprep.subr.bf16.mxu0 %v7905_v37 }
 0xac3   : > { %5505 = vmatpush3.bf16.msra.mxu0 %v5701_v12 }
 0xac4   : > { %4437 = vperm.xlu0 %5631, %v4395_v36   ;;  %5506 = vmatprep.subr.bf16.mxu0 %v7905_v37 }
 0xac7   : > { %5507 = vmatpush3.bf16.msra.mxu0 %v5702_v16 }
 0xac8   : > { %4442 = vperm.xlu0 %5631, %v4396_v63   ;;  %5508 = vmatprep.subr.bf16.mxu0 %v7905_v37  ;;  %v5893_v37 = vld [vmem:[#allocation5 + $0x20] sm:$0xff] }
 0xacb   : > { %5509 = vmatpush3.bf16.msra.mxu0 %v5703_v19 }
 0xacc   : > { %4447 = vperm.xlu0 %5631, %v4397_v56  }
 0xad0   : > { %4457 = vperm.xlu0 %5631, %v4399_v10  }
 0xad4   : > { %4462 = vperm.xlu0 %5631, %v4400_v0   ;;  %v5898_v0 = vld [vmem:[#allocation5 + $0x50] sm:$0xff] }
 0xad8   : > { %4467 = vperm.xlu0 %5631, %v4401_v46   ;;  %v5899_v46 = vld [vmem:[#allocation5 + $0x58] sm:$0xff] }
 0xadc   : > { %4472 = vperm.xlu0 %5631, %v4402_v24  }
 0xae0   : > { %4482 = vperm.xlu0 %5631, %v4404_v20  }
 0xb27   : > { %v4418_v41 = vpop.permute.xlu0 %4417  ;;  %v4453_v42 = vpop.permute.xlu1 %4452 }
 0xb28   : > { %v4487_v33 = vmul.f32 %v5889_v25, %v4418_v41  ;;  %v4494_v17 = vmul.f32 %v5896_v57, %v4453_v42 }
 0xb2b   : > { %v4423_v2 = vpop.permute.xlu0 %4422 }
 0xb2c   : > { %v4488_v9 = vmul.f32 %v5888_v7, %v4423_v2 }
 0xb2e   : > { %v4508_v55 = vadd.f32 %v4488_v9, %v4487_v33  ;;  %v5900_v33 = vld [vmem:[#allocation5 + $0x60] sm:$0xff] }
 0xb2f   : > { %v4428_v34 = vpop.permute.xlu0 %4427 }
 0xb30   : > { %v4489_v30 = vmul.f32 %v5893_v37, %v4428_v34  ;;  %v4509_v51 = vrot.slane %v4508_v55, 4  ;;  %v4558_v37 = vrot.slane %v7514_v15, 1 }
 0xb32   : > { %v4510_v61 = vadd.f32 %v4509_v51, %v4508_v55 }
 0xb33   : > { %v4433_v6 = vpop.permute.xlu0 %4432 }
 0xb34   : > { %v4490_v52 = vmul.f32 %v5891_v35, %v4433_v6  ;;  %v4511_v36 = vrot.slane %v4510_v61, 2 }
 0xb36   : > { %v4515_v44 = vadd.f32 %v4490_v52, %v4489_v30  ;;  %v4512_v43 = vadd.f32 %v4511_v36, %v4510_v61  ;;  %v4562_v61 = vrot.slane %v7514_v15, 5 }
 0xb37   : > { %v4408_v18 = vpop.permute.xlu0 %4407 }
 0xb38   : > { %v4485_v53 = vmul.f32 %v5892_v4, %v4408_v18  ;;  %v4516_v21 = vrot.slane %v4515_v44, 4  ;;  %v4513_v2 = vrot.slane %v4512_v43, 1  ;;  %v4478_v18 = vpop.permute.xlu1 %4477  ;;  %v5902_v4 = vld [vmem:[#allocation5 + $0x70] sm:$0xff] }
 0xb3a   : > { %v4517_v54 = vadd.f32 %v4516_v21, %v4515_v44  ;;  %v4514_v52 = vadd.f32 %v4513_v2, %v4512_v43  ;;  %v4563_v43 = vrot.slane %v7514_v15, 6 }
 0xb3b   : > { %v4413_v39 = vpop.permute.xlu0 %4412 }
 0xb3c   : > { %v4486_v3 = vmul.f32 %v5890_v26, %v4413_v39  ;;  %v4518_v20 = vrot.slane %v4517_v54, 2 }
 0xb3e   : > { %v4501_v62 = vadd.f32 %v4486_v3, %v4485_v53  ;;  %v4519_v19 = vadd.f32 %v4518_v20, %v4517_v54  ;;  %v5901_v3 = vld [vmem:[#allocation5 + $0x68] sm:$0xff]  ;;  %v4499_v53 = vmul.f32 %v5902_v4, %v4478_v18 }
 0xb3f   : > { %v4438_v5 = vpop.permute.xlu0 %4437 }
 0xb40   : > { %v4491_v59 = vmul.f32 %v5894_v50, %v4438_v5  ;;  %v4502_v60 = vrot.slane %v4501_v62, 4  ;;  %v4520_v5 = vrot.slane %v4519_v19, 1 }
 0xb42   : > { %v4503_v27 = vadd.f32 %v4502_v60, %v4501_v62  ;;  %v4521_v42 = vadd.f32 %v4520_v5, %v4519_v19  ;;  %v4559_v60 = vrot.slane %v7514_v15, 2 }
 0xb43   : > { %v4443_v28 = vpop.permute.xlu0 %4442 }
 0xb44   : > { %v4492_v40 = vmul.f32 %v5895_v31, %v4443_v28  ;;  %v4504_v49 = vrot.slane %v4503_v27, 2  ;;  %v5903_v31 = vld [vmem:[#allocation5 + $0x78] sm:$0xff] }
 0xb46   : > { %v4522_v22 = vadd.f32 %v4492_v40, %v4491_v59  ;;  %v4505_v29 = vadd.f32 %v4504_v49, %v4503_v27 }
 0xb47   : > { %v4448_v23 = vpop.permute.xlu0 %4447 }
 0xb48   : > { %v4523_v8 = vrot.slane %v4522_v22, 4  ;;  %v4493_v48 = vmul.f32 %v5897_v58, %v4448_v23  ;;  %v4506_v39 = vrot.slane %v4505_v29, 1  ;;  %v4560_v23 = vrot.slane %v7514_v15, 3 }
 0xb4a   : > { %v4529_v1 = vadd.f32 %v4494_v17, %v4493_v48  ;;  %v4524_v13 = vadd.f32 %v4523_v8, %v4522_v22  ;;  %v4507_v62 = vadd.f32 %v4506_v39, %v4505_v29  ;;  %v4574_v22 = vadd.f32 %v4558_v37, %v4514_v52 }
 0xb4b   : > { %v4458_v11 = vpop.permute.xlu0 %4457  ;;  %v4561_v8 = vrot.slane %v7514_v15, 4 }
 0xb4c   : > { %v4530_v45 = vrot.slane %v4529_v1, 4  ;;  %v4525_v10 = vrot.slane %v4524_v13, 2  ;;  %v4495_v47 = vmul.f32 %v5898_v0, %v4458_v11  ;;  %v4573_v48 = vadd.f32 %v4507_v62, %v7514_v15 }
 0xb4d   : > { %v4575_v11 = vadd.f32 %v4559_v60, %v4521_v42  ;;  %v4589_v0 = vrot.slane %v4574_v22, 7 }
 0xb4e   : > { %v4531_v63 = vadd.f32 %v4530_v45, %v4529_v1  ;;  %v4526_v12 = vadd.f32 %v4525_v10, %v4524_v13  ;;  %v4606_v45 = vpack.c.bf16 %v4574_v22, %v4574_v22 }
 0xb4f   : > { %v4463_v56 = vpop.permute.xlu0 %4462  ;;  %v4590_v29 = vsel %vm1646_vm2, %v4589_v0, %v4573_v48 }
 0xb50   : > { %v4496_v24 = vmul.f32 %v5899_v46, %v4463_v56  ;;  %v4532_v14 = vrot.slane %v4531_v63, 2  ;;  %v4527_v7 = vrot.slane %v4526_v12, 1  ;;  %v4605_v56 = vpack.c.bf16 %v4573_v48, %v4573_v48 }
 0xb51   : > { %v4645_v20 = vunpack.c.l.b16 %v4606_v45 }
 0xb52   : > { %v4536_v38 = vadd.f32 %v4496_v24, %v4495_v47  ;;  %v4533_v41 = vadd.f32 %v4532_v14, %v4531_v63  ;;  %v4528_v50 = vadd.f32 %v4527_v7, %v4526_v12  ;;  %v4607_v47 = vpack.c.bf16 %v4575_v11, %v4575_v11 }
 0xb53   : > { %v4468_v32 = vpop.permute.xlu0 %4467  ;;  %v4644_v19 = vunpack.c.l.b16 %v4605_v56 }
 0xb54   : > { %v4537_v16 = vrot.slane %v4536_v38, 4  ;;  %v4534_v25 = vrot.slane %v4533_v41, 1  ;;  %v4497_v26 = vmul.f32 %v5900_v33, %v4468_v32  ;;  %v4576_v21 = vadd.f32 %v4560_v23, %v4528_v50 }
 0xb55   : > { %v4591_v32 = vrot.slane %v4575_v11, 6 }
 0xb56   : > { %v4538_v34 = vadd.f32 %v4537_v16, %v4536_v38  ;;  %v4535_v44 = vadd.f32 %v4534_v25, %v4533_v41  ;;  %v4608_v49 = vpack.c.bf16 %v4576_v21, %v4576_v21  ;;  %v4564_v16 = vrot.slane %v7514_v15, 7 }
 0xb57   : > { %v4473_v6 = vpop.permute.xlu0 %4472  ;;  %v4593_v41 = vrot.slane %v4576_v21, 5  ;;  %v5409_v21 = vld [vmem:[%s760_s24] ss:$0 sm:$0xff] }
 0xb58   : > { %v4539_v9 = vrot.slane %v4538_v34, 2  ;;  %v4498_v35 = vmul.f32 %v5901_v3, %v4473_v6  ;;  %v4577_v27 = vadd.f32 %v4561_v8, %v4535_v44  ;;  %v4647_v2 = vunpack.c.l.b16 %v4608_v49 }
 0xb59   : > { %v4646_v6 = vunpack.c.l.b16 %v4607_v47 }
 0xb5a   : > { %v4540_v55 = vadd.f32 %v4539_v9, %v4538_v34  ;;  %v4543_v30 = vadd.f32 %v4498_v35, %v4497_v26  ;;  %v4609_v46 = vpack.c.bf16 %v4577_v27, %v4577_v27  ;;  %v4595_v18 = vrot.slane %v4577_v27, 4 }
 0xb5b   : > { %v4483_v28 = vpop.permute.xlu0 %4482  ;;  %v4652_v9 = vrot.slane %v4645_v20, 7  ;;  %v4592_v26 = vsel %vm1648_vm3, %v4591_v32, %v4590_v29 }
 0xb5c   : > { %v4541_v59 = vrot.slane %v4540_v55, 1  ;;  %v4500_v40 = vmul.f32 %v5903_v31, %v4483_v28  ;;  %v4544_v51 = vrot.slane %v4543_v30, 4  ;;  %v4648_v39 = vunpack.c.l.b16 %v4609_v46 }
 0xb5d   : > { %v4653_v52 = vsel %vm1646_vm2, %v4652_v9, %v4644_v19  ;;  %v4594_v15 = vsel %vm1650_vm4, %v4593_v41, %v4592_v26 }
 0xb5e   : > { %v4542_v57 = vadd.f32 %v4541_v59, %v4540_v55  ;;  %v4550_v17 = vadd.f32 %v4500_v40, %v4499_v53  ;;  %v4545_v58 = vadd.f32 %v4544_v51, %v4543_v30  ;;  %v4656_v55 = vrot.slane %v4647_v2, 5 }
 0xb5f   : > { %v4654_v53 = vrot.slane %v4646_v6, 6  ;;  %v4596_v37 = vsel %vm1652_vm5, %v4595_v18, %v4594_v15  ;;  %v4658_v30 = vrot.slane %v4648_v39, 4 }
 0xb60   : > { %v4551_v1 = vrot.slane %v4550_v17, 4  ;;  %v4546_v13 = vrot.slane %v4545_v58, 2  ;;  %v4578_v54 = vadd.f32 %v4562_v61, %v4542_v57 }
 0xb61   : > { %v4655_v44 = vsel %vm1648_vm3, %v4654_v53, %v4653_v52 }
 0xb62   : > { %v4552_v36 = vadd.f32 %v4551_v1, %v4550_v17  ;;  %v4547_v63 = vadd.f32 %v4546_v13, %v4545_v58  ;;  %v4610_v14 = vpack.c.bf16 %v4578_v54, %v4578_v54  ;;  %v4597_v5 = vrot.slane %v4578_v54, 3 }
 0xb63   : > { %v4657_v23 = vsel %vm1650_vm4, %v4656_v55, %v4655_v44 }
 0xb64   : > { %v4553_v10 = vrot.slane %v4552_v36, 2  ;;  %v4548_v24 = vrot.slane %v4547_v63, 1  ;;  %v4649_v25 = vunpack.c.l.b16 %v4610_v14  ;;  %v4598_v62 = vsel %vm1654_vm6, %v4597_v5, %v4596_v37 }
 0xb65   : > { %v4659_v57 = vsel %vm1652_vm5, %v4658_v30, %v4657_v23 }
 0xb66   : > { %v4554_v38 = vadd.f32 %v4553_v10, %v4552_v36  ;;  %v4549_v12 = vadd.f32 %v4548_v24, %v4547_v63  ;;  %v4660_v50 = vrot.slane %v4649_v25, 3 }
 0xb68   : > { %v4555_v34 = vrot.slane %v4554_v38, 1  ;;  %v4579_v7 = vadd.f32 %v4563_v43, %v4549_v12  ;;  %v4661_v17 = vsel %vm1654_vm6, %v4660_v50, %v4659_v57 }
 0xb6a   : > { %v4556_v33 = vadd.f32 %v4555_v34, %v4554_v38  ;;  %v4599_v3 = vrot.slane %v4579_v7, 2  ;;  %v4611_v35 = vpack.c.bf16 %v4579_v7, %v4579_v7 }
 0xb6c   : > { %v4580_v4 = vadd.f32 %v4564_v16, %v4556_v33  ;;  %v4650_v28 = vunpack.c.l.b16 %v4611_v35  ;;  %v4600_v40 = vsel %vm1656_vm7, %v4599_v3, %v4598_v62 }
 0xb6e   : > { %v4601_v59 = vrot.slane %v4580_v4, 1  ;;  %v4612_v31 = vpack.c.bf16 %v4580_v4, %v4580_v4  ;;  %v4662_v42 = vrot.slane %v4650_v28, 2 }
 0xb70   : > { %v4602_v51 = vsel %vm1658_vm8, %v4601_v59, %v4600_v40  ;;  %v4651_v22 = vunpack.c.l.b16 %v4612_v31  ;;  %v4663_v8 = vsel %vm1656_vm7, %v4662_v42, %v4661_v17 }
 0xb71   : > { %4604 = vst [vmem:[#allocation2] sm:$0xff] %v4602_v51  ;;  %4767 = vst [vmem:[%s876_s6] sm:$0xff] %v4602_v51 }
 0xb72   : > { %v4664_v60 = vrot.slane %v4651_v22, 1 }
 0xb74   : > { %v4665_v58 = vsel %vm1658_vm8, %v4664_v60, %v4663_v8 }
 0xb75   : > { %v4666_v48 = vpack.c.b16 %v4665_v58, %v4665_v58 }
 0xb77   : > { %5511 = vmatmul.mubr.bf16.vlgmr.msra.gmra.mxu0 %v4666_v48 }
 0xc37   : > { %v4750_v61 = vpop.f32.mrf.mxu0 }
 0xc38   : > { %v4751_v1 = vadd.f32 %v5409_v21, %v4750_v61 }
 0xc39   : > { %v5512_v11 = vpop.f32.mrf.mxu0 }
 0xc3a   : > { %4756 = vmax.xlane.f32.xlu1 %v4751_v1 }
 0xc3b   : > { %v4753_v27 = vpop.f32.mrf.mxu0 }
 0xc3d   : > { %v5513_v13 = vpop.f32.mrf.mxu0 }
 0xcc3   : > { %v4757_v45 = vpop.xlane.xlu1 %4756 }
 0xcc4   : > { %v4758_v54 = vsub.f32 %v4751_v1, %v4757_v45 }
 0xcc6   : > { %v4759_v36 = vmul.f32 1.442695, %v4758_v54 }
 0xcc8   : > { %5868 = vpow2.f32 %v4759_v36 }
 0xcd5   : > { %v5869_v63 = vpop.eup %5868 }
 0xcd6   : > { %4761 = vadd.xlane.f32.xlu0 %v5869_v63 }
 0xd5f   : > { %v4762_v56 = vpop.xlane.xlu0 %4761 }
 0xd60   : > { %5870 = vlog2.f32 %v4762_v56 }
 0xd6d   : > { %v5871_v49 = vpop.eup %5870 }
 0xd6e   : > { %v4764_v10 = vmul.f32 0.6931472, %v5871_v49 }
 0xd70   : > { %v4765_v0 = vadd.f32 %v4764_v10, %v4757_v45 }
 0xd72   : > { %v4768_v47 = vsub.f32 %v4751_v1, %v4765_v0 }
 0xd74   : > { %4769 = vst [vmem:[%s880_s30] sm:$0xff] %v4768_v47 }
 0xd75 PF: > { %s7915_s21 = sld [smem:[#allocation22_spill]] }
 0xd76   : > { %s7916_s18 = sld [smem:[#allocation19_spill]] }
 0xd77   : > { %s7917_s19 = sld [smem:[#allocation20_spill]] }
 0xd78   : > { %s7918_s20 = sld [smem:[#allocation23_spill]] }
 0xd7b   : > { %p25_p6 = scmp.ge.s32.totalorder %s7915_s21, 4  }
 0xd7d   :  { %27 = sbr.rel (!%p25_p6) target bundleno = 18 (0x12), region = 244 }
 0xd82   :  { %4817 = vsyncpa [#allocation4], 1 }
 0xd83   :  { %4819 = vsyncpa [#allocation4 + $0x1], 1 }
 0xd84   :  { %4820 = vsyncpa [#allocation6], 1 }

</bundles_post_ra>
